<compile_context>
chip_gen: v5e
topology: v5e:2x2
jax: 0.10.0
libtpu: 0.0.40
codegen_flags: <defaults>
</compile_context>

<pallas_src>
import numpy as np
import jax
import jax.numpy as jnp
from jax import lax
from jax.experimental import pallas as pl
from jax.experimental.pallas import tpu as pltpu  # noqa: F401  (kept per-convention; no grid/TPU params needed)

# ----------------------- config (consistent with SHA_Context) -----------------------
IN_CHANNELS = 64      # roi_features dim (in_channels / obj_dim)
EMBED_DIM   = 16      # MODEL.ROI_RELATION_HEAD.EMBED_DIM  (GloVe dim)
HIDDEN_DIM  = 32      # MODEL.ROI_RELATION_HEAD.CONTEXT_HIDDEN_DIM
NUM_HEAD    = 2       # TRANSFORMER.NUM_HEAD
K_DIM       = 8       # TRANSFORMER.KEY_DIM
V_DIM       = 8       # TRANSFORMER.VAL_DIM
INNER_DIM   = 64      # TRANSFORMER.INNER_DIM
OBJ_LAYER   = 1       # TRANSFORMER.OBJ_LAYER
EDGE_LAYER  = 1       # TRANSFORMER.REL_LAYER
NUM_OBJ_CLS = 9
BBOX_HID    = 32      # bbox_embed hidden width
POS_DIM     = 128     # bbox_embed output width
BOX_PAD     = 16      # box_info padded from 9 -> 16 lanes
LN_EPS      = 1e-5
NEG_INF     = -1e9

HDK = NUM_HEAD * K_DIM   # 16
HDV = NUM_HEAD * V_DIM   # 16


# -------------------------------------- kernel helpers --------------------------------------

def _mmf(a, b):
    """MXU matmul: bf16 operands, f32 accumulation."""
    return jnp.dot(a.astype(jnp.bfloat16), b.astype(jnp.bfloat16),
                   preferred_element_type=jnp.float32)


def _qkT(q, k):
    """q @ k^T with the transpose folded into the contraction (no materialized XLU transpose)."""
    return lax.dot_general(q.astype(jnp.bfloat16), k.astype(jnp.bfloat16),
                           dimension_numbers=(((1,), (1,)), ((), ())),
                           preferred_element_type=jnp.float32)


def _layer_norm(x, gamma, beta):
    mu = jnp.mean(x, axis=-1, keepdims=True)
    var = jnp.mean((x - mu) ** 2, axis=-1, keepdims=True)
    return (x - mu) * lax.rsqrt(var + LN_EPS) * gamma + beta


def _attn_ffn(x, q, k, v, mask, wo, w1, w2, vec, cell):
    """One Self/Cross attention encoder cell tail (eval mode, dropout = identity):
    multi-head attention (q/k/v already projected), output projection folded per head,
    residual + LN1, position-wise FFN, residual + LN2."""
    base = 2 + 7 * cell
    bo   = vec[base + 0:base + 1, 0:HIDDEN_DIM]
    b1   = vec[base + 1:base + 2, :]
    b2   = vec[base + 2:base + 3, 0:HIDDEN_DIM]
    ln1g = vec[base + 3:base + 4, 0:HIDDEN_DIM]
    ln1b = vec[base + 4:base + 5, 0:HIDDEN_DIM]
    ln2g = vec[base + 5:base + 6, 0:HIDDEN_DIM]
    ln2b = vec[base + 6:base + 7, 0:HIDDEN_DIM]

    inv_temp = 1.0 / (float(K_DIM) ** 0.5)
    attn_out = bo                                 # (1, D) -> broadcasts on the first add
    for h in range(NUM_HEAD):                     # each head's context folds straight into the
        qh = q[:, h * K_DIM:(h + 1) * K_DIM]      # output projection -> no concat/lane shuffle
        kh = k[:, h * K_DIM:(h + 1) * K_DIM]
        vh = v[:, h * V_DIM:(h + 1) * V_DIM]
        sc = _qkT(qh, kh) * inv_temp + mask
        m = jnp.max(sc, axis=-1, keepdims=True)
        e = jnp.exp(sc - m)
        p = e * pl.reciprocal(jnp.sum(e, axis=-1, keepdims=True), approx=True)
        ctx = _mmf(p, vh)
        attn_out = attn_out + _mmf(ctx, wo[h * V_DIM:(h + 1) * V_DIM, :])

    y = _layer_norm(attn_out + x, ln1g, ln1b)     # residual + LayerNorm 1
    h1 = jnp.maximum(_mmf(y, w1) + b1, 0.0)
    h2 = _mmf(h1, w2) + b2
    return _layer_norm(h2 + y, ln2g, ln2b)        # residual + LayerNorm 2


def _sha_group(x, kvx, mask, wx, wkv, wo, w1, w2, vec):
    """One modality group of Single_Layer_Hybrid_Attention: SA(x) + CA(q=x, kv=kvx).
    Batched projections: one (N,D)@(D,64) matmul gives [SA.q|SA.k|SA.v|CA.q], one
    (N,D)@(D,32) matmul gives [CA.k|CA.v]."""
    px  = _mmf(x,   wx)  + vec[0:1, :]              # (N, 64)
    pkv = _mmf(kvx, wkv) + vec[1:2, 0:HDK + HDV]    # (N, 32)
    sa = _attn_ffn(x, px[:, 0:HDK], px[:, HDK:2 * HDK], px[:, 2 * HDK:2 * HDK + HDV], mask,
                   wo[0:HDV, :], w1[0:HIDDEN_DIM, :], w2[0:INNER_DIM, :], vec, cell=0)
    ca = _attn_ffn(x, px[:, 2 * HDK + HDV:], pkv[:, 0:HDK], pkv[:, HDK:HDK + HDV], mask,
                   wo[HDV:, :], w1[HIDDEN_DIM:, :], w2[INNER_DIM:, :], vec, cell=1)
    return sa + ca


# --------------------------------- fully fused forward kernel ---------------------------------

def _sha_context_kernel(roi_ref, box_ref, emb1_ref, emb2_ref, idrow_ref, idcol_ref,
                        bb_w1_ref, bb_w2_ref, ovis_roi_ref, ovis_pos_ref, otxt_ref, ovec_ref,
                        evis_roi_ref, evis_ctx_ref, etxt_ref, evec_ref,
                        wx_ref, wkv_ref, wo_ref, w1_ref, w2_ref, lvec_ref,
                        edge_ref):
    # Block-diagonal additive attention mask rebuilt in-kernel from O(N) image ids.
    # Mathematically identical to the original per-image padded attention (key-pad mask)
    # for every valid row.
    mask = jnp.where(idrow_ref[...] == idcol_ref[...], 0.0, NEG_INF)

    roi = roi_ref[...]

    # ---- object front-end: bbox_embed MLP + lin_obj_visual (concat folded) + lin_obj_textual ----
    ovec = ovec_ref[...]
    h   = jnp.maximum(_mmf(box_ref[...], bb_w1_ref[...]) + ovec[0:1, 0:BBOX_HID], 0.0)
    pos = jnp.maximum(_mmf(h, bb_w2_ref[...]) + ovec[1:2, 0:POS_DIM], 0.0)
    vis = _mmf(roi, ovis_roi_ref[...]) + _mmf(pos, ovis_pos_ref[...]) + ovec[2:3, 0:HIDDEN_DIM]
    txt = _mmf(emb1_ref[...], otxt_ref[...]) + ovec[3:4, 0:HIDDEN_DIM]

    def run_layers(txt, vis, first_layer, n_layers):
        """SHA_Encoder body: layers are statically unrolled; index 2*l is the textual group
        [SA_txt, CA_txt], index 2*l+1 the visual group [SA_vis, CA_vis]."""
        for l in range(first_layer, first_layer + n_layers):
            i0, i1 = 2 * l, 2 * l + 1
            new_txt = _sha_group(txt, vis, mask, wx_ref[i0], wkv_ref[i0], wo_ref[i0],
                                 w1_ref[i0], w2_ref[i0], lvec_ref[i0])
            new_vis = _sha_group(vis, txt, mask, wx_ref[i1], wkv_ref[i1], wo_ref[i1],
                                 w1_ref[i1], w2_ref[i1], lvec_ref[i1])
            txt, vis = new_txt, new_vis
        return txt, vis

    # ---- object context (SHA_Encoder, OBJ_LAYER layers) + tail add ----
    txt, vis = run_layers(txt, vis, 0, OBJ_LAYER)
    obj_feats = vis + txt                          # SHA_Encoder tail: visual += textual

    # ---- edge front-end: lin_edge_visual (concat folded) + lin_edge_textual ----
    evec = evec_ref[...]
    evis = _mmf(roi, evis_roi_ref[...]) + _mmf(obj_feats, evis_ctx_ref[...]) + evec[0:1, :]
    etxt = _mmf(emb2_ref[...], etxt_ref[...]) + evec[1:2, :]

    # ---- edge context (SHA_Encoder, EDGE_LAYER layers) + tail add -> edge_ctx ----
    etxt, evis = run_layers(etxt, evis, OBJ_LAYER, EDGE_LAYER)
    edge_ref[...] = evis + etxt


# ------------------------------------ glue (plain JAX) ------------------------------------

def to_onehot(labels, num_classes, fill=1000.0):
    """iota-compare onehot (no scatter), matching maskrcnn_benchmark's to_onehot."""
    iota = lax.broadcasted_iota(jnp.int32, (labels.shape[0], num_classes), 1)
    return jnp.where(labels[:, None] == iota, fill, -fill).astype(jnp.float32)


# ---------------------------------- parameter initialization ----------------------------------

def _pad_cols(a, width):
    return jnp.pad(a, ((0, 0), (0, width - a.shape[1])))


def init_linear(key, din, dout, scale=0.05):
    k1, k2 = jax.random.split(key)
    w = jax.random.normal(k1, (din, dout), jnp.float32) * scale
    b = jax.random.normal(k2, (1, dout), jnp.float32) * scale
    return w, b


def init_encoder_cell(key, d_model, n_head, d_k, d_v, d_inner):
    ks = jax.random.split(key, 6)
    wq, bq = init_linear(ks[0], d_model, n_head * d_k)
    wk, bk = init_linear(ks[1], d_model, n_head * d_k)
    wv, bv = init_linear(ks[2], d_model, n_head * d_v)
    wo, bo = init_linear(ks[3], n_head * d_v, d_model)
    w1, b1 = init_linear(ks[4], d_model, d_inner)
    w2, b2 = init_linear(ks[5], d_inner, d_model)
    return dict(wq=wq, bq=bq, wk=wk, bk=bk, wv=wv, bv=bv, wo=wo, bo=bo,
                ln1_g=jnp.ones((1, d_model), jnp.float32),
                ln1_b=jnp.zeros((1, d_model), jnp.float32),
                w1=w1, b1=b1, w2=w2, b2=b2,
                ln2_g=jnp.ones((1, d_model), jnp.float32),
                ln2_b=jnp.zeros((1, d_model), jnp.float32))


def pack_group(sa, ca):
    """Pack one modality group (self-attention cell + cross-attention cell)."""
    wx  = jnp.concatenate([sa["wq"], sa["wk"], sa["wv"], ca["wq"]], axis=1)   # (32, 64)
    wkv = jnp.concatenate([ca["wk"], ca["wv"]], axis=1)                       # (32, 32)
    wo  = jnp.concatenate([sa["wo"], ca["wo"]], axis=0)                       # (32, 32)
    w1  = jnp.concatenate([sa["w1"], ca["w1"]], axis=0)                       # (64, 64)
    w2  = jnp.concatenate([sa["w2"], ca["w2"]], axis=0)                       # (128, 32)
    vw = INNER_DIM

    def cell_rows(c):
        return [_pad_cols(c["bo"], vw), c["b1"], _pad_cols(c["b2"], vw),
                _pad_cols(c["ln1_g"], vw), _pad_cols(c["ln1_b"], vw),
                _pad_cols(c["ln2_g"], vw), _pad_cols(c["ln2_b"], vw)]

    rows = ([jnp.concatenate([sa["bq"], sa["bk"], sa["bv"], ca["bq"]], axis=1),
             _pad_cols(jnp.concatenate([ca["bk"], ca["bv"]], axis=1), vw)]
            + cell_rows(sa) + cell_rows(ca))
    vec = jnp.concatenate(rows, axis=0)                                       # (16, 64)
    return wx, wkv, wo, w1, w2, vec


def pack_layers(all_cells):
    """all_cells: list over layers of 4-cell lists [SA_txt, CA_txt, SA_vis, CA_vis].
    Returns stacked tensors with leading index 2*layer + group (group 0 = textual)."""
    groups = []
    for cells in all_cells:
        groups.append(pack_group(cells[0], cells[1]))   # textual group
        groups.append(pack_group(cells[2], cells[3]))   # visual group
    stack = lambda i: jnp.stack([g[i] for g in groups])
    return dict(wx=stack(0).astype(jnp.bfloat16), wkv=stack(1).astype(jnp.bfloat16),
                wo=stack(2).astype(jnp.bfloat16), w1=stack(3).astype(jnp.bfloat16),
                w2=stack(4).astype(jnp.bfloat16), vec=stack(5))


def init_sha_context_params(key):
    ks = jax.random.split(key, 12)
    params = {}
    # TODO(synk): obj_embed1/2 are GloVe vectors (obj_edge_vectors) in the original; random init here.
    params["obj_embed1"] = jax.random.normal(ks[0], (NUM_OBJ_CLS, EMBED_DIM), jnp.float32) * 0.1
    params["obj_embed2"] = jax.random.normal(ks[1], (NUM_OBJ_CLS, EMBED_DIM), jnp.float32) * 0.1

    bbox_w1, bbox_b1 = init_linear(ks[2], 9, BBOX_HID)
    bbox_w1 = jnp.pad(bbox_w1, ((0, BOX_PAD - 9), (0, 0)))     # zero-pad rows to match padded box
    bbox_w2, bbox_b2 = init_linear(ks[3], BBOX_HID, POS_DIM)
    obj_vis_w, obj_vis_b = init_linear(ks[4], IN_CHANNELS + POS_DIM, HIDDEN_DIM)
    obj_txt_w, obj_txt_b = init_linear(ks[5], EMBED_DIM, HIDDEN_DIM)
    params["front_obj"] = dict(
        bbox_w1=bbox_w1.astype(jnp.bfloat16), bbox_w2=bbox_w2.astype(jnp.bfloat16),
        wvis_roi=obj_vis_w[:IN_CHANNELS].astype(jnp.bfloat16),
        wvis_pos=obj_vis_w[IN_CHANNELS:].astype(jnp.bfloat16),
        wtxt=obj_txt_w.astype(jnp.bfloat16),
        vec=jnp.concatenate([_pad_cols(bbox_b1, POS_DIM), bbox_b2,
                             _pad_cols(obj_vis_b, POS_DIM), _pad_cols(obj_txt_b, POS_DIM)],
                            axis=0))

    edge_vis_w, edge_vis_b = init_linear(ks[6], IN_CHANNELS + HIDDEN_DIM, HIDDEN_DIM)
    edge_txt_w, edge_txt_b = init_linear(ks[7], EMBED_DIM, HIDDEN_DIM)
    params["front_edge"] = dict(
        wvis_roi=edge_vis_w[:IN_CHANNELS].astype(jnp.bfloat16),
        wvis_ctx=edge_vis_w[IN_CHANNELS:].astype(jnp.bfloat16),
        wtxt=edge_txt_w.astype(jnp.bfloat16),
        vec=jnp.concatenate([edge_vis_b, edge_txt_b], axis=0))

    # out_obj exists in the module but is unused in 'predcls' mode (kept for completeness).
    params["out_obj_w"], params["out_obj_b"] = init_linear(ks[8], HIDDEN_DIM, NUM_OBJ_CLS)

    all_cells = []
    for i in range(OBJ_LAYER + EDGE_LAYER):          # obj layers first, then edge layers
        kc = jax.random.split(jax.random.fold_in(ks[9], i), 4)
        all_cells.append([init_encoder_cell(k, HIDDEN_DIM, NUM_HEAD, K_DIM, V_DIM, INNER_DIM)
                          for k in kc])
    params["layers"] = pack_layers(all_cells)
    return params


# ------------------------------------- SHA_Context forward -------------------------------------

def sha_context_forward(params, roi_features, box_info, obj_labels, num_objs):
    """predcls mode (USE_GT_BOX=True, USE_GT_OBJECT_LABEL=True), eval (dropout = identity)."""
    n = roi_features.shape[0]
    assert sum(num_objs) == n

    # O(N) per-row image ids (trace-time constants from the static per-image counts); the
    # O(N^2) block-diagonal mask is rebuilt inside the kernel with one broadcast compare.
    img_id = np.concatenate([np.full((k,), i, dtype=np.float32)
                             for i, k in enumerate(num_objs)])
    id_row = jnp.asarray(img_id.reshape(n, 1))
    id_col = jnp.asarray(img_id.reshape(1, n))

    # Embedding gathers stay in plain JAX (data-dependent gather).
    obj_embed1 = params["obj_embed1"][obj_labels]
    obj_embed2 = params["obj_embed2"][obj_labels]
    # TODO(synk): encode_box_info (9-d box geometry from BoxList proposals) is fed in directly.
    box_padded = jnp.pad(box_info, ((0, 0), (0, BOX_PAD - box_info.shape[1])))

    fo, fe, ly = params["front_obj"], params["front_edge"], params["layers"]
    edge_ctx = pl.pallas_call(
        _sha_context_kernel,
        out_shape=jax.ShapeDtypeStruct((n, HIDDEN_DIM), jnp.float32),
    )(roi_features, box_padded, obj_embed1, obj_embed2, id_row, id_col,
      fo["bbox_w1"], fo["bbox_w2"], fo["wvis_roi"], fo["wvis_pos"], fo["wtxt"], fo["vec"],
      fe["wvis_roi"], fe["wvis_ctx"], fe["wtxt"], fe["vec"],
      ly["wx"], ly["wkv"], ly["wo"], ly["w1"], ly["w2"], ly["vec"])

    # ---- predcls branch (no nms_per_cls / out_obj path needed) ----
    obj_preds = obj_labels
    obj_dists = to_onehot(obj_preds, NUM_OBJ_CLS)
    return obj_dists, obj_preds, edge_ctx


# --------------------------------------------- main ---------------------------------------------

if __name__ == "__main__":
    key = jax.random.PRNGKey(0)
    k_par, k_roi, k_box, k_lbl = jax.random.split(key, 4)

    num_objs = (5, 7)                 # proposals per image (static per trace)
    N = sum(num_objs)

    params = init_sha_context_params(k_par)
    roi_features = jax.random.normal(k_roi, (N, IN_CHANNELS), jnp.float32)
    box_info = jax.random.uniform(k_box, (N, 9), jnp.float32)        # stand-in for encode_box_info
    obj_labels = jax.random.randint(k_lbl, (N,), 1, NUM_OBJ_CLS, dtype=jnp.int32)

    fwd = jax.jit(sha_context_forward, static_argnames=("num_objs",))
    obj_dists, obj_preds, edge_ctx = fwd(params, roi_features, box_info, obj_labels,
                                         num_objs=num_objs)

    jax.block_until_ready((obj_dists, obj_preds, edge_ctx))
    assert obj_dists.shape == (N, NUM_OBJ_CLS)
    assert obj_preds.shape == (N,)
    assert edge_ctx.shape == (N, HIDDEN_DIM)
    assert bool(jnp.all(jnp.isfinite(obj_dists))) and bool(jnp.all(jnp.isfinite(edge_ctx)))
    print("KERNEL_OK")
</pallas_src>

<mosaic_0001>
module attributes {stable_mosaic.version = 11 : i64} {
  func.func @_sha_context_kernel(%arg0: memref<12x64xf32, #tpu.memory_space<vmem>>, %arg1: memref<12x16xf32, #tpu.memory_space<vmem>>, %arg2: memref<12x16xf32, #tpu.memory_space<vmem>>, %arg3: memref<12x16xf32, #tpu.memory_space<vmem>>, %arg4: memref<12x1xf32, #tpu.memory_space<vmem>>, %arg5: memref<1x12xf32, #tpu.memory_space<vmem>>, %arg6: memref<16x32xbf16, #tpu.memory_space<vmem>>, %arg7: memref<32x128xbf16, #tpu.memory_space<vmem>>, %arg8: memref<64x32xbf16, #tpu.memory_space<vmem>>, %arg9: memref<128x32xbf16, #tpu.memory_space<vmem>>, %arg10: memref<16x32xbf16, #tpu.memory_space<vmem>>, %arg11: memref<4x128xf32, #tpu.memory_space<vmem>>, %arg12: memref<64x32xbf16, #tpu.memory_space<vmem>>, %arg13: memref<32x32xbf16, #tpu.memory_space<vmem>>, %arg14: memref<16x32xbf16, #tpu.memory_space<vmem>>, %arg15: memref<2x32xf32, #tpu.memory_space<vmem>>, %arg16: memref<4x32x64xbf16, #tpu.memory_space<vmem>>, %arg17: memref<4x32x32xbf16, #tpu.memory_space<vmem>>, %arg18: memref<4x32x32xbf16, #tpu.memory_space<vmem>>, %arg19: memref<4x64x64xbf16, #tpu.memory_space<vmem>>, %arg20: memref<4x128x32xbf16, #tpu.memory_space<vmem>>, %arg21: memref<4x16x64xf32, #tpu.memory_space<vmem>>, %arg22: memref<12x32xf32, #tpu.memory_space<vmem>>) attributes {dimension_semantics = [], scalar_prefetch = 0 : i64, scratch_operands = 0 : i64, tpu.core_type = #tpu.core_type<tc>} {
    %c0 = arith.constant 0 : index
    %c0_0 = arith.constant 0 : index
    %0 = vector.load %arg4[%c0, %c0_0] : memref<12x1xf32, #tpu.memory_space<vmem>>, vector<12x1xf32>
    %c0_1 = arith.constant 0 : index
    %c0_2 = arith.constant 0 : index
    %1 = vector.load %arg5[%c0_1, %c0_2] : memref<1x12xf32, #tpu.memory_space<vmem>>, vector<1x12xf32>
    %2 = vector.broadcast %0 : vector<12x1xf32> to vector<12x12xf32>
    %3 = vector.broadcast %1 : vector<1x12xf32> to vector<12x12xf32>
    %4 = arith.cmpf oeq, %2, %3 : vector<12x12xf32>
    %cst = arith.constant 0.000000e+00 : f32
    %cst_3 = arith.constant -1.000000e+09 : f32
    %5 = vector.broadcast %cst : f32 to vector<12x12xf32>
    %6 = vector.broadcast %cst_3 : f32 to vector<12x12xf32>
    %7 = arith.select %4, %5, %6 : vector<12x12xi1>, vector<12x12xf32>
    %c0_4 = arith.constant 0 : index
    %c0_5 = arith.constant 0 : index
    %8 = vector.load %arg0[%c0_4, %c0_5] : memref<12x64xf32, #tpu.memory_space<vmem>>, vector<12x64xf32>
    %c0_6 = arith.constant 0 : index
    %c0_7 = arith.constant 0 : index
    %9 = vector.load %arg11[%c0_6, %c0_7] : memref<4x128xf32, #tpu.memory_space<vmem>>, vector<4x128xf32>
    %c0_8 = arith.constant 0 : index
    %c0_9 = arith.constant 0 : index
    %10 = vector.load %arg1[%c0_8, %c0_9] : memref<12x16xf32, #tpu.memory_space<vmem>>, vector<12x16xf32>
    %c0_10 = arith.constant 0 : index
    %c0_11 = arith.constant 0 : index
    %11 = vector.load %arg6[%c0_10, %c0_11] : memref<16x32xbf16, #tpu.memory_space<vmem>>, vector<16x32xbf16>
    %12 = arith.truncf %10 : vector<12x16xf32> to vector<12x16xbf16>
    %cst_12 = arith.constant dense<0.000000e+00> : vector<12x32xf32>
    %13 = tpu.matmul %12, %11, %cst_12 {dimension_numbers = #tpu.dot_dimension_numbers<[1], [0], [0], [1], [0, 0, 1, 1], [], []>} : vector<12x16xbf16>, vector<16x32xbf16>, vector<12x32xf32> -> vector<12x32xf32>
    %14 = vector.extract_strided_slice %9 {offsets = [0, 0], sizes = [1, 32], strides = [1, 1]} : vector<4x128xf32> to vector<1x32xf32>
    %15 = vector.broadcast %14 : vector<1x32xf32> to vector<12x32xf32>
    %16 = arith.addf %13, %15 : vector<12x32xf32>
    %cst_13 = arith.constant 0.000000e+00 : f32
    %17 = vector.broadcast %cst_13 : f32 to vector<12x32xf32>
    %18 = arith.maximumf %16, %17 : vector<12x32xf32>
    %c0_14 = arith.constant 0 : index
    %c0_15 = arith.constant 0 : index
    %19 = vector.load %arg7[%c0_14, %c0_15] : memref<32x128xbf16, #tpu.memory_space<vmem>>, vector<32x128xbf16>
    %20 = arith.truncf %18 : vector<12x32xf32> to vector<12x32xbf16>
    %cst_16 = arith.constant dense<0.000000e+00> : vector<12x128xf32>
    %21 = tpu.matmul %20, %19, %cst_16 {dimension_numbers = #tpu.dot_dimension_numbers<[1], [0], [0], [1], [0, 0, 1, 1], [], []>} : vector<12x32xbf16>, vector<32x128xbf16>, vector<12x128xf32> -> vector<12x128xf32>
    %22 = vector.extract_strided_slice %9 {offsets = [1, 0], sizes = [1, 128], strides = [1, 1]} : vector<4x128xf32> to vector<1x128xf32>
    %23 = vector.broadcast %22 : vector<1x128xf32> to vector<12x128xf32>
    %24 = arith.addf %21, %23 : vector<12x128xf32>
    %cst_17 = arith.constant 0.000000e+00 : f32
    %25 = vector.broadcast %cst_17 : f32 to vector<12x128xf32>
    %26 = arith.maximumf %24, %25 : vector<12x128xf32>
    %c0_18 = arith.constant 0 : index
    %c0_19 = arith.constant 0 : index
    %27 = vector.load %arg8[%c0_18, %c0_19] : memref<64x32xbf16, #tpu.memory_space<vmem>>, vector<64x32xbf16>
    %28 = arith.truncf %8 : vector<12x64xf32> to vector<12x64xbf16>
    %cst_20 = arith.constant dense<0.000000e+00> : vector<12x32xf32>
    %29 = tpu.matmul %28, %27, %cst_20 {dimension_numbers = #tpu.dot_dimension_numbers<[1], [0], [0], [1], [0, 0, 1, 1], [], []>} : vector<12x64xbf16>, vector<64x32xbf16>, vector<12x32xf32> -> vector<12x32xf32>
    %c0_21 = arith.constant 0 : index
    %c0_22 = arith.constant 0 : index
    %30 = vector.load %arg9[%c0_21, %c0_22] : memref<128x32xbf16, #tpu.memory_space<vmem>>, vector<128x32xbf16>
    %31 = arith.truncf %26 : vector<12x128xf32> to vector<12x128xbf16>
    %cst_23 = arith.constant dense<0.000000e+00> : vector<12x32xf32>
    %32 = tpu.matmul %31, %30, %cst_23 {dimension_numbers = #tpu.dot_dimension_numbers<[1], [0], [0], [1], [0, 0, 1, 1], [], []>} : vector<12x128xbf16>, vector<128x32xbf16>, vector<12x32xf32> -> vector<12x32xf32>
    %33 = arith.addf %29, %32 : vector<12x32xf32>
    %34 = vector.extract_strided_slice %9 {offsets = [2, 0], sizes = [1, 32], strides = [1, 1]} : vector<4x128xf32> to vector<1x32xf32>
    %35 = vector.broadcast %34 : vector<1x32xf32> to vector<12x32xf32>
    %36 = arith.addf %33, %35 : vector<12x32xf32>
    %c0_24 = arith.constant 0 : index
    %c0_25 = arith.constant 0 : index
    %37 = vector.load %arg2[%c0_24, %c0_25] : memref<12x16xf32, #tpu.memory_space<vmem>>, vector<12x16xf32>
    %c0_26 = arith.constant 0 : index
    %c0_27 = arith.constant 0 : index
    %38 = vector.load %arg10[%c0_26, %c0_27] : memref<16x32xbf16, #tpu.memory_space<vmem>>, vector<16x32xbf16>
    %39 = arith.truncf %37 : vector<12x16xf32> to vector<12x16xbf16>
    %cst_28 = arith.constant dense<0.000000e+00> : vector<12x32xf32>
    %40 = tpu.matmul %39, %38, %cst_28 {dimension_numbers = #tpu.dot_dimension_numbers<[1], [0], [0], [1], [0, 0, 1, 1], [], []>} : vector<12x16xbf16>, vector<16x32xbf16>, vector<12x32xf32> -> vector<12x32xf32>
    %41 = vector.extract_strided_slice %9 {offsets = [3, 0], sizes = [1, 32], strides = [1, 1]} : vector<4x128xf32> to vector<1x32xf32>
    %42 = vector.broadcast %41 : vector<1x32xf32> to vector<12x32xf32>
    %43 = arith.addf %40, %42 : vector<12x32xf32>
    %c0_29 = arith.constant 0 : index
    %c0_30 = arith.constant 0 : index
    %c0_31 = arith.constant 0 : index
    %44 = vector.load %arg16[%c0_29, %c0_30, %c0_31] : memref<4x32x64xbf16, #tpu.memory_space<vmem>>, vector<1x32x64xbf16>
    %45 = vector.shape_cast %44 : vector<1x32x64xbf16> to vector<32x64xbf16>
    %c0_32 = arith.constant 0 : index
    %c0_33 = arith.constant 0 : index
    %c0_34 = arith.constant 0 : index
    %46 = vector.load %arg17[%c0_32, %c0_33, %c0_34] : memref<4x32x32xbf16, #tpu.memory_space<vmem>>, vector<1x32x32xbf16>
    %47 = vector.shape_cast %46 : vector<1x32x32xbf16> to vector<32x32xbf16>
    %c0_35 = arith.constant 0 : index
    %c0_36 = arith.constant 0 : index
    %c0_37 = arith.constant 0 : index
    %48 = vector.load %arg18[%c0_35, %c0_36, %c0_37] : memref<4x32x32xbf16, #tpu.memory_space<vmem>>, vector<1x32x32xbf16>
    %49 = vector.shape_cast %48 : vector<1x32x32xbf16> to vector<32x32xbf16>
    %c0_38 = arith.constant 0 : index
    %c0_39 = arith.constant 0 : index
    %c0_40 = arith.constant 0 : index
    %50 = vector.load %arg19[%c0_38, %c0_39, %c0_40] : memref<4x64x64xbf16, #tpu.memory_space<vmem>>, vector<1x64x64xbf16>
    %51 = vector.shape_cast %50 : vector<1x64x64xbf16> to vector<64x64xbf16>
    %c0_41 = arith.constant 0 : index
    %c0_42 = arith.constant 0 : index
    %c0_43 = arith.constant 0 : index
    %52 = vector.load %arg20[%c0_41, %c0_42, %c0_43] : memref<4x128x32xbf16, #tpu.memory_space<vmem>>, vector<1x128x32xbf16>
    %53 = vector.shape_cast %52 : vector<1x128x32xbf16> to vector<128x32xbf16>
    %c0_44 = arith.constant 0 : index
    %c0_45 = arith.constant 0 : index
    %c0_46 = arith.constant 0 : index
    %54 = vector.load %arg21[%c0_44, %c0_45, %c0_46] : memref<4x16x64xf32, #tpu.memory_space<vmem>>, vector<1x16x64xf32>
    %55 = vector.shape_cast %54 : vector<1x16x64xf32> to vector<16x64xf32>
    %56 = arith.truncf %43 : vector<12x32xf32> to vector<12x32xbf16>
    %cst_47 = arith.constant dense<0.000000e+00> : vector<12x64xf32>
    %57 = tpu.matmul %56, %45, %cst_47 {dimension_numbers = #tpu.dot_dimension_numbers<[1], [0], [0], [1], [0, 0, 1, 1], [], []>} : vector<12x32xbf16>, vector<32x64xbf16>, vector<12x64xf32> -> vector<12x64xf32>
    %58 = vector.extract_strided_slice %55 {offsets = [0, 0], sizes = [1, 64], strides = [1, 1]} : vector<16x64xf32> to vector<1x64xf32>
    %59 = vector.broadcast %58 : vector<1x64xf32> to vector<12x64xf32>
    %60 = arith.addf %57, %59 : vector<12x64xf32>
    %61 = arith.truncf %36 : vector<12x32xf32> to vector<12x32xbf16>
    %cst_48 = arith.constant dense<0.000000e+00> : vector<12x32xf32>
    %62 = tpu.matmul %61, %47, %cst_48 {dimension_numbers = #tpu.dot_dimension_numbers<[1], [0], [0], [1], [0, 0, 1, 1], [], []>} : vector<12x32xbf16>, vector<32x32xbf16>, vector<12x32xf32> -> vector<12x32xf32>
    %63 = vector.extract_strided_slice %55 {offsets = [1, 0], sizes = [1, 32], strides = [1, 1]} : vector<16x64xf32> to vector<1x32xf32>
    %64 = vector.broadcast %63 : vector<1x32xf32> to vector<12x32xf32>
    %65 = arith.addf %62, %64 : vector<12x32xf32>
    %66 = vector.extract_strided_slice %60 {offsets = [0, 0], sizes = [12, 16], strides = [1, 1]} : vector<12x64xf32> to vector<12x16xf32>
    %67 = vector.extract_strided_slice %60 {offsets = [0, 16], sizes = [12, 16], strides = [1, 1]} : vector<12x64xf32> to vector<12x16xf32>
    %68 = vector.extract_strided_slice %60 {offsets = [0, 32], sizes = [12, 16], strides = [1, 1]} : vector<12x64xf32> to vector<12x16xf32>
    %69 = vector.extract_strided_slice %49 {offsets = [0, 0], sizes = [16, 32], strides = [1, 1]} : vector<32x32xbf16> to vector<16x32xbf16>
    %70 = vector.extract_strided_slice %51 {offsets = [0, 0], sizes = [32, 64], strides = [1, 1]} : vector<64x64xbf16> to vector<32x64xbf16>
    %71 = vector.extract_strided_slice %53 {offsets = [0, 0], sizes = [64, 32], strides = [1, 1]} : vector<128x32xbf16> to vector<64x32xbf16>
    %72 = vector.extract_strided_slice %55 {offsets = [2, 0], sizes = [1, 32], strides = [1, 1]} : vector<16x64xf32> to vector<1x32xf32>
    %73 = vector.extract_strided_slice %55 {offsets = [3, 0], sizes = [1, 64], strides = [1, 1]} : vector<16x64xf32> to vector<1x64xf32>
    %74 = vector.extract_strided_slice %55 {offsets = [4, 0], sizes = [1, 32], strides = [1, 1]} : vector<16x64xf32> to vector<1x32xf32>
    %75 = vector.extract_strided_slice %55 {offsets = [5, 0], sizes = [1, 32], strides = [1, 1]} : vector<16x64xf32> to vector<1x32xf32>
    %76 = vector.extract_strided_slice %55 {offsets = [6, 0], sizes = [1, 32], strides = [1, 1]} : vector<16x64xf32> to vector<1x32xf32>
    %77 = vector.extract_strided_slice %55 {offsets = [7, 0], sizes = [1, 32], strides = [1, 1]} : vector<16x64xf32> to vector<1x32xf32>
    %78 = vector.extract_strided_slice %55 {offsets = [8, 0], sizes = [1, 32], strides = [1, 1]} : vector<16x64xf32> to vector<1x32xf32>
    %79 = vector.extract_strided_slice %66 {offsets = [0, 0], sizes = [12, 8], strides = [1, 1]} : vector<12x16xf32> to vector<12x8xf32>
    %80 = vector.extract_strided_slice %67 {offsets = [0, 0], sizes = [12, 8], strides = [1, 1]} : vector<12x16xf32> to vector<12x8xf32>
    %81 = vector.extract_strided_slice %68 {offsets = [0, 0], sizes = [12, 8], strides = [1, 1]} : vector<12x16xf32> to vector<12x8xf32>
    %82 = arith.truncf %79 : vector<12x8xf32> to vector<12x8xbf16>
    %83 = arith.truncf %80 : vector<12x8xf32> to vector<12x8xbf16>
    %cst_49 = arith.constant dense<0.000000e+00> : vector<12x12xf32>
    %84 = tpu.matmul %82, %83, %cst_49 {dimension_numbers = #tpu.dot_dimension_numbers<[1], [1], [0], [0], [0, 0, 1, 0], [], []>} : vector<12x8xbf16>, vector<12x8xbf16>, vector<12x12xf32> -> vector<12x12xf32>
    %cst_50 = arith.constant 0.353553385 : f32
    %85 = vector.broadcast %cst_50 : f32 to vector<12x12xf32>
    %86 = arith.mulf %84, %85 : vector<12x12xf32>
    %87 = arith.addf %86, %7 : vector<12x12xf32>
    %cst_51 = arith.constant dense<0xFF800000> : vector<12xf32>
    %88 = vector.multi_reduction <maximumf>, %87, %cst_51 [1] : vector<12x12xf32> to vector<12xf32>
    %89 = vector.shape_cast %88 : vector<12xf32> to vector<12x1xf32>
    %90 = vector.broadcast %89 : vector<12x1xf32> to vector<12x12xf32>
    %91 = arith.subf %87, %90 : vector<12x12xf32>
    %92 = math.exp %91 : vector<12x12xf32>
    %cst_52 = arith.constant dense<0.000000e+00> : vector<12xf32>
    %93 = vector.multi_reduction <add>, %92, %cst_52 [1] : vector<12x12xf32> to vector<12xf32>
    %94 = vector.shape_cast %93 : vector<12xf32> to vector<12x1xf32>
    %95 = tpu.reciprocal %94 {approx = true} : vector<12x1xf32> -> vector<12x1xf32>
    %96 = vector.broadcast %95 : vector<12x1xf32> to vector<12x12xf32>
    %97 = arith.mulf %92, %96 : vector<12x12xf32>
    %98 = arith.truncf %97 : vector<12x12xf32> to vector<12x12xbf16>
    %99 = arith.truncf %81 : vector<12x8xf32> to vector<12x8xbf16>
    %cst_53 = arith.constant dense<0.000000e+00> : vector<12x8xf32>
    %100 = tpu.matmul %98, %99, %cst_53 {dimension_numbers = #tpu.dot_dimension_numbers<[1], [0], [0], [1], [0, 0, 1, 1], [], []>} : vector<12x12xbf16>, vector<12x8xbf16>, vector<12x8xf32> -> vector<12x8xf32>
    %101 = vector.extract_strided_slice %69 {offsets = [0, 0], sizes = [8, 32], strides = [1, 1]} : vector<16x32xbf16> to vector<8x32xbf16>
    %102 = arith.truncf %100 : vector<12x8xf32> to vector<12x8xbf16>
    %cst_54 = arith.constant dense<0.000000e+00> : vector<12x32xf32>
    %103 = tpu.matmul %102, %101, %cst_54 {dimension_numbers = #tpu.dot_dimension_numbers<[1], [0], [0], [1], [0, 0, 1, 1], [], []>} : vector<12x8xbf16>, vector<8x32xbf16>, vector<12x32xf32> -> vector<12x32xf32>
    %104 = vector.broadcast %72 : vector<1x32xf32> to vector<12x32xf32>
    %105 = arith.addf %104, %103 : vector<12x32xf32>
    %106 = vector.extract_strided_slice %66 {offsets = [0, 8], sizes = [12, 8], strides = [1, 1]} : vector<12x16xf32> to vector<12x8xf32>
    %107 = vector.extract_strided_slice %67 {offsets = [0, 8], sizes = [12, 8], strides = [1, 1]} : vector<12x16xf32> to vector<12x8xf32>
    %108 = vector.extract_strided_slice %68 {offsets = [0, 8], sizes = [12, 8], strides = [1, 1]} : vector<12x16xf32> to vector<12x8xf32>
    %109 = arith.truncf %106 : vector<12x8xf32> to vector<12x8xbf16>
    %110 = arith.truncf %107 : vector<12x8xf32> to vector<12x8xbf16>
    %cst_55 = arith.constant dense<0.000000e+00> : vector<12x12xf32>
    %111 = tpu.matmul %109, %110, %cst_55 {dimension_numbers = #tpu.dot_dimension_numbers<[1], [1], [0], [0], [0, 0, 1, 0], [], []>} : vector<12x8xbf16>, vector<12x8xbf16>, vector<12x12xf32> -> vector<12x12xf32>
    %cst_56 = arith.constant 0.353553385 : f32
    %112 = vector.broadcast %cst_56 : f32 to vector<12x12xf32>
    %113 = arith.mulf %111, %112 : vector<12x12xf32>
    %114 = arith.addf %113, %7 : vector<12x12xf32>
    %cst_57 = arith.constant dense<0xFF800000> : vector<12xf32>
    %115 = vector.multi_reduction <maximumf>, %114, %cst_57 [1] : vector<12x12xf32> to vector<12xf32>
    %116 = vector.shape_cast %115 : vector<12xf32> to vector<12x1xf32>
    %117 = vector.broadcast %116 : vector<12x1xf32> to vector<12x12xf32>
    %118 = arith.subf %114, %117 : vector<12x12xf32>
    %119 = math.exp %118 : vector<12x12xf32>
    %cst_58 = arith.constant dense<0.000000e+00> : vector<12xf32>
    %120 = vector.multi_reduction <add>, %119, %cst_58 [1] : vector<12x12xf32> to vector<12xf32>
    %121 = vector.shape_cast %120 : vector<12xf32> to vector<12x1xf32>
    %122 = tpu.reciprocal %121 {approx = true} : vector<12x1xf32> -> vector<12x1xf32>
    %123 = vector.broadcast %122 : vector<12x1xf32> to vector<12x12xf32>
    %124 = arith.mulf %119, %123 : vector<12x12xf32>
    %125 = arith.truncf %124 : vector<12x12xf32> to vector<12x12xbf16>
    %126 = arith.truncf %108 : vector<12x8xf32> to vector<12x8xbf16>
    %cst_59 = arith.constant dense<0.000000e+00> : vector<12x8xf32>
    %127 = tpu.matmul %125, %126, %cst_59 {dimension_numbers = #tpu.dot_dimension_numbers<[1], [0], [0], [1], [0, 0, 1, 1], [], []>} : vector<12x12xbf16>, vector<12x8xbf16>, vector<12x8xf32> -> vector<12x8xf32>
    %128 = vector.extract_strided_slice %69 {offsets = [8, 0], sizes = [8, 32], strides = [1, 1]} : vector<16x32xbf16> to vector<8x32xbf16>
    %129 = arith.truncf %127 : vector<12x8xf32> to vector<12x8xbf16>
    %cst_60 = arith.constant dense<0.000000e+00> : vector<12x32xf32>
    %130 = tpu.matmul %129, %128, %cst_60 {dimension_numbers = #tpu.dot_dimension_numbers<[1], [0], [0], [1], [0, 0, 1, 1], [], []>} : vector<12x8xbf16>, vector<8x32xbf16>, vector<12x32xf32> -> vector<12x32xf32>
    %131 = arith.addf %105, %130 : vector<12x32xf32>
    %132 = arith.addf %131, %43 : vector<12x32xf32>
    %cst_61 = arith.constant dense<0.000000e+00> : vector<12xf32>
    %133 = vector.multi_reduction <add>, %132, %cst_61 [1] : vector<12x32xf32> to vector<12xf32>
    %134 = vector.shape_cast %133 : vector<12xf32> to vector<12x1xf32>
    %cst_62 = arith.constant 3.200000e+01 : f32
    %135 = vector.broadcast %cst_62 : f32 to vector<12x1xf32>
    %136 = arith.divf %134, %135 : vector<12x1xf32>
    %137 = vector.broadcast %136 : vector<12x1xf32> to vector<12x32xf32>
    %138 = arith.subf %132, %137 : vector<12x32xf32>
    %139 = arith.mulf %138, %138 : vector<12x32xf32>
    %cst_63 = arith.constant dense<0.000000e+00> : vector<12xf32>
    %140 = vector.multi_reduction <add>, %139, %cst_63 [1] : vector<12x32xf32> to vector<12xf32>
    %141 = vector.shape_cast %140 : vector<12xf32> to vector<12x1xf32>
    %cst_64 = arith.constant 3.200000e+01 : f32
    %142 = vector.broadcast %cst_64 : f32 to vector<12x1xf32>
    %143 = arith.divf %141, %142 : vector<12x1xf32>
    %144 = vector.broadcast %136 : vector<12x1xf32> to vector<12x32xf32>
    %145 = arith.subf %132, %144 : vector<12x32xf32>
    %cst_65 = arith.constant 9.99999974E-6 : f32
    %146 = vector.broadcast %cst_65 : f32 to vector<12x1xf32>
    %147 = arith.addf %143, %146 : vector<12x1xf32>
    %148 = math.rsqrt %147 : vector<12x1xf32>
    %149 = vector.broadcast %148 : vector<12x1xf32> to vector<12x32xf32>
    %150 = arith.mulf %145, %149 : vector<12x32xf32>
    %151 = vector.broadcast %75 : vector<1x32xf32> to vector<12x32xf32>
    %152 = arith.mulf %150, %151 : vector<12x32xf32>
    %153 = vector.broadcast %76 : vector<1x32xf32> to vector<12x32xf32>
    %154 = arith.addf %152, %153 : vector<12x32xf32>
    %155 = arith.truncf %154 : vector<12x32xf32> to vector<12x32xbf16>
    %cst_66 = arith.constant dense<0.000000e+00> : vector<12x64xf32>
    %156 = tpu.matmul %155, %70, %cst_66 {dimension_numbers = #tpu.dot_dimension_numbers<[1], [0], [0], [1], [0, 0, 1, 1], [], []>} : vector<12x32xbf16>, vector<32x64xbf16>, vector<12x64xf32> -> vector<12x64xf32>
    %157 = vector.broadcast %73 : vector<1x64xf32> to vector<12x64xf32>
    %158 = arith.addf %156, %157 : vector<12x64xf32>
    %cst_67 = arith.constant 0.000000e+00 : f32
    %159 = vector.broadcast %cst_67 : f32 to vector<12x64xf32>
    %160 = arith.maximumf %158, %159 : vector<12x64xf32>
    %161 = arith.truncf %160 : vector<12x64xf32> to vector<12x64xbf16>
    %cst_68 = arith.constant dense<0.000000e+00> : vector<12x32xf32>
    %162 = tpu.matmul %161, %71, %cst_68 {dimension_numbers = #tpu.dot_dimension_numbers<[1], [0], [0], [1], [0, 0, 1, 1], [], []>} : vector<12x64xbf16>, vector<64x32xbf16>, vector<12x32xf32> -> vector<12x32xf32>
    %163 = vector.broadcast %74 : vector<1x32xf32> to vector<12x32xf32>
    %164 = arith.addf %162, %163 : vector<12x32xf32>
    %165 = arith.addf %164, %154 : vector<12x32xf32>
    %cst_69 = arith.constant dense<0.000000e+00> : vector<12xf32>
    %166 = vector.multi_reduction <add>, %165, %cst_69 [1] : vector<12x32xf32> to vector<12xf32>
    %167 = vector.shape_cast %166 : vector<12xf32> to vector<12x1xf32>
    %cst_70 = arith.constant 3.200000e+01 : f32
    %168 = vector.broadcast %cst_70 : f32 to vector<12x1xf32>
    %169 = arith.divf %167, %168 : vector<12x1xf32>
    %170 = vector.broadcast %169 : vector<12x1xf32> to vector<12x32xf32>
    %171 = arith.subf %165, %170 : vector<12x32xf32>
    %172 = arith.mulf %171, %171 : vector<12x32xf32>
    %cst_71 = arith.constant dense<0.000000e+00> : vector<12xf32>
    %173 = vector.multi_reduction <add>, %172, %cst_71 [1] : vector<12x32xf32> to vector<12xf32>
    %174 = vector.shape_cast %173 : vector<12xf32> to vector<12x1xf32>
    %cst_72 = arith.constant 3.200000e+01 : f32
    %175 = vector.broadcast %cst_72 : f32 to vector<12x1xf32>
    %176 = arith.divf %174, %175 : vector<12x1xf32>
    %177 = vector.broadcast %169 : vector<12x1xf32> to vector<12x32xf32>
    %178 = arith.subf %165, %177 : vector<12x32xf32>
    %cst_73 = arith.constant 9.99999974E-6 : f32
    %179 = vector.broadcast %cst_73 : f32 to vector<12x1xf32>
    %180 = arith.addf %176, %179 : vector<12x1xf32>
    %181 = math.rsqrt %180 : vector<12x1xf32>
    %182 = vector.broadcast %181 : vector<12x1xf32> to vector<12x32xf32>
    %183 = arith.mulf %178, %182 : vector<12x32xf32>
    %184 = vector.broadcast %77 : vector<1x32xf32> to vector<12x32xf32>
    %185 = arith.mulf %183, %184 : vector<12x32xf32>
    %186 = vector.broadcast %78 : vector<1x32xf32> to vector<12x32xf32>
    %187 = arith.addf %185, %186 : vector<12x32xf32>
    %188 = vector.extract_strided_slice %60 {offsets = [0, 48], sizes = [12, 16], strides = [1, 1]} : vector<12x64xf32> to vector<12x16xf32>
    %189 = vector.extract_strided_slice %65 {offsets = [0, 0], sizes = [12, 16], strides = [1, 1]} : vector<12x32xf32> to vector<12x16xf32>
    %190 = vector.extract_strided_slice %65 {offsets = [0, 16], sizes = [12, 16], strides = [1, 1]} : vector<12x32xf32> to vector<12x16xf32>
    %191 = vector.extract_strided_slice %49 {offsets = [16, 0], sizes = [16, 32], strides = [1, 1]} : vector<32x32xbf16> to vector<16x32xbf16>
    %192 = vector.extract_strided_slice %51 {offsets = [32, 0], sizes = [32, 64], strides = [1, 1]} : vector<64x64xbf16> to vector<32x64xbf16>
    %193 = vector.extract_strided_slice %53 {offsets = [64, 0], sizes = [64, 32], strides = [1, 1]} : vector<128x32xbf16> to vector<64x32xbf16>
    %194 = vector.extract_strided_slice %55 {offsets = [9, 0], sizes = [1, 32], strides = [1, 1]} : vector<16x64xf32> to vector<1x32xf32>
    %195 = vector.extract_strided_slice %55 {offsets = [10, 0], sizes = [1, 64], strides = [1, 1]} : vector<16x64xf32> to vector<1x64xf32>
    %196 = vector.extract_strided_slice %55 {offsets = [11, 0], sizes = [1, 32], strides = [1, 1]} : vector<16x64xf32> to vector<1x32xf32>
    %197 = vector.extract_strided_slice %55 {offsets = [12, 0], sizes = [1, 32], strides = [1, 1]} : vector<16x64xf32> to vector<1x32xf32>
    %198 = vector.extract_strided_slice %55 {offsets = [13, 0], sizes = [1, 32], strides = [1, 1]} : vector<16x64xf32> to vector<1x32xf32>
    %199 = vector.extract_strided_slice %55 {offsets = [14, 0], sizes = [1, 32], strides = [1, 1]} : vector<16x64xf32> to vector<1x32xf32>
    %200 = vector.extract_strided_slice %55 {offsets = [15, 0], sizes = [1, 32], strides = [1, 1]} : vector<16x64xf32> to vector<1x32xf32>
    %201 = vector.extract_strided_slice %188 {offsets = [0, 0], sizes = [12, 8], strides = [1, 1]} : vector<12x16xf32> to vector<12x8xf32>
    %202 = vector.extract_strided_slice %189 {offsets = [0, 0], sizes = [12, 8], strides = [1, 1]} : vector<12x16xf32> to vector<12x8xf32>
    %203 = vector.extract_strided_slice %190 {offsets = [0, 0], sizes = [12, 8], strides = [1, 1]} : vector<12x16xf32> to vector<12x8xf32>
    %204 = arith.truncf %201 : vector<12x8xf32> to vector<12x8xbf16>
    %205 = arith.truncf %202 : vector<12x8xf32> to vector<12x8xbf16>
    %cst_74 = arith.constant dense<0.000000e+00> : vector<12x12xf32>
    %206 = tpu.matmul %204, %205, %cst_74 {dimension_numbers = #tpu.dot_dimension_numbers<[1], [1], [0], [0], [0, 0, 1, 0], [], []>} : vector<12x8xbf16>, vector<12x8xbf16>, vector<12x12xf32> -> vector<12x12xf32>
    %cst_75 = arith.constant 0.353553385 : f32
    %207 = vector.broadcast %cst_75 : f32 to vector<12x12xf32>
    %208 = arith.mulf %206, %207 : vector<12x12xf32>
    %209 = arith.addf %208, %7 : vector<12x12xf32>
    %cst_76 = arith.constant dense<0xFF800000> : vector<12xf32>
    %210 = vector.multi_reduction <maximumf>, %209, %cst_76 [1] : vector<12x12xf32> to vector<12xf32>
    %211 = vector.shape_cast %210 : vector<12xf32> to vector<12x1xf32>
    %212 = vector.broadcast %211 : vector<12x1xf32> to vector<12x12xf32>
    %213 = arith.subf %209, %212 : vector<12x12xf32>
    %214 = math.exp %213 : vector<12x12xf32>
    %cst_77 = arith.constant dense<0.000000e+00> : vector<12xf32>
    %215 = vector.multi_reduction <add>, %214, %cst_77 [1] : vector<12x12xf32> to vector<12xf32>
    %216 = vector.shape_cast %215 : vector<12xf32> to vector<12x1xf32>
    %217 = tpu.reciprocal %216 {approx = true} : vector<12x1xf32> -> vector<12x1xf32>
    %218 = vector.broadcast %217 : vector<12x1xf32> to vector<12x12xf32>
    %219 = arith.mulf %214, %218 : vector<12x12xf32>
    %220 = arith.truncf %219 : vector<12x12xf32> to vector<12x12xbf16>
    %221 = arith.truncf %203 : vector<12x8xf32> to vector<12x8xbf16>
    %cst_78 = arith.constant dense<0.000000e+00> : vector<12x8xf32>
    %222 = tpu.matmul %220, %221, %cst_78 {dimension_numbers = #tpu.dot_dimension_numbers<[1], [0], [0], [1], [0, 0, 1, 1], [], []>} : vector<12x12xbf16>, vector<12x8xbf16>, vector<12x8xf32> -> vector<12x8xf32>
    %223 = vector.extract_strided_slice %191 {offsets = [0, 0], sizes = [8, 32], strides = [1, 1]} : vector<16x32xbf16> to vector<8x32xbf16>
    %224 = arith.truncf %222 : vector<12x8xf32> to vector<12x8xbf16>
    %cst_79 = arith.constant dense<0.000000e+00> : vector<12x32xf32>
    %225 = tpu.matmul %224, %223, %cst_79 {dimension_numbers = #tpu.dot_dimension_numbers<[1], [0], [0], [1], [0, 0, 1, 1], [], []>} : vector<12x8xbf16>, vector<8x32xbf16>, vector<12x32xf32> -> vector<12x32xf32>
    %226 = vector.broadcast %194 : vector<1x32xf32> to vector<12x32xf32>
    %227 = arith.addf %226, %225 : vector<12x32xf32>
    %228 = vector.extract_strided_slice %188 {offsets = [0, 8], sizes = [12, 8], strides = [1, 1]} : vector<12x16xf32> to vector<12x8xf32>
    %229 = vector.extract_strided_slice %189 {offsets = [0, 8], sizes = [12, 8], strides = [1, 1]} : vector<12x16xf32> to vector<12x8xf32>
    %230 = vector.extract_strided_slice %190 {offsets = [0, 8], sizes = [12, 8], strides = [1, 1]} : vector<12x16xf32> to vector<12x8xf32>
    %231 = arith.truncf %228 : vector<12x8xf32> to vector<12x8xbf16>
    %232 = arith.truncf %229 : vector<12x8xf32> to vector<12x8xbf16>
    %cst_80 = arith.constant dense<0.000000e+00> : vector<12x12xf32>
    %233 = tpu.matmul %231, %232, %cst_80 {dimension_numbers = #tpu.dot_dimension_numbers<[1], [1], [0], [0], [0, 0, 1, 0], [], []>} : vector<12x8xbf16>, vector<12x8xbf16>, vector<12x12xf32> -> vector<12x12xf32>
    %cst_81 = arith.constant 0.353553385 : f32
    %234 = vector.broadcast %cst_81 : f32 to vector<12x12xf32>
    %235 = arith.mulf %233, %234 : vector<12x12xf32>
    %236 = arith.addf %235, %7 : vector<12x12xf32>
    %cst_82 = arith.constant dense<0xFF800000> : vector<12xf32>
    %237 = vector.multi_reduction <maximumf>, %236, %cst_82 [1] : vector<12x12xf32> to vector<12xf32>
    %238 = vector.shape_cast %237 : vector<12xf32> to vector<12x1xf32>
    %239 = vector.broadcast %238 : vector<12x1xf32> to vector<12x12xf32>
    %240 = arith.subf %236, %239 : vector<12x12xf32>
    %241 = math.exp %240 : vector<12x12xf32>
    %cst_83 = arith.constant dense<0.000000e+00> : vector<12xf32>
    %242 = vector.multi_reduction <add>, %241, %cst_83 [1] : vector<12x12xf32> to vector<12xf32>
    %243 = vector.shape_cast %242 : vector<12xf32> to vector<12x1xf32>
    %244 = tpu.reciprocal %243 {approx = true} : vector<12x1xf32> -> vector<12x1xf32>
    %245 = vector.broadcast %244 : vector<12x1xf32> to vector<12x12xf32>
    %246 = arith.mulf %241, %245 : vector<12x12xf32>
    %247 = arith.truncf %246 : vector<12x12xf32> to vector<12x12xbf16>
    %248 = arith.truncf %230 : vector<12x8xf32> to vector<12x8xbf16>
    %cst_84 = arith.constant dense<0.000000e+00> : vector<12x8xf32>
    %249 = tpu.matmul %247, %248, %cst_84 {dimension_numbers = #tpu.dot_dimension_numbers<[1], [0], [0], [1], [0, 0, 1, 1], [], []>} : vector<12x12xbf16>, vector<12x8xbf16>, vector<12x8xf32> -> vector<12x8xf32>
    %250 = vector.extract_strided_slice %191 {offsets = [8, 0], sizes = [8, 32], strides = [1, 1]} : vector<16x32xbf16> to vector<8x32xbf16>
    %251 = arith.truncf %249 : vector<12x8xf32> to vector<12x8xbf16>
    %cst_85 = arith.constant dense<0.000000e+00> : vector<12x32xf32>
    %252 = tpu.matmul %251, %250, %cst_85 {dimension_numbers = #tpu.dot_dimension_numbers<[1], [0], [0], [1], [0, 0, 1, 1], [], []>} : vector<12x8xbf16>, vector<8x32xbf16>, vector<12x32xf32> -> vector<12x32xf32>
    %253 = arith.addf %227, %252 : vector<12x32xf32>
    %254 = arith.addf %253, %43 : vector<12x32xf32>
    %cst_86 = arith.constant dense<0.000000e+00> : vector<12xf32>
    %255 = vector.multi_reduction <add>, %254, %cst_86 [1] : vector<12x32xf32> to vector<12xf32>
    %256 = vector.shape_cast %255 : vector<12xf32> to vector<12x1xf32>
    %cst_87 = arith.constant 3.200000e+01 : f32
    %257 = vector.broadcast %cst_87 : f32 to vector<12x1xf32>
    %258 = arith.divf %256, %257 : vector<12x1xf32>
    %259 = vector.broadcast %258 : vector<12x1xf32> to vector<12x32xf32>
    %260 = arith.subf %254, %259 : vector<12x32xf32>
    %261 = arith.mulf %260, %260 : vector<12x32xf32>
    %cst_88 = arith.constant dense<0.000000e+00> : vector<12xf32>
    %262 = vector.multi_reduction <add>, %261, %cst_88 [1] : vector<12x32xf32> to vector<12xf32>
    %263 = vector.shape_cast %262 : vector<12xf32> to vector<12x1xf32>
    %cst_89 = arith.constant 3.200000e+01 : f32
    %264 = vector.broadcast %cst_89 : f32 to vector<12x1xf32>
    %265 = arith.divf %263, %264 : vector<12x1xf32>
    %266 = vector.broadcast %258 : vector<12x1xf32> to vector<12x32xf32>
    %267 = arith.subf %254, %266 : vector<12x32xf32>
    %cst_90 = arith.constant 9.99999974E-6 : f32
    %268 = vector.broadcast %cst_90 : f32 to vector<12x1xf32>
    %269 = arith.addf %265, %268 : vector<12x1xf32>
    %270 = math.rsqrt %269 : vector<12x1xf32>
    %271 = vector.broadcast %270 : vector<12x1xf32> to vector<12x32xf32>
    %272 = arith.mulf %267, %271 : vector<12x32xf32>
    %273 = vector.broadcast %197 : vector<1x32xf32> to vector<12x32xf32>
    %274 = arith.mulf %272, %273 : vector<12x32xf32>
    %275 = vector.broadcast %198 : vector<1x32xf32> to vector<12x32xf32>
    %276 = arith.addf %274, %275 : vector<12x32xf32>
    %277 = arith.truncf %276 : vector<12x32xf32> to vector<12x32xbf16>
    %cst_91 = arith.constant dense<0.000000e+00> : vector<12x64xf32>
    %278 = tpu.matmul %277, %192, %cst_91 {dimension_numbers = #tpu.dot_dimension_numbers<[1], [0], [0], [1], [0, 0, 1, 1], [], []>} : vector<12x32xbf16>, vector<32x64xbf16>, vector<12x64xf32> -> vector<12x64xf32>
    %279 = vector.broadcast %195 : vector<1x64xf32> to vector<12x64xf32>
    %280 = arith.addf %278, %279 : vector<12x64xf32>
    %cst_92 = arith.constant 0.000000e+00 : f32
    %281 = vector.broadcast %cst_92 : f32 to vector<12x64xf32>
    %282 = arith.maximumf %280, %281 : vector<12x64xf32>
    %283 = arith.truncf %282 : vector<12x64xf32> to vector<12x64xbf16>
    %cst_93 = arith.constant dense<0.000000e+00> : vector<12x32xf32>
    %284 = tpu.matmul %283, %193, %cst_93 {dimension_numbers = #tpu.dot_dimension_numbers<[1], [0], [0], [1], [0, 0, 1, 1], [], []>} : vector<12x64xbf16>, vector<64x32xbf16>, vector<12x32xf32> -> vector<12x32xf32>
    %285 = vector.broadcast %196 : vector<1x32xf32> to vector<12x32xf32>
    %286 = arith.addf %284, %285 : vector<12x32xf32>
    %287 = arith.addf %286, %276 : vector<12x32xf32>
    %cst_94 = arith.constant dense<0.000000e+00> : vector<12xf32>
    %288 = vector.multi_reduction <add>, %287, %cst_94 [1] : vector<12x32xf32> to vector<12xf32>
    %289 = vector.shape_cast %288 : vector<12xf32> to vector<12x1xf32>
    %cst_95 = arith.constant 3.200000e+01 : f32
    %290 = vector.broadcast %cst_95 : f32 to vector<12x1xf32>
    %291 = arith.divf %289, %290 : vector<12x1xf32>
    %292 = vector.broadcast %291 : vector<12x1xf32> to vector<12x32xf32>
    %293 = arith.subf %287, %292 : vector<12x32xf32>
    %294 = arith.mulf %293, %293 : vector<12x32xf32>
    %cst_96 = arith.constant dense<0.000000e+00> : vector<12xf32>
    %295 = vector.multi_reduction <add>, %294, %cst_96 [1] : vector<12x32xf32> to vector<12xf32>
    %296 = vector.shape_cast %295 : vector<12xf32> to vector<12x1xf32>
    %cst_97 = arith.constant 3.200000e+01 : f32
    %297 = vector.broadcast %cst_97 : f32 to vector<12x1xf32>
    %298 = arith.divf %296, %297 : vector<12x1xf32>
    %299 = vector.broadcast %291 : vector<12x1xf32> to vector<12x32xf32>
    %300 = arith.subf %287, %299 : vector<12x32xf32>
    %cst_98 = arith.constant 9.99999974E-6 : f32
    %301 = vector.broadcast %cst_98 : f32 to vector<12x1xf32>
    %302 = arith.addf %298, %301 : vector<12x1xf32>
    %303 = math.rsqrt %302 : vector<12x1xf32>
    %304 = vector.broadcast %303 : vector<12x1xf32> to vector<12x32xf32>
    %305 = arith.mulf %300, %304 : vector<12x32xf32>
    %306 = vector.broadcast %199 : vector<1x32xf32> to vector<12x32xf32>
    %307 = arith.mulf %305, %306 : vector<12x32xf32>
    %308 = vector.broadcast %200 : vector<1x32xf32> to vector<12x32xf32>
    %309 = arith.addf %307, %308 : vector<12x32xf32>
    %310 = arith.addf %187, %309 : vector<12x32xf32>
    %c1 = arith.constant 1 : index
    %c0_99 = arith.constant 0 : index
    %c0_100 = arith.constant 0 : index
    %311 = vector.load %arg16[%c1, %c0_99, %c0_100] : memref<4x32x64xbf16, #tpu.memory_space<vmem>>, vector<1x32x64xbf16>
    %312 = vector.shape_cast %311 : vector<1x32x64xbf16> to vector<32x64xbf16>
    %c1_101 = arith.constant 1 : index
    %c0_102 = arith.constant 0 : index
    %c0_103 = arith.constant 0 : index
    %313 = vector.load %arg17[%c1_101, %c0_102, %c0_103] : memref<4x32x32xbf16, #tpu.memory_space<vmem>>, vector<1x32x32xbf16>
    %314 = vector.shape_cast %313 : vector<1x32x32xbf16> to vector<32x32xbf16>
    %c1_104 = arith.constant 1 : index
    %c0_105 = arith.constant 0 : index
    %c0_106 = arith.constant 0 : index
    %315 = vector.load %arg18[%c1_104, %c0_105, %c0_106] : memref<4x32x32xbf16, #tpu.memory_space<vmem>>, vector<1x32x32xbf16>
    %316 = vector.shape_cast %315 : vector<1x32x32xbf16> to vector<32x32xbf16>
    %c1_107 = arith.constant 1 : index
    %c0_108 = arith.constant 0 : index
    %c0_109 = arith.constant 0 : index
    %317 = vector.load %arg19[%c1_107, %c0_108, %c0_109] : memref<4x64x64xbf16, #tpu.memory_space<vmem>>, vector<1x64x64xbf16>
    %318 = vector.shape_cast %317 : vector<1x64x64xbf16> to vector<64x64xbf16>
    %c1_110 = arith.constant 1 : index
    %c0_111 = arith.constant 0 : index
    %c0_112 = arith.constant 0 : index
    %319 = vector.load %arg20[%c1_110, %c0_111, %c0_112] : memref<4x128x32xbf16, #tpu.memory_space<vmem>>, vector<1x128x32xbf16>
    %320 = vector.shape_cast %319 : vector<1x128x32xbf16> to vector<128x32xbf16>
    %c1_113 = arith.constant 1 : index
    %c0_114 = arith.constant 0 : index
    %c0_115 = arith.constant 0 : index
    %321 = vector.load %arg21[%c1_113, %c0_114, %c0_115] : memref<4x16x64xf32, #tpu.memory_space<vmem>>, vector<1x16x64xf32>
    %322 = vector.shape_cast %321 : vector<1x16x64xf32> to vector<16x64xf32>
    %323 = arith.truncf %36 : vector<12x32xf32> to vector<12x32xbf16>
    %cst_116 = arith.constant dense<0.000000e+00> : vector<12x64xf32>
    %324 = tpu.matmul %323, %312, %cst_116 {dimension_numbers = #tpu.dot_dimension_numbers<[1], [0], [0], [1], [0, 0, 1, 1], [], []>} : vector<12x32xbf16>, vector<32x64xbf16>, vector<12x64xf32> -> vector<12x64xf32>
    %325 = vector.extract_strided_slice %322 {offsets = [0, 0], sizes = [1, 64], strides = [1, 1]} : vector<16x64xf32> to vector<1x64xf32>
    %326 = vector.broadcast %325 : vector<1x64xf32> to vector<12x64xf32>
    %327 = arith.addf %324, %326 : vector<12x64xf32>
    %328 = arith.truncf %43 : vector<12x32xf32> to vector<12x32xbf16>
    %cst_117 = arith.constant dense<0.000000e+00> : vector<12x32xf32>
    %329 = tpu.matmul %328, %314, %cst_117 {dimension_numbers = #tpu.dot_dimension_numbers<[1], [0], [0], [1], [0, 0, 1, 1], [], []>} : vector<12x32xbf16>, vector<32x32xbf16>, vector<12x32xf32> -> vector<12x32xf32>
    %330 = vector.extract_strided_slice %322 {offsets = [1, 0], sizes = [1, 32], strides = [1, 1]} : vector<16x64xf32> to vector<1x32xf32>
    %331 = vector.broadcast %330 : vector<1x32xf32> to vector<12x32xf32>
    %332 = arith.addf %329, %331 : vector<12x32xf32>
    %333 = vector.extract_strided_slice %327 {offsets = [0, 0], sizes = [12, 16], strides = [1, 1]} : vector<12x64xf32> to vector<12x16xf32>
    %334 = vector.extract_strided_slice %327 {offsets = [0, 16], sizes = [12, 16], strides = [1, 1]} : vector<12x64xf32> to vector<12x16xf32>
    %335 = vector.extract_strided_slice %327 {offsets = [0, 32], sizes = [12, 16], strides = [1, 1]} : vector<12x64xf32> to vector<12x16xf32>
    %336 = vector.extract_strided_slice %316 {offsets = [0, 0], sizes = [16, 32], strides = [1, 1]} : vector<32x32xbf16> to vector<16x32xbf16>
    %337 = vector.extract_strided_slice %318 {offsets = [0, 0], sizes = [32, 64], strides = [1, 1]} : vector<64x64xbf16> to vector<32x64xbf16>
    %338 = vector.extract_strided_slice %320 {offsets = [0, 0], sizes = [64, 32], strides = [1, 1]} : vector<128x32xbf16> to vector<64x32xbf16>
    %339 = vector.extract_strided_slice %322 {offsets = [2, 0], sizes = [1, 32], strides = [1, 1]} : vector<16x64xf32> to vector<1x32xf32>
    %340 = vector.extract_strided_slice %322 {offsets = [3, 0], sizes = [1, 64], strides = [1, 1]} : vector<16x64xf32> to vector<1x64xf32>
    %341 = vector.extract_strided_slice %322 {offsets = [4, 0], sizes = [1, 32], strides = [1, 1]} : vector<16x64xf32> to vector<1x32xf32>
    %342 = vector.extract_strided_slice %322 {offsets = [5, 0], sizes = [1, 32], strides = [1, 1]} : vector<16x64xf32> to vector<1x32xf32>
    %343 = vector.extract_strided_slice %322 {offsets = [6, 0], sizes = [1, 32], strides = [1, 1]} : vector<16x64xf32> to vector<1x32xf32>
    %344 = vector.extract_strided_slice %322 {offsets = [7, 0], sizes = [1, 32], strides = [1, 1]} : vector<16x64xf32> to vector<1x32xf32>
    %345 = vector.extract_strided_slice %322 {offsets = [8, 0], sizes = [1, 32], strides = [1, 1]} : vector<16x64xf32> to vector<1x32xf32>
    %346 = vector.extract_strided_slice %333 {offsets = [0, 0], sizes = [12, 8], strides = [1, 1]} : vector<12x16xf32> to vector<12x8xf32>
    %347 = vector.extract_strided_slice %334 {offsets = [0, 0], sizes = [12, 8], strides = [1, 1]} : vector<12x16xf32> to vector<12x8xf32>
    %348 = vector.extract_strided_slice %335 {offsets = [0, 0], sizes = [12, 8], strides = [1, 1]} : vector<12x16xf32> to vector<12x8xf32>
    %349 = arith.truncf %346 : vector<12x8xf32> to vector<12x8xbf16>
    %350 = arith.truncf %347 : vector<12x8xf32> to vector<12x8xbf16>
    %cst_118 = arith.constant dense<0.000000e+00> : vector<12x12xf32>
    %351 = tpu.matmul %349, %350, %cst_118 {dimension_numbers = #tpu.dot_dimension_numbers<[1], [1], [0], [0], [0, 0, 1, 0], [], []>} : vector<12x8xbf16>, vector<12x8xbf16>, vector<12x12xf32> -> vector<12x12xf32>
    %cst_119 = arith.constant 0.353553385 : f32
    %352 = vector.broadcast %cst_119 : f32 to vector<12x12xf32>
    %353 = arith.mulf %351, %352 : vector<12x12xf32>
    %354 = arith.addf %353, %7 : vector<12x12xf32>
    %cst_120 = arith.constant dense<0xFF800000> : vector<12xf32>
    %355 = vector.multi_reduction <maximumf>, %354, %cst_120 [1] : vector<12x12xf32> to vector<12xf32>
    %356 = vector.shape_cast %355 : vector<12xf32> to vector<12x1xf32>
    %357 = vector.broadcast %356 : vector<12x1xf32> to vector<12x12xf32>
    %358 = arith.subf %354, %357 : vector<12x12xf32>
    %359 = math.exp %358 : vector<12x12xf32>
    %cst_121 = arith.constant dense<0.000000e+00> : vector<12xf32>
    %360 = vector.multi_reduction <add>, %359, %cst_121 [1] : vector<12x12xf32> to vector<12xf32>
    %361 = vector.shape_cast %360 : vector<12xf32> to vector<12x1xf32>
    %362 = tpu.reciprocal %361 {approx = true} : vector<12x1xf32> -> vector<12x1xf32>
    %363 = vector.broadcast %362 : vector<12x1xf32> to vector<12x12xf32>
    %364 = arith.mulf %359, %363 : vector<12x12xf32>
    %365 = arith.truncf %364 : vector<12x12xf32> to vector<12x12xbf16>
    %366 = arith.truncf %348 : vector<12x8xf32> to vector<12x8xbf16>
    %cst_122 = arith.constant dense<0.000000e+00> : vector<12x8xf32>
    %367 = tpu.matmul %365, %366, %cst_122 {dimension_numbers = #tpu.dot_dimension_numbers<[1], [0], [0], [1], [0, 0, 1, 1], [], []>} : vector<12x12xbf16>, vector<12x8xbf16>, vector<12x8xf32> -> vector<12x8xf32>
    %368 = vector.extract_strided_slice %336 {offsets = [0, 0], sizes = [8, 32], strides = [1, 1]} : vector<16x32xbf16> to vector<8x32xbf16>
    %369 = arith.truncf %367 : vector<12x8xf32> to vector<12x8xbf16>
    %cst_123 = arith.constant dense<0.000000e+00> : vector<12x32xf32>
    %370 = tpu.matmul %369, %368, %cst_123 {dimension_numbers = #tpu.dot_dimension_numbers<[1], [0], [0], [1], [0, 0, 1, 1], [], []>} : vector<12x8xbf16>, vector<8x32xbf16>, vector<12x32xf32> -> vector<12x32xf32>
    %371 = vector.broadcast %339 : vector<1x32xf32> to vector<12x32xf32>
    %372 = arith.addf %371, %370 : vector<12x32xf32>
    %373 = vector.extract_strided_slice %333 {offsets = [0, 8], sizes = [12, 8], strides = [1, 1]} : vector<12x16xf32> to vector<12x8xf32>
    %374 = vector.extract_strided_slice %334 {offsets = [0, 8], sizes = [12, 8], strides = [1, 1]} : vector<12x16xf32> to vector<12x8xf32>
    %375 = vector.extract_strided_slice %335 {offsets = [0, 8], sizes = [12, 8], strides = [1, 1]} : vector<12x16xf32> to vector<12x8xf32>
    %376 = arith.truncf %373 : vector<12x8xf32> to vector<12x8xbf16>
    %377 = arith.truncf %374 : vector<12x8xf32> to vector<12x8xbf16>
    %cst_124 = arith.constant dense<0.000000e+00> : vector<12x12xf32>
    %378 = tpu.matmul %376, %377, %cst_124 {dimension_numbers = #tpu.dot_dimension_numbers<[1], [1], [0], [0], [0, 0, 1, 0], [], []>} : vector<12x8xbf16>, vector<12x8xbf16>, vector<12x12xf32> -> vector<12x12xf32>
    %cst_125 = arith.constant 0.353553385 : f32
    %379 = vector.broadcast %cst_125 : f32 to vector<12x12xf32>
    %380 = arith.mulf %378, %379 : vector<12x12xf32>
    %381 = arith.addf %380, %7 : vector<12x12xf32>
    %cst_126 = arith.constant dense<0xFF800000> : vector<12xf32>
    %382 = vector.multi_reduction <maximumf>, %381, %cst_126 [1] : vector<12x12xf32> to vector<12xf32>
    %383 = vector.shape_cast %382 : vector<12xf32> to vector<12x1xf32>
    %384 = vector.broadcast %383 : vector<12x1xf32> to vector<12x12xf32>
    %385 = arith.subf %381, %384 : vector<12x12xf32>
    %386 = math.exp %385 : vector<12x12xf32>
    %cst_127 = arith.constant dense<0.000000e+00> : vector<12xf32>
    %387 = vector.multi_reduction <add>, %386, %cst_127 [1] : vector<12x12xf32> to vector<12xf32>
    %388 = vector.shape_cast %387 : vector<12xf32> to vector<12x1xf32>
    %389 = tpu.reciprocal %388 {approx = true} : vector<12x1xf32> -> vector<12x1xf32>
    %390 = vector.broadcast %389 : vector<12x1xf32> to vector<12x12xf32>
    %391 = arith.mulf %386, %390 : vector<12x12xf32>
    %392 = arith.truncf %391 : vector<12x12xf32> to vector<12x12xbf16>
    %393 = arith.truncf %375 : vector<12x8xf32> to vector<12x8xbf16>
    %cst_128 = arith.constant dense<0.000000e+00> : vector<12x8xf32>
    %394 = tpu.matmul %392, %393, %cst_128 {dimension_numbers = #tpu.dot_dimension_numbers<[1], [0], [0], [1], [0, 0, 1, 1], [], []>} : vector<12x12xbf16>, vector<12x8xbf16>, vector<12x8xf32> -> vector<12x8xf32>
    %395 = vector.extract_strided_slice %336 {offsets = [8, 0], sizes = [8, 32], strides = [1, 1]} : vector<16x32xbf16> to vector<8x32xbf16>
    %396 = arith.truncf %394 : vector<12x8xf32> to vector<12x8xbf16>
    %cst_129 = arith.constant dense<0.000000e+00> : vector<12x32xf32>
    %397 = tpu.matmul %396, %395, %cst_129 {dimension_numbers = #tpu.dot_dimension_numbers<[1], [0], [0], [1], [0, 0, 1, 1], [], []>} : vector<12x8xbf16>, vector<8x32xbf16>, vector<12x32xf32> -> vector<12x32xf32>
    %398 = arith.addf %372, %397 : vector<12x32xf32>
    %399 = arith.addf %398, %36 : vector<12x32xf32>
    %cst_130 = arith.constant dense<0.000000e+00> : vector<12xf32>
    %400 = vector.multi_reduction <add>, %399, %cst_130 [1] : vector<12x32xf32> to vector<12xf32>
    %401 = vector.shape_cast %400 : vector<12xf32> to vector<12x1xf32>
    %cst_131 = arith.constant 3.200000e+01 : f32
    %402 = vector.broadcast %cst_131 : f32 to vector<12x1xf32>
    %403 = arith.divf %401, %402 : vector<12x1xf32>
    %404 = vector.broadcast %403 : vector<12x1xf32> to vector<12x32xf32>
    %405 = arith.subf %399, %404 : vector<12x32xf32>
    %406 = arith.mulf %405, %405 : vector<12x32xf32>
    %cst_132 = arith.constant dense<0.000000e+00> : vector<12xf32>
    %407 = vector.multi_reduction <add>, %406, %cst_132 [1] : vector<12x32xf32> to vector<12xf32>
    %408 = vector.shape_cast %407 : vector<12xf32> to vector<12x1xf32>
    %cst_133 = arith.constant 3.200000e+01 : f32
    %409 = vector.broadcast %cst_133 : f32 to vector<12x1xf32>
    %410 = arith.divf %408, %409 : vector<12x1xf32>
    %411 = vector.broadcast %403 : vector<12x1xf32> to vector<12x32xf32>
    %412 = arith.subf %399, %411 : vector<12x32xf32>
    %cst_134 = arith.constant 9.99999974E-6 : f32
    %413 = vector.broadcast %cst_134 : f32 to vector<12x1xf32>
    %414 = arith.addf %410, %413 : vector<12x1xf32>
    %415 = math.rsqrt %414 : vector<12x1xf32>
    %416 = vector.broadcast %415 : vector<12x1xf32> to vector<12x32xf32>
    %417 = arith.mulf %412, %416 : vector<12x32xf32>
    %418 = vector.broadcast %342 : vector<1x32xf32> to vector<12x32xf32>
    %419 = arith.mulf %417, %418 : vector<12x32xf32>
    %420 = vector.broadcast %343 : vector<1x32xf32> to vector<12x32xf32>
    %421 = arith.addf %419, %420 : vector<12x32xf32>
    %422 = arith.truncf %421 : vector<12x32xf32> to vector<12x32xbf16>
    %cst_135 = arith.constant dense<0.000000e+00> : vector<12x64xf32>
    %423 = tpu.matmul %422, %337, %cst_135 {dimension_numbers = #tpu.dot_dimension_numbers<[1], [0], [0], [1], [0, 0, 1, 1], [], []>} : vector<12x32xbf16>, vector<32x64xbf16>, vector<12x64xf32> -> vector<12x64xf32>
    %424 = vector.broadcast %340 : vector<1x64xf32> to vector<12x64xf32>
    %425 = arith.addf %423, %424 : vector<12x64xf32>
    %cst_136 = arith.constant 0.000000e+00 : f32
    %426 = vector.broadcast %cst_136 : f32 to vector<12x64xf32>
    %427 = arith.maximumf %425, %426 : vector<12x64xf32>
    %428 = arith.truncf %427 : vector<12x64xf32> to vector<12x64xbf16>
    %cst_137 = arith.constant dense<0.000000e+00> : vector<12x32xf32>
    %429 = tpu.matmul %428, %338, %cst_137 {dimension_numbers = #tpu.dot_dimension_numbers<[1], [0], [0], [1], [0, 0, 1, 1], [], []>} : vector<12x64xbf16>, vector<64x32xbf16>, vector<12x32xf32> -> vector<12x32xf32>
    %430 = vector.broadcast %341 : vector<1x32xf32> to vector<12x32xf32>
    %431 = arith.addf %429, %430 : vector<12x32xf32>
    %432 = arith.addf %431, %421 : vector<12x32xf32>
    %cst_138 = arith.constant dense<0.000000e+00> : vector<12xf32>
    %433 = vector.multi_reduction <add>, %432, %cst_138 [1] : vector<12x32xf32> to vector<12xf32>
    %434 = vector.shape_cast %433 : vector<12xf32> to vector<12x1xf32>
    %cst_139 = arith.constant 3.200000e+01 : f32
    %435 = vector.broadcast %cst_139 : f32 to vector<12x1xf32>
    %436 = arith.divf %434, %435 : vector<12x1xf32>
    %437 = vector.broadcast %436 : vector<12x1xf32> to vector<12x32xf32>
    %438 = arith.subf %432, %437 : vector<12x32xf32>
    %439 = arith.mulf %438, %438 : vector<12x32xf32>
    %cst_140 = arith.constant dense<0.000000e+00> : vector<12xf32>
    %440 = vector.multi_reduction <add>, %439, %cst_140 [1] : vector<12x32xf32> to vector<12xf32>
    %441 = vector.shape_cast %440 : vector<12xf32> to vector<12x1xf32>
    %cst_141 = arith.constant 3.200000e+01 : f32
    %442 = vector.broadcast %cst_141 : f32 to vector<12x1xf32>
    %443 = arith.divf %441, %442 : vector<12x1xf32>
    %444 = vector.broadcast %436 : vector<12x1xf32> to vector<12x32xf32>
    %445 = arith.subf %432, %444 : vector<12x32xf32>
    %cst_142 = arith.constant 9.99999974E-6 : f32
    %446 = vector.broadcast %cst_142 : f32 to vector<12x1xf32>
    %447 = arith.addf %443, %446 : vector<12x1xf32>
    %448 = math.rsqrt %447 : vector<12x1xf32>
    %449 = vector.broadcast %448 : vector<12x1xf32> to vector<12x32xf32>
    %450 = arith.mulf %445, %449 : vector<12x32xf32>
    %451 = vector.broadcast %344 : vector<1x32xf32> to vector<12x32xf32>
    %452 = arith.mulf %450, %451 : vector<12x32xf32>
    %453 = vector.broadcast %345 : vector<1x32xf32> to vector<12x32xf32>
    %454 = arith.addf %452, %453 : vector<12x32xf32>
    %455 = vector.extract_strided_slice %327 {offsets = [0, 48], sizes = [12, 16], strides = [1, 1]} : vector<12x64xf32> to vector<12x16xf32>
    %456 = vector.extract_strided_slice %332 {offsets = [0, 0], sizes = [12, 16], strides = [1, 1]} : vector<12x32xf32> to vector<12x16xf32>
    %457 = vector.extract_strided_slice %332 {offsets = [0, 16], sizes = [12, 16], strides = [1, 1]} : vector<12x32xf32> to vector<12x16xf32>
    %458 = vector.extract_strided_slice %316 {offsets = [16, 0], sizes = [16, 32], strides = [1, 1]} : vector<32x32xbf16> to vector<16x32xbf16>
    %459 = vector.extract_strided_slice %318 {offsets = [32, 0], sizes = [32, 64], strides = [1, 1]} : vector<64x64xbf16> to vector<32x64xbf16>
    %460 = vector.extract_strided_slice %320 {offsets = [64, 0], sizes = [64, 32], strides = [1, 1]} : vector<128x32xbf16> to vector<64x32xbf16>
    %461 = vector.extract_strided_slice %322 {offsets = [9, 0], sizes = [1, 32], strides = [1, 1]} : vector<16x64xf32> to vector<1x32xf32>
    %462 = vector.extract_strided_slice %322 {offsets = [10, 0], sizes = [1, 64], strides = [1, 1]} : vector<16x64xf32> to vector<1x64xf32>
    %463 = vector.extract_strided_slice %322 {offsets = [11, 0], sizes = [1, 32], strides = [1, 1]} : vector<16x64xf32> to vector<1x32xf32>
    %464 = vector.extract_strided_slice %322 {offsets = [12, 0], sizes = [1, 32], strides = [1, 1]} : vector<16x64xf32> to vector<1x32xf32>
    %465 = vector.extract_strided_slice %322 {offsets = [13, 0], sizes = [1, 32], strides = [1, 1]} : vector<16x64xf32> to vector<1x32xf32>
    %466 = vector.extract_strided_slice %322 {offsets = [14, 0], sizes = [1, 32], strides = [1, 1]} : vector<16x64xf32> to vector<1x32xf32>
    %467 = vector.extract_strided_slice %322 {offsets = [15, 0], sizes = [1, 32], strides = [1, 1]} : vector<16x64xf32> to vector<1x32xf32>
    %468 = vector.extract_strided_slice %455 {offsets = [0, 0], sizes = [12, 8], strides = [1, 1]} : vector<12x16xf32> to vector<12x8xf32>
    %469 = vector.extract_strided_slice %456 {offsets = [0, 0], sizes = [12, 8], strides = [1, 1]} : vector<12x16xf32> to vector<12x8xf32>
    %470 = vector.extract_strided_slice %457 {offsets = [0, 0], sizes = [12, 8], strides = [1, 1]} : vector<12x16xf32> to vector<12x8xf32>
    %471 = arith.truncf %468 : vector<12x8xf32> to vector<12x8xbf16>
    %472 = arith.truncf %469 : vector<12x8xf32> to vector<12x8xbf16>
    %cst_143 = arith.constant dense<0.000000e+00> : vector<12x12xf32>
    %473 = tpu.matmul %471, %472, %cst_143 {dimension_numbers = #tpu.dot_dimension_numbers<[1], [1], [0], [0], [0, 0, 1, 0], [], []>} : vector<12x8xbf16>, vector<12x8xbf16>, vector<12x12xf32> -> vector<12x12xf32>
    %cst_144 = arith.constant 0.353553385 : f32
    %474 = vector.broadcast %cst_144 : f32 to vector<12x12xf32>
    %475 = arith.mulf %473, %474 : vector<12x12xf32>
    %476 = arith.addf %475, %7 : vector<12x12xf32>
    %cst_145 = arith.constant dense<0xFF800000> : vector<12xf32>
    %477 = vector.multi_reduction <maximumf>, %476, %cst_145 [1] : vector<12x12xf32> to vector<12xf32>
    %478 = vector.shape_cast %477 : vector<12xf32> to vector<12x1xf32>
    %479 = vector.broadcast %478 : vector<12x1xf32> to vector<12x12xf32>
    %480 = arith.subf %476, %479 : vector<12x12xf32>
    %481 = math.exp %480 : vector<12x12xf32>
    %cst_146 = arith.constant dense<0.000000e+00> : vector<12xf32>
    %482 = vector.multi_reduction <add>, %481, %cst_146 [1] : vector<12x12xf32> to vector<12xf32>
    %483 = vector.shape_cast %482 : vector<12xf32> to vector<12x1xf32>
    %484 = tpu.reciprocal %483 {approx = true} : vector<12x1xf32> -> vector<12x1xf32>
    %485 = vector.broadcast %484 : vector<12x1xf32> to vector<12x12xf32>
    %486 = arith.mulf %481, %485 : vector<12x12xf32>
    %487 = arith.truncf %486 : vector<12x12xf32> to vector<12x12xbf16>
    %488 = arith.truncf %470 : vector<12x8xf32> to vector<12x8xbf16>
    %cst_147 = arith.constant dense<0.000000e+00> : vector<12x8xf32>
    %489 = tpu.matmul %487, %488, %cst_147 {dimension_numbers = #tpu.dot_dimension_numbers<[1], [0], [0], [1], [0, 0, 1, 1], [], []>} : vector<12x12xbf16>, vector<12x8xbf16>, vector<12x8xf32> -> vector<12x8xf32>
    %490 = vector.extract_strided_slice %458 {offsets = [0, 0], sizes = [8, 32], strides = [1, 1]} : vector<16x32xbf16> to vector<8x32xbf16>
    %491 = arith.truncf %489 : vector<12x8xf32> to vector<12x8xbf16>
    %cst_148 = arith.constant dense<0.000000e+00> : vector<12x32xf32>
    %492 = tpu.matmul %491, %490, %cst_148 {dimension_numbers = #tpu.dot_dimension_numbers<[1], [0], [0], [1], [0, 0, 1, 1], [], []>} : vector<12x8xbf16>, vector<8x32xbf16>, vector<12x32xf32> -> vector<12x32xf32>
    %493 = vector.broadcast %461 : vector<1x32xf32> to vector<12x32xf32>
    %494 = arith.addf %493, %492 : vector<12x32xf32>
    %495 = vector.extract_strided_slice %455 {offsets = [0, 8], sizes = [12, 8], strides = [1, 1]} : vector<12x16xf32> to vector<12x8xf32>
    %496 = vector.extract_strided_slice %456 {offsets = [0, 8], sizes = [12, 8], strides = [1, 1]} : vector<12x16xf32> to vector<12x8xf32>
    %497 = vector.extract_strided_slice %457 {offsets = [0, 8], sizes = [12, 8], strides = [1, 1]} : vector<12x16xf32> to vector<12x8xf32>
    %498 = arith.truncf %495 : vector<12x8xf32> to vector<12x8xbf16>
    %499 = arith.truncf %496 : vector<12x8xf32> to vector<12x8xbf16>
    %cst_149 = arith.constant dense<0.000000e+00> : vector<12x12xf32>
    %500 = tpu.matmul %498, %499, %cst_149 {dimension_numbers = #tpu.dot_dimension_numbers<[1], [1], [0], [0], [0, 0, 1, 0], [], []>} : vector<12x8xbf16>, vector<12x8xbf16>, vector<12x12xf32> -> vector<12x12xf32>
    %cst_150 = arith.constant 0.353553385 : f32
    %501 = vector.broadcast %cst_150 : f32 to vector<12x12xf32>
    %502 = arith.mulf %500, %501 : vector<12x12xf32>
    %503 = arith.addf %502, %7 : vector<12x12xf32>
    %cst_151 = arith.constant dense<0xFF800000> : vector<12xf32>
    %504 = vector.multi_reduction <maximumf>, %503, %cst_151 [1] : vector<12x12xf32> to vector<12xf32>
    %505 = vector.shape_cast %504 : vector<12xf32> to vector<12x1xf32>
    %506 = vector.broadcast %505 : vector<12x1xf32> to vector<12x12xf32>
    %507 = arith.subf %503, %506 : vector<12x12xf32>
    %508 = math.exp %507 : vector<12x12xf32>
    %cst_152 = arith.constant dense<0.000000e+00> : vector<12xf32>
    %509 = vector.multi_reduction <add>, %508, %cst_152 [1] : vector<12x12xf32> to vector<12xf32>
    %510 = vector.shape_cast %509 : vector<12xf32> to vector<12x1xf32>
    %511 = tpu.reciprocal %510 {approx = true} : vector<12x1xf32> -> vector<12x1xf32>
    %512 = vector.broadcast %511 : vector<12x1xf32> to vector<12x12xf32>
    %513 = arith.mulf %508, %512 : vector<12x12xf32>
    %514 = arith.truncf %513 : vector<12x12xf32> to vector<12x12xbf16>
    %515 = arith.truncf %497 : vector<12x8xf32> to vector<12x8xbf16>
    %cst_153 = arith.constant dense<0.000000e+00> : vector<12x8xf32>
    %516 = tpu.matmul %514, %515, %cst_153 {dimension_numbers = #tpu.dot_dimension_numbers<[1], [0], [0], [1], [0, 0, 1, 1], [], []>} : vector<12x12xbf16>, vector<12x8xbf16>, vector<12x8xf32> -> vector<12x8xf32>
    %517 = vector.extract_strided_slice %458 {offsets = [8, 0], sizes = [8, 32], strides = [1, 1]} : vector<16x32xbf16> to vector<8x32xbf16>
    %518 = arith.truncf %516 : vector<12x8xf32> to vector<12x8xbf16>
    %cst_154 = arith.constant dense<0.000000e+00> : vector<12x32xf32>
    %519 = tpu.matmul %518, %517, %cst_154 {dimension_numbers = #tpu.dot_dimension_numbers<[1], [0], [0], [1], [0, 0, 1, 1], [], []>} : vector<12x8xbf16>, vector<8x32xbf16>, vector<12x32xf32> -> vector<12x32xf32>
    %520 = arith.addf %494, %519 : vector<12x32xf32>
    %521 = arith.addf %520, %36 : vector<12x32xf32>
    %cst_155 = arith.constant dense<0.000000e+00> : vector<12xf32>
    %522 = vector.multi_reduction <add>, %521, %cst_155 [1] : vector<12x32xf32> to vector<12xf32>
    %523 = vector.shape_cast %522 : vector<12xf32> to vector<12x1xf32>
    %cst_156 = arith.constant 3.200000e+01 : f32
    %524 = vector.broadcast %cst_156 : f32 to vector<12x1xf32>
    %525 = arith.divf %523, %524 : vector<12x1xf32>
    %526 = vector.broadcast %525 : vector<12x1xf32> to vector<12x32xf32>
    %527 = arith.subf %521, %526 : vector<12x32xf32>
    %528 = arith.mulf %527, %527 : vector<12x32xf32>
    %cst_157 = arith.constant dense<0.000000e+00> : vector<12xf32>
    %529 = vector.multi_reduction <add>, %528, %cst_157 [1] : vector<12x32xf32> to vector<12xf32>
    %530 = vector.shape_cast %529 : vector<12xf32> to vector<12x1xf32>
    %cst_158 = arith.constant 3.200000e+01 : f32
    %531 = vector.broadcast %cst_158 : f32 to vector<12x1xf32>
    %532 = arith.divf %530, %531 : vector<12x1xf32>
    %533 = vector.broadcast %525 : vector<12x1xf32> to vector<12x32xf32>
    %534 = arith.subf %521, %533 : vector<12x32xf32>
    %cst_159 = arith.constant 9.99999974E-6 : f32
    %535 = vector.broadcast %cst_159 : f32 to vector<12x1xf32>
    %536 = arith.addf %532, %535 : vector<12x1xf32>
    %537 = math.rsqrt %536 : vector<12x1xf32>
    %538 = vector.broadcast %537 : vector<12x1xf32> to vector<12x32xf32>
    %539 = arith.mulf %534, %538 : vector<12x32xf32>
    %540 = vector.broadcast %464 : vector<1x32xf32> to vector<12x32xf32>
    %541 = arith.mulf %539, %540 : vector<12x32xf32>
    %542 = vector.broadcast %465 : vector<1x32xf32> to vector<12x32xf32>
    %543 = arith.addf %541, %542 : vector<12x32xf32>
    %544 = arith.truncf %543 : vector<12x32xf32> to vector<12x32xbf16>
    %cst_160 = arith.constant dense<0.000000e+00> : vector<12x64xf32>
    %545 = tpu.matmul %544, %459, %cst_160 {dimension_numbers = #tpu.dot_dimension_numbers<[1], [0], [0], [1], [0, 0, 1, 1], [], []>} : vector<12x32xbf16>, vector<32x64xbf16>, vector<12x64xf32> -> vector<12x64xf32>
    %546 = vector.broadcast %462 : vector<1x64xf32> to vector<12x64xf32>
    %547 = arith.addf %545, %546 : vector<12x64xf32>
    %cst_161 = arith.constant 0.000000e+00 : f32
    %548 = vector.broadcast %cst_161 : f32 to vector<12x64xf32>
    %549 = arith.maximumf %547, %548 : vector<12x64xf32>
    %550 = arith.truncf %549 : vector<12x64xf32> to vector<12x64xbf16>
    %cst_162 = arith.constant dense<0.000000e+00> : vector<12x32xf32>
    %551 = tpu.matmul %550, %460, %cst_162 {dimension_numbers = #tpu.dot_dimension_numbers<[1], [0], [0], [1], [0, 0, 1, 1], [], []>} : vector<12x64xbf16>, vector<64x32xbf16>, vector<12x32xf32> -> vector<12x32xf32>
    %552 = vector.broadcast %463 : vector<1x32xf32> to vector<12x32xf32>
    %553 = arith.addf %551, %552 : vector<12x32xf32>
    %554 = arith.addf %553, %543 : vector<12x32xf32>
    %cst_163 = arith.constant dense<0.000000e+00> : vector<12xf32>
    %555 = vector.multi_reduction <add>, %554, %cst_163 [1] : vector<12x32xf32> to vector<12xf32>
    %556 = vector.shape_cast %555 : vector<12xf32> to vector<12x1xf32>
    %cst_164 = arith.constant 3.200000e+01 : f32
    %557 = vector.broadcast %cst_164 : f32 to vector<12x1xf32>
    %558 = arith.divf %556, %557 : vector<12x1xf32>
    %559 = vector.broadcast %558 : vector<12x1xf32> to vector<12x32xf32>
    %560 = arith.subf %554, %559 : vector<12x32xf32>
    %561 = arith.mulf %560, %560 : vector<12x32xf32>
    %cst_165 = arith.constant dense<0.000000e+00> : vector<12xf32>
    %562 = vector.multi_reduction <add>, %561, %cst_165 [1] : vector<12x32xf32> to vector<12xf32>
    %563 = vector.shape_cast %562 : vector<12xf32> to vector<12x1xf32>
    %cst_166 = arith.constant 3.200000e+01 : f32
    %564 = vector.broadcast %cst_166 : f32 to vector<12x1xf32>
    %565 = arith.divf %563, %564 : vector<12x1xf32>
    %566 = vector.broadcast %558 : vector<12x1xf32> to vector<12x32xf32>
    %567 = arith.subf %554, %566 : vector<12x32xf32>
    %cst_167 = arith.constant 9.99999974E-6 : f32
    %568 = vector.broadcast %cst_167 : f32 to vector<12x1xf32>
    %569 = arith.addf %565, %568 : vector<12x1xf32>
    %570 = math.rsqrt %569 : vector<12x1xf32>
    %571 = vector.broadcast %570 : vector<12x1xf32> to vector<12x32xf32>
    %572 = arith.mulf %567, %571 : vector<12x32xf32>
    %573 = vector.broadcast %466 : vector<1x32xf32> to vector<12x32xf32>
    %574 = arith.mulf %572, %573 : vector<12x32xf32>
    %575 = vector.broadcast %467 : vector<1x32xf32> to vector<12x32xf32>
    %576 = arith.addf %574, %575 : vector<12x32xf32>
    %577 = arith.addf %454, %576 : vector<12x32xf32>
    %578 = arith.addf %577, %310 : vector<12x32xf32>
    %c0_168 = arith.constant 0 : index
    %c0_169 = arith.constant 0 : index
    %579 = vector.load %arg15[%c0_168, %c0_169] : memref<2x32xf32, #tpu.memory_space<vmem>>, vector<2x32xf32>
    %c0_170 = arith.constant 0 : index
    %c0_171 = arith.constant 0 : index
    %580 = vector.load %arg12[%c0_170, %c0_171] : memref<64x32xbf16, #tpu.memory_space<vmem>>, vector<64x32xbf16>
    %581 = arith.truncf %8 : vector<12x64xf32> to vector<12x64xbf16>
    %cst_172 = arith.constant dense<0.000000e+00> : vector<12x32xf32>
    %582 = tpu.matmul %581, %580, %cst_172 {dimension_numbers = #tpu.dot_dimension_numbers<[1], [0], [0], [1], [0, 0, 1, 1], [], []>} : vector<12x64xbf16>, vector<64x32xbf16>, vector<12x32xf32> -> vector<12x32xf32>
    %c0_173 = arith.constant 0 : index
    %c0_174 = arith.constant 0 : index
    %583 = vector.load %arg13[%c0_173, %c0_174] : memref<32x32xbf16, #tpu.memory_space<vmem>>, vector<32x32xbf16>
    %584 = arith.truncf %578 : vector<12x32xf32> to vector<12x32xbf16>
    %cst_175 = arith.constant dense<0.000000e+00> : vector<12x32xf32>
    %585 = tpu.matmul %584, %583, %cst_175 {dimension_numbers = #tpu.dot_dimension_numbers<[1], [0], [0], [1], [0, 0, 1, 1], [], []>} : vector<12x32xbf16>, vector<32x32xbf16>, vector<12x32xf32> -> vector<12x32xf32>
    %586 = arith.addf %582, %585 : vector<12x32xf32>
    %587 = vector.extract_strided_slice %579 {offsets = [0, 0], sizes = [1, 32], strides = [1, 1]} : vector<2x32xf32> to vector<1x32xf32>
    %588 = vector.broadcast %587 : vector<1x32xf32> to vector<12x32xf32>
    %589 = arith.addf %586, %588 : vector<12x32xf32>
    %c0_176 = arith.constant 0 : index
    %c0_177 = arith.constant 0 : index
    %590 = vector.load %arg3[%c0_176, %c0_177] : memref<12x16xf32, #tpu.memory_space<vmem>>, vector<12x16xf32>
    %c0_178 = arith.constant 0 : index
    %c0_179 = arith.constant 0 : index
    %591 = vector.load %arg14[%c0_178, %c0_179] : memref<16x32xbf16, #tpu.memory_space<vmem>>, vector<16x32xbf16>
    %592 = arith.truncf %590 : vector<12x16xf32> to vector<12x16xbf16>
    %cst_180 = arith.constant dense<0.000000e+00> : vector<12x32xf32>
    %593 = tpu.matmul %592, %591, %cst_180 {dimension_numbers = #tpu.dot_dimension_numbers<[1], [0], [0], [1], [0, 0, 1, 1], [], []>} : vector<12x16xbf16>, vector<16x32xbf16>, vector<12x32xf32> -> vector<12x32xf32>
    %594 = vector.extract_strided_slice %579 {offsets = [1, 0], sizes = [1, 32], strides = [1, 1]} : vector<2x32xf32> to vector<1x32xf32>
    %595 = vector.broadcast %594 : vector<1x32xf32> to vector<12x32xf32>
    %596 = arith.addf %593, %595 : vector<12x32xf32>
    %c2 = arith.constant 2 : index
    %c0_181 = arith.constant 0 : index
    %c0_182 = arith.constant 0 : index
    %597 = vector.load %arg16[%c2, %c0_181, %c0_182] : memref<4x32x64xbf16, #tpu.memory_space<vmem>>, vector<1x32x64xbf16>
    %598 = vector.shape_cast %597 : vector<1x32x64xbf16> to vector<32x64xbf16>
    %c2_183 = arith.constant 2 : index
    %c0_184 = arith.constant 0 : index
    %c0_185 = arith.constant 0 : index
    %599 = vector.load %arg17[%c2_183, %c0_184, %c0_185] : memref<4x32x32xbf16, #tpu.memory_space<vmem>>, vector<1x32x32xbf16>
    %600 = vector.shape_cast %599 : vector<1x32x32xbf16> to vector<32x32xbf16>
    %c2_186 = arith.constant 2 : index
    %c0_187 = arith.constant 0 : index
    %c0_188 = arith.constant 0 : index
    %601 = vector.load %arg18[%c2_186, %c0_187, %c0_188] : memref<4x32x32xbf16, #tpu.memory_space<vmem>>, vector<1x32x32xbf16>
    %602 = vector.shape_cast %601 : vector<1x32x32xbf16> to vector<32x32xbf16>
    %c2_189 = arith.constant 2 : index
    %c0_190 = arith.constant 0 : index
    %c0_191 = arith.constant 0 : index
    %603 = vector.load %arg19[%c2_189, %c0_190, %c0_191] : memref<4x64x64xbf16, #tpu.memory_space<vmem>>, vector<1x64x64xbf16>
    %604 = vector.shape_cast %603 : vector<1x64x64xbf16> to vector<64x64xbf16>
    %c2_192 = arith.constant 2 : index
    %c0_193 = arith.constant 0 : index
    %c0_194 = arith.constant 0 : index
    %605 = vector.load %arg20[%c2_192, %c0_193, %c0_194] : memref<4x128x32xbf16, #tpu.memory_space<vmem>>, vector<1x128x32xbf16>
    %606 = vector.shape_cast %605 : vector<1x128x32xbf16> to vector<128x32xbf16>
    %c2_195 = arith.constant 2 : index
    %c0_196 = arith.constant 0 : index
    %c0_197 = arith.constant 0 : index
    %607 = vector.load %arg21[%c2_195, %c0_196, %c0_197] : memref<4x16x64xf32, #tpu.memory_space<vmem>>, vector<1x16x64xf32>
    %608 = vector.shape_cast %607 : vector<1x16x64xf32> to vector<16x64xf32>
    %609 = arith.truncf %596 : vector<12x32xf32> to vector<12x32xbf16>
    %cst_198 = arith.constant dense<0.000000e+00> : vector<12x64xf32>
    %610 = tpu.matmul %609, %598, %cst_198 {dimension_numbers = #tpu.dot_dimension_numbers<[1], [0], [0], [1], [0, 0, 1, 1], [], []>} : vector<12x32xbf16>, vector<32x64xbf16>, vector<12x64xf32> -> vector<12x64xf32>
    %611 = vector.extract_strided_slice %608 {offsets = [0, 0], sizes = [1, 64], strides = [1, 1]} : vector<16x64xf32> to vector<1x64xf32>
    %612 = vector.broadcast %611 : vector<1x64xf32> to vector<12x64xf32>
    %613 = arith.addf %610, %612 : vector<12x64xf32>
    %614 = arith.truncf %589 : vector<12x32xf32> to vector<12x32xbf16>
    %cst_199 = arith.constant dense<0.000000e+00> : vector<12x32xf32>
    %615 = tpu.matmul %614, %600, %cst_199 {dimension_numbers = #tpu.dot_dimension_numbers<[1], [0], [0], [1], [0, 0, 1, 1], [], []>} : vector<12x32xbf16>, vector<32x32xbf16>, vector<12x32xf32> -> vector<12x32xf32>
    %616 = vector.extract_strided_slice %608 {offsets = [1, 0], sizes = [1, 32], strides = [1, 1]} : vector<16x64xf32> to vector<1x32xf32>
    %617 = vector.broadcast %616 : vector<1x32xf32> to vector<12x32xf32>
    %618 = arith.addf %615, %617 : vector<12x32xf32>
    %619 = vector.extract_strided_slice %613 {offsets = [0, 0], sizes = [12, 16], strides = [1, 1]} : vector<12x64xf32> to vector<12x16xf32>
    %620 = vector.extract_strided_slice %613 {offsets = [0, 16], sizes = [12, 16], strides = [1, 1]} : vector<12x64xf32> to vector<12x16xf32>
    %621 = vector.extract_strided_slice %613 {offsets = [0, 32], sizes = [12, 16], strides = [1, 1]} : vector<12x64xf32> to vector<12x16xf32>
    %622 = vector.extract_strided_slice %602 {offsets = [0, 0], sizes = [16, 32], strides = [1, 1]} : vector<32x32xbf16> to vector<16x32xbf16>
    %623 = vector.extract_strided_slice %604 {offsets = [0, 0], sizes = [32, 64], strides = [1, 1]} : vector<64x64xbf16> to vector<32x64xbf16>
    %624 = vector.extract_strided_slice %606 {offsets = [0, 0], sizes = [64, 32], strides = [1, 1]} : vector<128x32xbf16> to vector<64x32xbf16>
    %625 = vector.extract_strided_slice %608 {offsets = [2, 0], sizes = [1, 32], strides = [1, 1]} : vector<16x64xf32> to vector<1x32xf32>
    %626 = vector.extract_strided_slice %608 {offsets = [3, 0], sizes = [1, 64], strides = [1, 1]} : vector<16x64xf32> to vector<1x64xf32>
    %627 = vector.extract_strided_slice %608 {offsets = [4, 0], sizes = [1, 32], strides = [1, 1]} : vector<16x64xf32> to vector<1x32xf32>
    %628 = vector.extract_strided_slice %608 {offsets = [5, 0], sizes = [1, 32], strides = [1, 1]} : vector<16x64xf32> to vector<1x32xf32>
    %629 = vector.extract_strided_slice %608 {offsets = [6, 0], sizes = [1, 32], strides = [1, 1]} : vector<16x64xf32> to vector<1x32xf32>
    %630 = vector.extract_strided_slice %608 {offsets = [7, 0], sizes = [1, 32], strides = [1, 1]} : vector<16x64xf32> to vector<1x32xf32>
    %631 = vector.extract_strided_slice %608 {offsets = [8, 0], sizes = [1, 32], strides = [1, 1]} : vector<16x64xf32> to vector<1x32xf32>
    %632 = vector.extract_strided_slice %619 {offsets = [0, 0], sizes = [12, 8], strides = [1, 1]} : vector<12x16xf32> to vector<12x8xf32>
    %633 = vector.extract_strided_slice %620 {offsets = [0, 0], sizes = [12, 8], strides = [1, 1]} : vector<12x16xf32> to vector<12x8xf32>
    %634 = vector.extract_strided_slice %621 {offsets = [0, 0], sizes = [12, 8], strides = [1, 1]} : vector<12x16xf32> to vector<12x8xf32>
    %635 = arith.truncf %632 : vector<12x8xf32> to vector<12x8xbf16>
    %636 = arith.truncf %633 : vector<12x8xf32> to vector<12x8xbf16>
    %cst_200 = arith.constant dense<0.000000e+00> : vector<12x12xf32>
    %637 = tpu.matmul %635, %636, %cst_200 {dimension_numbers = #tpu.dot_dimension_numbers<[1], [1], [0], [0], [0, 0, 1, 0], [], []>} : vector<12x8xbf16>, vector<12x8xbf16>, vector<12x12xf32> -> vector<12x12xf32>
    %cst_201 = arith.constant 0.353553385 : f32
    %638 = vector.broadcast %cst_201 : f32 to vector<12x12xf32>
    %639 = arith.mulf %637, %638 : vector<12x12xf32>
    %640 = arith.addf %639, %7 : vector<12x12xf32>
    %cst_202 = arith.constant dense<0xFF800000> : vector<12xf32>
    %641 = vector.multi_reduction <maximumf>, %640, %cst_202 [1] : vector<12x12xf32> to vector<12xf32>
    %642 = vector.shape_cast %641 : vector<12xf32> to vector<12x1xf32>
    %643 = vector.broadcast %642 : vector<12x1xf32> to vector<12x12xf32>
    %644 = arith.subf %640, %643 : vector<12x12xf32>
    %645 = math.exp %644 : vector<12x12xf32>
    %cst_203 = arith.constant dense<0.000000e+00> : vector<12xf32>
    %646 = vector.multi_reduction <add>, %645, %cst_203 [1] : vector<12x12xf32> to vector<12xf32>
    %647 = vector.shape_cast %646 : vector<12xf32> to vector<12x1xf32>
    %648 = tpu.reciprocal %647 {approx = true} : vector<12x1xf32> -> vector<12x1xf32>
    %649 = vector.broadcast %648 : vector<12x1xf32> to vector<12x12xf32>
    %650 = arith.mulf %645, %649 : vector<12x12xf32>
    %651 = arith.truncf %650 : vector<12x12xf32> to vector<12x12xbf16>
    %652 = arith.truncf %634 : vector<12x8xf32> to vector<12x8xbf16>
    %cst_204 = arith.constant dense<0.000000e+00> : vector<12x8xf32>
    %653 = tpu.matmul %651, %652, %cst_204 {dimension_numbers = #tpu.dot_dimension_numbers<[1], [0], [0], [1], [0, 0, 1, 1], [], []>} : vector<12x12xbf16>, vector<12x8xbf16>, vector<12x8xf32> -> vector<12x8xf32>
    %654 = vector.extract_strided_slice %622 {offsets = [0, 0], sizes = [8, 32], strides = [1, 1]} : vector<16x32xbf16> to vector<8x32xbf16>
    %655 = arith.truncf %653 : vector<12x8xf32> to vector<12x8xbf16>
    %cst_205 = arith.constant dense<0.000000e+00> : vector<12x32xf32>
    %656 = tpu.matmul %655, %654, %cst_205 {dimension_numbers = #tpu.dot_dimension_numbers<[1], [0], [0], [1], [0, 0, 1, 1], [], []>} : vector<12x8xbf16>, vector<8x32xbf16>, vector<12x32xf32> -> vector<12x32xf32>
    %657 = vector.broadcast %625 : vector<1x32xf32> to vector<12x32xf32>
    %658 = arith.addf %657, %656 : vector<12x32xf32>
    %659 = vector.extract_strided_slice %619 {offsets = [0, 8], sizes = [12, 8], strides = [1, 1]} : vector<12x16xf32> to vector<12x8xf32>
    %660 = vector.extract_strided_slice %620 {offsets = [0, 8], sizes = [12, 8], strides = [1, 1]} : vector<12x16xf32> to vector<12x8xf32>
    %661 = vector.extract_strided_slice %621 {offsets = [0, 8], sizes = [12, 8], strides = [1, 1]} : vector<12x16xf32> to vector<12x8xf32>
    %662 = arith.truncf %659 : vector<12x8xf32> to vector<12x8xbf16>
    %663 = arith.truncf %660 : vector<12x8xf32> to vector<12x8xbf16>
    %cst_206 = arith.constant dense<0.000000e+00> : vector<12x12xf32>
    %664 = tpu.matmul %662, %663, %cst_206 {dimension_numbers = #tpu.dot_dimension_numbers<[1], [1], [0], [0], [0, 0, 1, 0], [], []>} : vector<12x8xbf16>, vector<12x8xbf16>, vector<12x12xf32> -> vector<12x12xf32>
    %cst_207 = arith.constant 0.353553385 : f32
    %665 = vector.broadcast %cst_207 : f32 to vector<12x12xf32>
    %666 = arith.mulf %664, %665 : vector<12x12xf32>
    %667 = arith.addf %666, %7 : vector<12x12xf32>
    %cst_208 = arith.constant dense<0xFF800000> : vector<12xf32>
    %668 = vector.multi_reduction <maximumf>, %667, %cst_208 [1] : vector<12x12xf32> to vector<12xf32>
    %669 = vector.shape_cast %668 : vector<12xf32> to vector<12x1xf32>
    %670 = vector.broadcast %669 : vector<12x1xf32> to vector<12x12xf32>
    %671 = arith.subf %667, %670 : vector<12x12xf32>
    %672 = math.exp %671 : vector<12x12xf32>
    %cst_209 = arith.constant dense<0.000000e+00> : vector<12xf32>
    %673 = vector.multi_reduction <add>, %672, %cst_209 [1] : vector<12x12xf32> to vector<12xf32>
    %674 = vector.shape_cast %673 : vector<12xf32> to vector<12x1xf32>
    %675 = tpu.reciprocal %674 {approx = true} : vector<12x1xf32> -> vector<12x1xf32>
    %676 = vector.broadcast %675 : vector<12x1xf32> to vector<12x12xf32>
    %677 = arith.mulf %672, %676 : vector<12x12xf32>
    %678 = arith.truncf %677 : vector<12x12xf32> to vector<12x12xbf16>
    %679 = arith.truncf %661 : vector<12x8xf32> to vector<12x8xbf16>
    %cst_210 = arith.constant dense<0.000000e+00> : vector<12x8xf32>
    %680 = tpu.matmul %678, %679, %cst_210 {dimension_numbers = #tpu.dot_dimension_numbers<[1], [0], [0], [1], [0, 0, 1, 1], [], []>} : vector<12x12xbf16>, vector<12x8xbf16>, vector<12x8xf32> -> vector<12x8xf32>
    %681 = vector.extract_strided_slice %622 {offsets = [8, 0], sizes = [8, 32], strides = [1, 1]} : vector<16x32xbf16> to vector<8x32xbf16>
    %682 = arith.truncf %680 : vector<12x8xf32> to vector<12x8xbf16>
    %cst_211 = arith.constant dense<0.000000e+00> : vector<12x32xf32>
    %683 = tpu.matmul %682, %681, %cst_211 {dimension_numbers = #tpu.dot_dimension_numbers<[1], [0], [0], [1], [0, 0, 1, 1], [], []>} : vector<12x8xbf16>, vector<8x32xbf16>, vector<12x32xf32> -> vector<12x32xf32>
    %684 = arith.addf %658, %683 : vector<12x32xf32>
    %685 = arith.addf %684, %596 : vector<12x32xf32>
    %cst_212 = arith.constant dense<0.000000e+00> : vector<12xf32>
    %686 = vector.multi_reduction <add>, %685, %cst_212 [1] : vector<12x32xf32> to vector<12xf32>
    %687 = vector.shape_cast %686 : vector<12xf32> to vector<12x1xf32>
    %cst_213 = arith.constant 3.200000e+01 : f32
    %688 = vector.broadcast %cst_213 : f32 to vector<12x1xf32>
    %689 = arith.divf %687, %688 : vector<12x1xf32>
    %690 = vector.broadcast %689 : vector<12x1xf32> to vector<12x32xf32>
    %691 = arith.subf %685, %690 : vector<12x32xf32>
    %692 = arith.mulf %691, %691 : vector<12x32xf32>
    %cst_214 = arith.constant dense<0.000000e+00> : vector<12xf32>
    %693 = vector.multi_reduction <add>, %692, %cst_214 [1] : vector<12x32xf32> to vector<12xf32>
    %694 = vector.shape_cast %693 : vector<12xf32> to vector<12x1xf32>
    %cst_215 = arith.constant 3.200000e+01 : f32
    %695 = vector.broadcast %cst_215 : f32 to vector<12x1xf32>
    %696 = arith.divf %694, %695 : vector<12x1xf32>
    %697 = vector.broadcast %689 : vector<12x1xf32> to vector<12x32xf32>
    %698 = arith.subf %685, %697 : vector<12x32xf32>
    %cst_216 = arith.constant 9.99999974E-6 : f32
    %699 = vector.broadcast %cst_216 : f32 to vector<12x1xf32>
    %700 = arith.addf %696, %699 : vector<12x1xf32>
    %701 = math.rsqrt %700 : vector<12x1xf32>
    %702 = vector.broadcast %701 : vector<12x1xf32> to vector<12x32xf32>
    %703 = arith.mulf %698, %702 : vector<12x32xf32>
    %704 = vector.broadcast %628 : vector<1x32xf32> to vector<12x32xf32>
    %705 = arith.mulf %703, %704 : vector<12x32xf32>
    %706 = vector.broadcast %629 : vector<1x32xf32> to vector<12x32xf32>
    %707 = arith.addf %705, %706 : vector<12x32xf32>
    %708 = arith.truncf %707 : vector<12x32xf32> to vector<12x32xbf16>
    %cst_217 = arith.constant dense<0.000000e+00> : vector<12x64xf32>
    %709 = tpu.matmul %708, %623, %cst_217 {dimension_numbers = #tpu.dot_dimension_numbers<[1], [0], [0], [1], [0, 0, 1, 1], [], []>} : vector<12x32xbf16>, vector<32x64xbf16>, vector<12x64xf32> -> vector<12x64xf32>
    %710 = vector.broadcast %626 : vector<1x64xf32> to vector<12x64xf32>
    %711 = arith.addf %709, %710 : vector<12x64xf32>
    %cst_218 = arith.constant 0.000000e+00 : f32
    %712 = vector.broadcast %cst_218 : f32 to vector<12x64xf32>
    %713 = arith.maximumf %711, %712 : vector<12x64xf32>
    %714 = arith.truncf %713 : vector<12x64xf32> to vector<12x64xbf16>
    %cst_219 = arith.constant dense<0.000000e+00> : vector<12x32xf32>
    %715 = tpu.matmul %714, %624, %cst_219 {dimension_numbers = #tpu.dot_dimension_numbers<[1], [0], [0], [1], [0, 0, 1, 1], [], []>} : vector<12x64xbf16>, vector<64x32xbf16>, vector<12x32xf32> -> vector<12x32xf32>
    %716 = vector.broadcast %627 : vector<1x32xf32> to vector<12x32xf32>
    %717 = arith.addf %715, %716 : vector<12x32xf32>
    %718 = arith.addf %717, %707 : vector<12x32xf32>
    %cst_220 = arith.constant dense<0.000000e+00> : vector<12xf32>
    %719 = vector.multi_reduction <add>, %718, %cst_220 [1] : vector<12x32xf32> to vector<12xf32>
    %720 = vector.shape_cast %719 : vector<12xf32> to vector<12x1xf32>
    %cst_221 = arith.constant 3.200000e+01 : f32
    %721 = vector.broadcast %cst_221 : f32 to vector<12x1xf32>
    %722 = arith.divf %720, %721 : vector<12x1xf32>
    %723 = vector.broadcast %722 : vector<12x1xf32> to vector<12x32xf32>
    %724 = arith.subf %718, %723 : vector<12x32xf32>
    %725 = arith.mulf %724, %724 : vector<12x32xf32>
    %cst_222 = arith.constant dense<0.000000e+00> : vector<12xf32>
    %726 = vector.multi_reduction <add>, %725, %cst_222 [1] : vector<12x32xf32> to vector<12xf32>
    %727 = vector.shape_cast %726 : vector<12xf32> to vector<12x1xf32>
    %cst_223 = arith.constant 3.200000e+01 : f32
    %728 = vector.broadcast %cst_223 : f32 to vector<12x1xf32>
    %729 = arith.divf %727, %728 : vector<12x1xf32>
    %730 = vector.broadcast %722 : vector<12x1xf32> to vector<12x32xf32>
    %731 = arith.subf %718, %730 : vector<12x32xf32>
    %cst_224 = arith.constant 9.99999974E-6 : f32
    %732 = vector.broadcast %cst_224 : f32 to vector<12x1xf32>
    %733 = arith.addf %729, %732 : vector<12x1xf32>
    %734 = math.rsqrt %733 : vector<12x1xf32>
    %735 = vector.broadcast %734 : vector<12x1xf32> to vector<12x32xf32>
    %736 = arith.mulf %731, %735 : vector<12x32xf32>
    %737 = vector.broadcast %630 : vector<1x32xf32> to vector<12x32xf32>
    %738 = arith.mulf %736, %737 : vector<12x32xf32>
    %739 = vector.broadcast %631 : vector<1x32xf32> to vector<12x32xf32>
    %740 = arith.addf %738, %739 : vector<12x32xf32>
    %741 = vector.extract_strided_slice %613 {offsets = [0, 48], sizes = [12, 16], strides = [1, 1]} : vector<12x64xf32> to vector<12x16xf32>
    %742 = vector.extract_strided_slice %618 {offsets = [0, 0], sizes = [12, 16], strides = [1, 1]} : vector<12x32xf32> to vector<12x16xf32>
    %743 = vector.extract_strided_slice %618 {offsets = [0, 16], sizes = [12, 16], strides = [1, 1]} : vector<12x32xf32> to vector<12x16xf32>
    %744 = vector.extract_strided_slice %602 {offsets = [16, 0], sizes = [16, 32], strides = [1, 1]} : vector<32x32xbf16> to vector<16x32xbf16>
    %745 = vector.extract_strided_slice %604 {offsets = [32, 0], sizes = [32, 64], strides = [1, 1]} : vector<64x64xbf16> to vector<32x64xbf16>
    %746 = vector.extract_strided_slice %606 {offsets = [64, 0], sizes = [64, 32], strides = [1, 1]} : vector<128x32xbf16> to vector<64x32xbf16>
    %747 = vector.extract_strided_slice %608 {offsets = [9, 0], sizes = [1, 32], strides = [1, 1]} : vector<16x64xf32> to vector<1x32xf32>
    %748 = vector.extract_strided_slice %608 {offsets = [10, 0], sizes = [1, 64], strides = [1, 1]} : vector<16x64xf32> to vector<1x64xf32>
    %749 = vector.extract_strided_slice %608 {offsets = [11, 0], sizes = [1, 32], strides = [1, 1]} : vector<16x64xf32> to vector<1x32xf32>
    %750 = vector.extract_strided_slice %608 {offsets = [12, 0], sizes = [1, 32], strides = [1, 1]} : vector<16x64xf32> to vector<1x32xf32>
    %751 = vector.extract_strided_slice %608 {offsets = [13, 0], sizes = [1, 32], strides = [1, 1]} : vector<16x64xf32> to vector<1x32xf32>
    %752 = vector.extract_strided_slice %608 {offsets = [14, 0], sizes = [1, 32], strides = [1, 1]} : vector<16x64xf32> to vector<1x32xf32>
    %753 = vector.extract_strided_slice %608 {offsets = [15, 0], sizes = [1, 32], strides = [1, 1]} : vector<16x64xf32> to vector<1x32xf32>
    %754 = vector.extract_strided_slice %741 {offsets = [0, 0], sizes = [12, 8], strides = [1, 1]} : vector<12x16xf32> to vector<12x8xf32>
    %755 = vector.extract_strided_slice %742 {offsets = [0, 0], sizes = [12, 8], strides = [1, 1]} : vector<12x16xf32> to vector<12x8xf32>
    %756 = vector.extract_strided_slice %743 {offsets = [0, 0], sizes = [12, 8], strides = [1, 1]} : vector<12x16xf32> to vector<12x8xf32>
    %757 = arith.truncf %754 : vector<12x8xf32> to vector<12x8xbf16>
    %758 = arith.truncf %755 : vector<12x8xf32> to vector<12x8xbf16>
    %cst_225 = arith.constant dense<0.000000e+00> : vector<12x12xf32>
    %759 = tpu.matmul %757, %758, %cst_225 {dimension_numbers = #tpu.dot_dimension_numbers<[1], [1], [0], [0], [0, 0, 1, 0], [], []>} : vector<12x8xbf16>, vector<12x8xbf16>, vector<12x12xf32> -> vector<12x12xf32>
    %cst_226 = arith.constant 0.353553385 : f32
    %760 = vector.broadcast %cst_226 : f32 to vector<12x12xf32>
    %761 = arith.mulf %759, %760 : vector<12x12xf32>
    %762 = arith.addf %761, %7 : vector<12x12xf32>
    %cst_227 = arith.constant dense<0xFF800000> : vector<12xf32>
    %763 = vector.multi_reduction <maximumf>, %762, %cst_227 [1] : vector<12x12xf32> to vector<12xf32>
    %764 = vector.shape_cast %763 : vector<12xf32> to vector<12x1xf32>
    %765 = vector.broadcast %764 : vector<12x1xf32> to vector<12x12xf32>
    %766 = arith.subf %762, %765 : vector<12x12xf32>
    %767 = math.exp %766 : vector<12x12xf32>
    %cst_228 = arith.constant dense<0.000000e+00> : vector<12xf32>
    %768 = vector.multi_reduction <add>, %767, %cst_228 [1] : vector<12x12xf32> to vector<12xf32>
    %769 = vector.shape_cast %768 : vector<12xf32> to vector<12x1xf32>
    %770 = tpu.reciprocal %769 {approx = true} : vector<12x1xf32> -> vector<12x1xf32>
    %771 = vector.broadcast %770 : vector<12x1xf32> to vector<12x12xf32>
    %772 = arith.mulf %767, %771 : vector<12x12xf32>
    %773 = arith.truncf %772 : vector<12x12xf32> to vector<12x12xbf16>
    %774 = arith.truncf %756 : vector<12x8xf32> to vector<12x8xbf16>
    %cst_229 = arith.constant dense<0.000000e+00> : vector<12x8xf32>
    %775 = tpu.matmul %773, %774, %cst_229 {dimension_numbers = #tpu.dot_dimension_numbers<[1], [0], [0], [1], [0, 0, 1, 1], [], []>} : vector<12x12xbf16>, vector<12x8xbf16>, vector<12x8xf32> -> vector<12x8xf32>
    %776 = vector.extract_strided_slice %744 {offsets = [0, 0], sizes = [8, 32], strides = [1, 1]} : vector<16x32xbf16> to vector<8x32xbf16>
    %777 = arith.truncf %775 : vector<12x8xf32> to vector<12x8xbf16>
    %cst_230 = arith.constant dense<0.000000e+00> : vector<12x32xf32>
    %778 = tpu.matmul %777, %776, %cst_230 {dimension_numbers = #tpu.dot_dimension_numbers<[1], [0], [0], [1], [0, 0, 1, 1], [], []>} : vector<12x8xbf16>, vector<8x32xbf16>, vector<12x32xf32> -> vector<12x32xf32>
    %779 = vector.broadcast %747 : vector<1x32xf32> to vector<12x32xf32>
    %780 = arith.addf %779, %778 : vector<12x32xf32>
    %781 = vector.extract_strided_slice %741 {offsets = [0, 8], sizes = [12, 8], strides = [1, 1]} : vector<12x16xf32> to vector<12x8xf32>
    %782 = vector.extract_strided_slice %742 {offsets = [0, 8], sizes = [12, 8], strides = [1, 1]} : vector<12x16xf32> to vector<12x8xf32>
    %783 = vector.extract_strided_slice %743 {offsets = [0, 8], sizes = [12, 8], strides = [1, 1]} : vector<12x16xf32> to vector<12x8xf32>
    %784 = arith.truncf %781 : vector<12x8xf32> to vector<12x8xbf16>
    %785 = arith.truncf %782 : vector<12x8xf32> to vector<12x8xbf16>
    %cst_231 = arith.constant dense<0.000000e+00> : vector<12x12xf32>
    %786 = tpu.matmul %784, %785, %cst_231 {dimension_numbers = #tpu.dot_dimension_numbers<[1], [1], [0], [0], [0, 0, 1, 0], [], []>} : vector<12x8xbf16>, vector<12x8xbf16>, vector<12x12xf32> -> vector<12x12xf32>
    %cst_232 = arith.constant 0.353553385 : f32
    %787 = vector.broadcast %cst_232 : f32 to vector<12x12xf32>
    %788 = arith.mulf %786, %787 : vector<12x12xf32>
    %789 = arith.addf %788, %7 : vector<12x12xf32>
    %cst_233 = arith.constant dense<0xFF800000> : vector<12xf32>
    %790 = vector.multi_reduction <maximumf>, %789, %cst_233 [1] : vector<12x12xf32> to vector<12xf32>
    %791 = vector.shape_cast %790 : vector<12xf32> to vector<12x1xf32>
    %792 = vector.broadcast %791 : vector<12x1xf32> to vector<12x12xf32>
    %793 = arith.subf %789, %792 : vector<12x12xf32>
    %794 = math.exp %793 : vector<12x12xf32>
    %cst_234 = arith.constant dense<0.000000e+00> : vector<12xf32>
    %795 = vector.multi_reduction <add>, %794, %cst_234 [1] : vector<12x12xf32> to vector<12xf32>
    %796 = vector.shape_cast %795 : vector<12xf32> to vector<12x1xf32>
    %797 = tpu.reciprocal %796 {approx = true} : vector<12x1xf32> -> vector<12x1xf32>
    %798 = vector.broadcast %797 : vector<12x1xf32> to vector<12x12xf32>
    %799 = arith.mulf %794, %798 : vector<12x12xf32>
    %800 = arith.truncf %799 : vector<12x12xf32> to vector<12x12xbf16>
    %801 = arith.truncf %783 : vector<12x8xf32> to vector<12x8xbf16>
    %cst_235 = arith.constant dense<0.000000e+00> : vector<12x8xf32>
    %802 = tpu.matmul %800, %801, %cst_235 {dimension_numbers = #tpu.dot_dimension_numbers<[1], [0], [0], [1], [0, 0, 1, 1], [], []>} : vector<12x12xbf16>, vector<12x8xbf16>, vector<12x8xf32> -> vector<12x8xf32>
    %803 = vector.extract_strided_slice %744 {offsets = [8, 0], sizes = [8, 32], strides = [1, 1]} : vector<16x32xbf16> to vector<8x32xbf16>
    %804 = arith.truncf %802 : vector<12x8xf32> to vector<12x8xbf16>
    %cst_236 = arith.constant dense<0.000000e+00> : vector<12x32xf32>
    %805 = tpu.matmul %804, %803, %cst_236 {dimension_numbers = #tpu.dot_dimension_numbers<[1], [0], [0], [1], [0, 0, 1, 1], [], []>} : vector<12x8xbf16>, vector<8x32xbf16>, vector<12x32xf32> -> vector<12x32xf32>
    %806 = arith.addf %780, %805 : vector<12x32xf32>
    %807 = arith.addf %806, %596 : vector<12x32xf32>
    %cst_237 = arith.constant dense<0.000000e+00> : vector<12xf32>
    %808 = vector.multi_reduction <add>, %807, %cst_237 [1] : vector<12x32xf32> to vector<12xf32>
    %809 = vector.shape_cast %808 : vector<12xf32> to vector<12x1xf32>
    %cst_238 = arith.constant 3.200000e+01 : f32
    %810 = vector.broadcast %cst_238 : f32 to vector<12x1xf32>
    %811 = arith.divf %809, %810 : vector<12x1xf32>
    %812 = vector.broadcast %811 : vector<12x1xf32> to vector<12x32xf32>
    %813 = arith.subf %807, %812 : vector<12x32xf32>
    %814 = arith.mulf %813, %813 : vector<12x32xf32>
    %cst_239 = arith.constant dense<0.000000e+00> : vector<12xf32>
    %815 = vector.multi_reduction <add>, %814, %cst_239 [1] : vector<12x32xf32> to vector<12xf32>
    %816 = vector.shape_cast %815 : vector<12xf32> to vector<12x1xf32>
    %cst_240 = arith.constant 3.200000e+01 : f32
    %817 = vector.broadcast %cst_240 : f32 to vector<12x1xf32>
    %818 = arith.divf %816, %817 : vector<12x1xf32>
    %819 = vector.broadcast %811 : vector<12x1xf32> to vector<12x32xf32>
    %820 = arith.subf %807, %819 : vector<12x32xf32>
    %cst_241 = arith.constant 9.99999974E-6 : f32
    %821 = vector.broadcast %cst_241 : f32 to vector<12x1xf32>
    %822 = arith.addf %818, %821 : vector<12x1xf32>
    %823 = math.rsqrt %822 : vector<12x1xf32>
    %824 = vector.broadcast %823 : vector<12x1xf32> to vector<12x32xf32>
    %825 = arith.mulf %820, %824 : vector<12x32xf32>
    %826 = vector.broadcast %750 : vector<1x32xf32> to vector<12x32xf32>
    %827 = arith.mulf %825, %826 : vector<12x32xf32>
    %828 = vector.broadcast %751 : vector<1x32xf32> to vector<12x32xf32>
    %829 = arith.addf %827, %828 : vector<12x32xf32>
    %830 = arith.truncf %829 : vector<12x32xf32> to vector<12x32xbf16>
    %cst_242 = arith.constant dense<0.000000e+00> : vector<12x64xf32>
    %831 = tpu.matmul %830, %745, %cst_242 {dimension_numbers = #tpu.dot_dimension_numbers<[1], [0], [0], [1], [0, 0, 1, 1], [], []>} : vector<12x32xbf16>, vector<32x64xbf16>, vector<12x64xf32> -> vector<12x64xf32>
    %832 = vector.broadcast %748 : vector<1x64xf32> to vector<12x64xf32>
    %833 = arith.addf %831, %832 : vector<12x64xf32>
    %cst_243 = arith.constant 0.000000e+00 : f32
    %834 = vector.broadcast %cst_243 : f32 to vector<12x64xf32>
    %835 = arith.maximumf %833, %834 : vector<12x64xf32>
    %836 = arith.truncf %835 : vector<12x64xf32> to vector<12x64xbf16>
    %cst_244 = arith.constant dense<0.000000e+00> : vector<12x32xf32>
    %837 = tpu.matmul %836, %746, %cst_244 {dimension_numbers = #tpu.dot_dimension_numbers<[1], [0], [0], [1], [0, 0, 1, 1], [], []>} : vector<12x64xbf16>, vector<64x32xbf16>, vector<12x32xf32> -> vector<12x32xf32>
    %838 = vector.broadcast %749 : vector<1x32xf32> to vector<12x32xf32>
    %839 = arith.addf %837, %838 : vector<12x32xf32>
    %840 = arith.addf %839, %829 : vector<12x32xf32>
    %cst_245 = arith.constant dense<0.000000e+00> : vector<12xf32>
    %841 = vector.multi_reduction <add>, %840, %cst_245 [1] : vector<12x32xf32> to vector<12xf32>
    %842 = vector.shape_cast %841 : vector<12xf32> to vector<12x1xf32>
    %cst_246 = arith.constant 3.200000e+01 : f32
    %843 = vector.broadcast %cst_246 : f32 to vector<12x1xf32>
    %844 = arith.divf %842, %843 : vector<12x1xf32>
    %845 = vector.broadcast %844 : vector<12x1xf32> to vector<12x32xf32>
    %846 = arith.subf %840, %845 : vector<12x32xf32>
    %847 = arith.mulf %846, %846 : vector<12x32xf32>
    %cst_247 = arith.constant dense<0.000000e+00> : vector<12xf32>
    %848 = vector.multi_reduction <add>, %847, %cst_247 [1] : vector<12x32xf32> to vector<12xf32>
    %849 = vector.shape_cast %848 : vector<12xf32> to vector<12x1xf32>
    %cst_248 = arith.constant 3.200000e+01 : f32
    %850 = vector.broadcast %cst_248 : f32 to vector<12x1xf32>
    %851 = arith.divf %849, %850 : vector<12x1xf32>
    %852 = vector.broadcast %844 : vector<12x1xf32> to vector<12x32xf32>
    %853 = arith.subf %840, %852 : vector<12x32xf32>
    %cst_249 = arith.constant 9.99999974E-6 : f32
    %854 = vector.broadcast %cst_249 : f32 to vector<12x1xf32>
    %855 = arith.addf %851, %854 : vector<12x1xf32>
    %856 = math.rsqrt %855 : vector<12x1xf32>
    %857 = vector.broadcast %856 : vector<12x1xf32> to vector<12x32xf32>
    %858 = arith.mulf %853, %857 : vector<12x32xf32>
    %859 = vector.broadcast %752 : vector<1x32xf32> to vector<12x32xf32>
    %860 = arith.mulf %858, %859 : vector<12x32xf32>
    %861 = vector.broadcast %753 : vector<1x32xf32> to vector<12x32xf32>
    %862 = arith.addf %860, %861 : vector<12x32xf32>
    %863 = arith.addf %740, %862 : vector<12x32xf32>
    %c3 = arith.constant 3 : index
    %c0_250 = arith.constant 0 : index
    %c0_251 = arith.constant 0 : index
    %864 = vector.load %arg16[%c3, %c0_250, %c0_251] : memref<4x32x64xbf16, #tpu.memory_space<vmem>>, vector<1x32x64xbf16>
    %865 = vector.shape_cast %864 : vector<1x32x64xbf16> to vector<32x64xbf16>
    %c3_252 = arith.constant 3 : index
    %c0_253 = arith.constant 0 : index
    %c0_254 = arith.constant 0 : index
    %866 = vector.load %arg17[%c3_252, %c0_253, %c0_254] : memref<4x32x32xbf16, #tpu.memory_space<vmem>>, vector<1x32x32xbf16>
    %867 = vector.shape_cast %866 : vector<1x32x32xbf16> to vector<32x32xbf16>
    %c3_255 = arith.constant 3 : index
    %c0_256 = arith.constant 0 : index
    %c0_257 = arith.constant 0 : index
    %868 = vector.load %arg18[%c3_255, %c0_256, %c0_257] : memref<4x32x32xbf16, #tpu.memory_space<vmem>>, vector<1x32x32xbf16>
    %869 = vector.shape_cast %868 : vector<1x32x32xbf16> to vector<32x32xbf16>
    %c3_258 = arith.constant 3 : index
    %c0_259 = arith.constant 0 : index
    %c0_260 = arith.constant 0 : index
    %870 = vector.load %arg19[%c3_258, %c0_259, %c0_260] : memref<4x64x64xbf16, #tpu.memory_space<vmem>>, vector<1x64x64xbf16>
    %871 = vector.shape_cast %870 : vector<1x64x64xbf16> to vector<64x64xbf16>
    %c3_261 = arith.constant 3 : index
    %c0_262 = arith.constant 0 : index
    %c0_263 = arith.constant 0 : index
    %872 = vector.load %arg20[%c3_261, %c0_262, %c0_263] : memref<4x128x32xbf16, #tpu.memory_space<vmem>>, vector<1x128x32xbf16>
    %873 = vector.shape_cast %872 : vector<1x128x32xbf16> to vector<128x32xbf16>
    %c3_264 = arith.constant 3 : index
    %c0_265 = arith.constant 0 : index
    %c0_266 = arith.constant 0 : index
    %874 = vector.load %arg21[%c3_264, %c0_265, %c0_266] : memref<4x16x64xf32, #tpu.memory_space<vmem>>, vector<1x16x64xf32>
    %875 = vector.shape_cast %874 : vector<1x16x64xf32> to vector<16x64xf32>
    %876 = arith.truncf %589 : vector<12x32xf32> to vector<12x32xbf16>
    %cst_267 = arith.constant dense<0.000000e+00> : vector<12x64xf32>
    %877 = tpu.matmul %876, %865, %cst_267 {dimension_numbers = #tpu.dot_dimension_numbers<[1], [0], [0], [1], [0, 0, 1, 1], [], []>} : vector<12x32xbf16>, vector<32x64xbf16>, vector<12x64xf32> -> vector<12x64xf32>
    %878 = vector.extract_strided_slice %875 {offsets = [0, 0], sizes = [1, 64], strides = [1, 1]} : vector<16x64xf32> to vector<1x64xf32>
    %879 = vector.broadcast %878 : vector<1x64xf32> to vector<12x64xf32>
    %880 = arith.addf %877, %879 : vector<12x64xf32>
    %881 = arith.truncf %596 : vector<12x32xf32> to vector<12x32xbf16>
    %cst_268 = arith.constant dense<0.000000e+00> : vector<12x32xf32>
    %882 = tpu.matmul %881, %867, %cst_268 {dimension_numbers = #tpu.dot_dimension_numbers<[1], [0], [0], [1], [0, 0, 1, 1], [], []>} : vector<12x32xbf16>, vector<32x32xbf16>, vector<12x32xf32> -> vector<12x32xf32>
    %883 = vector.extract_strided_slice %875 {offsets = [1, 0], sizes = [1, 32], strides = [1, 1]} : vector<16x64xf32> to vector<1x32xf32>
    %884 = vector.broadcast %883 : vector<1x32xf32> to vector<12x32xf32>
    %885 = arith.addf %882, %884 : vector<12x32xf32>
    %886 = vector.extract_strided_slice %880 {offsets = [0, 0], sizes = [12, 16], strides = [1, 1]} : vector<12x64xf32> to vector<12x16xf32>
    %887 = vector.extract_strided_slice %880 {offsets = [0, 16], sizes = [12, 16], strides = [1, 1]} : vector<12x64xf32> to vector<12x16xf32>
    %888 = vector.extract_strided_slice %880 {offsets = [0, 32], sizes = [12, 16], strides = [1, 1]} : vector<12x64xf32> to vector<12x16xf32>
    %889 = vector.extract_strided_slice %869 {offsets = [0, 0], sizes = [16, 32], strides = [1, 1]} : vector<32x32xbf16> to vector<16x32xbf16>
    %890 = vector.extract_strided_slice %871 {offsets = [0, 0], sizes = [32, 64], strides = [1, 1]} : vector<64x64xbf16> to vector<32x64xbf16>
    %891 = vector.extract_strided_slice %873 {offsets = [0, 0], sizes = [64, 32], strides = [1, 1]} : vector<128x32xbf16> to vector<64x32xbf16>
    %892 = vector.extract_strided_slice %875 {offsets = [2, 0], sizes = [1, 32], strides = [1, 1]} : vector<16x64xf32> to vector<1x32xf32>
    %893 = vector.extract_strided_slice %875 {offsets = [3, 0], sizes = [1, 64], strides = [1, 1]} : vector<16x64xf32> to vector<1x64xf32>
    %894 = vector.extract_strided_slice %875 {offsets = [4, 0], sizes = [1, 32], strides = [1, 1]} : vector<16x64xf32> to vector<1x32xf32>
    %895 = vector.extract_strided_slice %875 {offsets = [5, 0], sizes = [1, 32], strides = [1, 1]} : vector<16x64xf32> to vector<1x32xf32>
    %896 = vector.extract_strided_slice %875 {offsets = [6, 0], sizes = [1, 32], strides = [1, 1]} : vector<16x64xf32> to vector<1x32xf32>
    %897 = vector.extract_strided_slice %875 {offsets = [7, 0], sizes = [1, 32], strides = [1, 1]} : vector<16x64xf32> to vector<1x32xf32>
    %898 = vector.extract_strided_slice %875 {offsets = [8, 0], sizes = [1, 32], strides = [1, 1]} : vector<16x64xf32> to vector<1x32xf32>
    %899 = vector.extract_strided_slice %886 {offsets = [0, 0], sizes = [12, 8], strides = [1, 1]} : vector<12x16xf32> to vector<12x8xf32>
    %900 = vector.extract_strided_slice %887 {offsets = [0, 0], sizes = [12, 8], strides = [1, 1]} : vector<12x16xf32> to vector<12x8xf32>
    %901 = vector.extract_strided_slice %888 {offsets = [0, 0], sizes = [12, 8], strides = [1, 1]} : vector<12x16xf32> to vector<12x8xf32>
    %902 = arith.truncf %899 : vector<12x8xf32> to vector<12x8xbf16>
    %903 = arith.truncf %900 : vector<12x8xf32> to vector<12x8xbf16>
    %cst_269 = arith.constant dense<0.000000e+00> : vector<12x12xf32>
    %904 = tpu.matmul %902, %903, %cst_269 {dimension_numbers = #tpu.dot_dimension_numbers<[1], [1], [0], [0], [0, 0, 1, 0], [], []>} : vector<12x8xbf16>, vector<12x8xbf16>, vector<12x12xf32> -> vector<12x12xf32>
    %cst_270 = arith.constant 0.353553385 : f32
    %905 = vector.broadcast %cst_270 : f32 to vector<12x12xf32>
    %906 = arith.mulf %904, %905 : vector<12x12xf32>
    %907 = arith.addf %906, %7 : vector<12x12xf32>
    %cst_271 = arith.constant dense<0xFF800000> : vector<12xf32>
    %908 = vector.multi_reduction <maximumf>, %907, %cst_271 [1] : vector<12x12xf32> to vector<12xf32>
    %909 = vector.shape_cast %908 : vector<12xf32> to vector<12x1xf32>
    %910 = vector.broadcast %909 : vector<12x1xf32> to vector<12x12xf32>
    %911 = arith.subf %907, %910 : vector<12x12xf32>
    %912 = math.exp %911 : vector<12x12xf32>
    %cst_272 = arith.constant dense<0.000000e+00> : vector<12xf32>
    %913 = vector.multi_reduction <add>, %912, %cst_272 [1] : vector<12x12xf32> to vector<12xf32>
    %914 = vector.shape_cast %913 : vector<12xf32> to vector<12x1xf32>
    %915 = tpu.reciprocal %914 {approx = true} : vector<12x1xf32> -> vector<12x1xf32>
    %916 = vector.broadcast %915 : vector<12x1xf32> to vector<12x12xf32>
    %917 = arith.mulf %912, %916 : vector<12x12xf32>
    %918 = arith.truncf %917 : vector<12x12xf32> to vector<12x12xbf16>
    %919 = arith.truncf %901 : vector<12x8xf32> to vector<12x8xbf16>
    %cst_273 = arith.constant dense<0.000000e+00> : vector<12x8xf32>
    %920 = tpu.matmul %918, %919, %cst_273 {dimension_numbers = #tpu.dot_dimension_numbers<[1], [0], [0], [1], [0, 0, 1, 1], [], []>} : vector<12x12xbf16>, vector<12x8xbf16>, vector<12x8xf32> -> vector<12x8xf32>
    %921 = vector.extract_strided_slice %889 {offsets = [0, 0], sizes = [8, 32], strides = [1, 1]} : vector<16x32xbf16> to vector<8x32xbf16>
    %922 = arith.truncf %920 : vector<12x8xf32> to vector<12x8xbf16>
    %cst_274 = arith.constant dense<0.000000e+00> : vector<12x32xf32>
    %923 = tpu.matmul %922, %921, %cst_274 {dimension_numbers = #tpu.dot_dimension_numbers<[1], [0], [0], [1], [0, 0, 1, 1], [], []>} : vector<12x8xbf16>, vector<8x32xbf16>, vector<12x32xf32> -> vector<12x32xf32>
    %924 = vector.broadcast %892 : vector<1x32xf32> to vector<12x32xf32>
    %925 = arith.addf %924, %923 : vector<12x32xf32>
    %926 = vector.extract_strided_slice %886 {offsets = [0, 8], sizes = [12, 8], strides = [1, 1]} : vector<12x16xf32> to vector<12x8xf32>
    %927 = vector.extract_strided_slice %887 {offsets = [0, 8], sizes = [12, 8], strides = [1, 1]} : vector<12x16xf32> to vector<12x8xf32>
    %928 = vector.extract_strided_slice %888 {offsets = [0, 8], sizes = [12, 8], strides = [1, 1]} : vector<12x16xf32> to vector<12x8xf32>
    %929 = arith.truncf %926 : vector<12x8xf32> to vector<12x8xbf16>
    %930 = arith.truncf %927 : vector<12x8xf32> to vector<12x8xbf16>
    %cst_275 = arith.constant dense<0.000000e+00> : vector<12x12xf32>
    %931 = tpu.matmul %929, %930, %cst_275 {dimension_numbers = #tpu.dot_dimension_numbers<[1], [1], [0], [0], [0, 0, 1, 0], [], []>} : vector<12x8xbf16>, vector<12x8xbf16>, vector<12x12xf32> -> vector<12x12xf32>
    %cst_276 = arith.constant 0.353553385 : f32
    %932 = vector.broadcast %cst_276 : f32 to vector<12x12xf32>
    %933 = arith.mulf %931, %932 : vector<12x12xf32>
    %934 = arith.addf %933, %7 : vector<12x12xf32>
    %cst_277 = arith.constant dense<0xFF800000> : vector<12xf32>
    %935 = vector.multi_reduction <maximumf>, %934, %cst_277 [1] : vector<12x12xf32> to vector<12xf32>
    %936 = vector.shape_cast %935 : vector<12xf32> to vector<12x1xf32>
    %937 = vector.broadcast %936 : vector<12x1xf32> to vector<12x12xf32>
    %938 = arith.subf %934, %937 : vector<12x12xf32>
    %939 = math.exp %938 : vector<12x12xf32>
    %cst_278 = arith.constant dense<0.000000e+00> : vector<12xf32>
    %940 = vector.multi_reduction <add>, %939, %cst_278 [1] : vector<12x12xf32> to vector<12xf32>
    %941 = vector.shape_cast %940 : vector<12xf32> to vector<12x1xf32>
    %942 = tpu.reciprocal %941 {approx = true} : vector<12x1xf32> -> vector<12x1xf32>
    %943 = vector.broadcast %942 : vector<12x1xf32> to vector<12x12xf32>
    %944 = arith.mulf %939, %943 : vector<12x12xf32>
    %945 = arith.truncf %944 : vector<12x12xf32> to vector<12x12xbf16>
    %946 = arith.truncf %928 : vector<12x8xf32> to vector<12x8xbf16>
    %cst_279 = arith.constant dense<0.000000e+00> : vector<12x8xf32>
    %947 = tpu.matmul %945, %946, %cst_279 {dimension_numbers = #tpu.dot_dimension_numbers<[1], [0], [0], [1], [0, 0, 1, 1], [], []>} : vector<12x12xbf16>, vector<12x8xbf16>, vector<12x8xf32> -> vector<12x8xf32>
    %948 = vector.extract_strided_slice %889 {offsets = [8, 0], sizes = [8, 32], strides = [1, 1]} : vector<16x32xbf16> to vector<8x32xbf16>
    %949 = arith.truncf %947 : vector<12x8xf32> to vector<12x8xbf16>
    %cst_280 = arith.constant dense<0.000000e+00> : vector<12x32xf32>
    %950 = tpu.matmul %949, %948, %cst_280 {dimension_numbers = #tpu.dot_dimension_numbers<[1], [0], [0], [1], [0, 0, 1, 1], [], []>} : vector<12x8xbf16>, vector<8x32xbf16>, vector<12x32xf32> -> vector<12x32xf32>
    %951 = arith.addf %925, %950 : vector<12x32xf32>
    %952 = arith.addf %951, %589 : vector<12x32xf32>
    %cst_281 = arith.constant dense<0.000000e+00> : vector<12xf32>
    %953 = vector.multi_reduction <add>, %952, %cst_281 [1] : vector<12x32xf32> to vector<12xf32>
    %954 = vector.shape_cast %953 : vector<12xf32> to vector<12x1xf32>
    %cst_282 = arith.constant 3.200000e+01 : f32
    %955 = vector.broadcast %cst_282 : f32 to vector<12x1xf32>
    %956 = arith.divf %954, %955 : vector<12x1xf32>
    %957 = vector.broadcast %956 : vector<12x1xf32> to vector<12x32xf32>
    %958 = arith.subf %952, %957 : vector<12x32xf32>
    %959 = arith.mulf %958, %958 : vector<12x32xf32>
    %cst_283 = arith.constant dense<0.000000e+00> : vector<12xf32>
    %960 = vector.multi_reduction <add>, %959, %cst_283 [1] : vector<12x32xf32> to vector<12xf32>
    %961 = vector.shape_cast %960 : vector<12xf32> to vector<12x1xf32>
    %cst_284 = arith.constant 3.200000e+01 : f32
    %962 = vector.broadcast %cst_284 : f32 to vector<12x1xf32>
    %963 = arith.divf %961, %962 : vector<12x1xf32>
    %964 = vector.broadcast %956 : vector<12x1xf32> to vector<12x32xf32>
    %965 = arith.subf %952, %964 : vector<12x32xf32>
    %cst_285 = arith.constant 9.99999974E-6 : f32
    %966 = vector.broadcast %cst_285 : f32 to vector<12x1xf32>
    %967 = arith.addf %963, %966 : vector<12x1xf32>
    %968 = math.rsqrt %967 : vector<12x1xf32>
    %969 = vector.broadcast %968 : vector<12x1xf32> to vector<12x32xf32>
    %970 = arith.mulf %965, %969 : vector<12x32xf32>
    %971 = vector.broadcast %895 : vector<1x32xf32> to vector<12x32xf32>
    %972 = arith.mulf %970, %971 : vector<12x32xf32>
    %973 = vector.broadcast %896 : vector<1x32xf32> to vector<12x32xf32>
    %974 = arith.addf %972, %973 : vector<12x32xf32>
    %975 = arith.truncf %974 : vector<12x32xf32> to vector<12x32xbf16>
    %cst_286 = arith.constant dense<0.000000e+00> : vector<12x64xf32>
    %976 = tpu.matmul %975, %890, %cst_286 {dimension_numbers = #tpu.dot_dimension_numbers<[1], [0], [0], [1], [0, 0, 1, 1], [], []>} : vector<12x32xbf16>, vector<32x64xbf16>, vector<12x64xf32> -> vector<12x64xf32>
    %977 = vector.broadcast %893 : vector<1x64xf32> to vector<12x64xf32>
    %978 = arith.addf %976, %977 : vector<12x64xf32>
    %cst_287 = arith.constant 0.000000e+00 : f32
    %979 = vector.broadcast %cst_287 : f32 to vector<12x64xf32>
    %980 = arith.maximumf %978, %979 : vector<12x64xf32>
    %981 = arith.truncf %980 : vector<12x64xf32> to vector<12x64xbf16>
    %cst_288 = arith.constant dense<0.000000e+00> : vector<12x32xf32>
    %982 = tpu.matmul %981, %891, %cst_288 {dimension_numbers = #tpu.dot_dimension_numbers<[1], [0], [0], [1], [0, 0, 1, 1], [], []>} : vector<12x64xbf16>, vector<64x32xbf16>, vector<12x32xf32> -> vector<12x32xf32>
    %983 = vector.broadcast %894 : vector<1x32xf32> to vector<12x32xf32>
    %984 = arith.addf %982, %983 : vector<12x32xf32>
    %985 = arith.addf %984, %974 : vector<12x32xf32>
    %cst_289 = arith.constant dense<0.000000e+00> : vector<12xf32>
    %986 = vector.multi_reduction <add>, %985, %cst_289 [1] : vector<12x32xf32> to vector<12xf32>
    %987 = vector.shape_cast %986 : vector<12xf32> to vector<12x1xf32>
    %cst_290 = arith.constant 3.200000e+01 : f32
    %988 = vector.broadcast %cst_290 : f32 to vector<12x1xf32>
    %989 = arith.divf %987, %988 : vector<12x1xf32>
    %990 = vector.broadcast %989 : vector<12x1xf32> to vector<12x32xf32>
    %991 = arith.subf %985, %990 : vector<12x32xf32>
    %992 = arith.mulf %991, %991 : vector<12x32xf32>
    %cst_291 = arith.constant dense<0.000000e+00> : vector<12xf32>
    %993 = vector.multi_reduction <add>, %992, %cst_291 [1] : vector<12x32xf32> to vector<12xf32>
    %994 = vector.shape_cast %993 : vector<12xf32> to vector<12x1xf32>
    %cst_292 = arith.constant 3.200000e+01 : f32
    %995 = vector.broadcast %cst_292 : f32 to vector<12x1xf32>
    %996 = arith.divf %994, %995 : vector<12x1xf32>
    %997 = vector.broadcast %989 : vector<12x1xf32> to vector<12x32xf32>
    %998 = arith.subf %985, %997 : vector<12x32xf32>
    %cst_293 = arith.constant 9.99999974E-6 : f32
    %999 = vector.broadcast %cst_293 : f32 to vector<12x1xf32>
    %1000 = arith.addf %996, %999 : vector<12x1xf32>
    %1001 = math.rsqrt %1000 : vector<12x1xf32>
    %1002 = vector.broadcast %1001 : vector<12x1xf32> to vector<12x32xf32>
    %1003 = arith.mulf %998, %1002 : vector<12x32xf32>
    %1004 = vector.broadcast %897 : vector<1x32xf32> to vector<12x32xf32>
    %1005 = arith.mulf %1003, %1004 : vector<12x32xf32>
    %1006 = vector.broadcast %898 : vector<1x32xf32> to vector<12x32xf32>
    %1007 = arith.addf %1005, %1006 : vector<12x32xf32>
    %1008 = vector.extract_strided_slice %880 {offsets = [0, 48], sizes = [12, 16], strides = [1, 1]} : vector<12x64xf32> to vector<12x16xf32>
    %1009 = vector.extract_strided_slice %885 {offsets = [0, 0], sizes = [12, 16], strides = [1, 1]} : vector<12x32xf32> to vector<12x16xf32>
    %1010 = vector.extract_strided_slice %885 {offsets = [0, 16], sizes = [12, 16], strides = [1, 1]} : vector<12x32xf32> to vector<12x16xf32>
    %1011 = vector.extract_strided_slice %869 {offsets = [16, 0], sizes = [16, 32], strides = [1, 1]} : vector<32x32xbf16> to vector<16x32xbf16>
    %1012 = vector.extract_strided_slice %871 {offsets = [32, 0], sizes = [32, 64], strides = [1, 1]} : vector<64x64xbf16> to vector<32x64xbf16>
    %1013 = vector.extract_strided_slice %873 {offsets = [64, 0], sizes = [64, 32], strides = [1, 1]} : vector<128x32xbf16> to vector<64x32xbf16>
    %1014 = vector.extract_strided_slice %875 {offsets = [9, 0], sizes = [1, 32], strides = [1, 1]} : vector<16x64xf32> to vector<1x32xf32>
    %1015 = vector.extract_strided_slice %875 {offsets = [10, 0], sizes = [1, 64], strides = [1, 1]} : vector<16x64xf32> to vector<1x64xf32>
    %1016 = vector.extract_strided_slice %875 {offsets = [11, 0], sizes = [1, 32], strides = [1, 1]} : vector<16x64xf32> to vector<1x32xf32>
    %1017 = vector.extract_strided_slice %875 {offsets = [12, 0], sizes = [1, 32], strides = [1, 1]} : vector<16x64xf32> to vector<1x32xf32>
    %1018 = vector.extract_strided_slice %875 {offsets = [13, 0], sizes = [1, 32], strides = [1, 1]} : vector<16x64xf32> to vector<1x32xf32>
    %1019 = vector.extract_strided_slice %875 {offsets = [14, 0], sizes = [1, 32], strides = [1, 1]} : vector<16x64xf32> to vector<1x32xf32>
    %1020 = vector.extract_strided_slice %875 {offsets = [15, 0], sizes = [1, 32], strides = [1, 1]} : vector<16x64xf32> to vector<1x32xf32>
    %1021 = vector.extract_strided_slice %1008 {offsets = [0, 0], sizes = [12, 8], strides = [1, 1]} : vector<12x16xf32> to vector<12x8xf32>
    %1022 = vector.extract_strided_slice %1009 {offsets = [0, 0], sizes = [12, 8], strides = [1, 1]} : vector<12x16xf32> to vector<12x8xf32>
    %1023 = vector.extract_strided_slice %1010 {offsets = [0, 0], sizes = [12, 8], strides = [1, 1]} : vector<12x16xf32> to vector<12x8xf32>
    %1024 = arith.truncf %1021 : vector<12x8xf32> to vector<12x8xbf16>
    %1025 = arith.truncf %1022 : vector<12x8xf32> to vector<12x8xbf16>
    %cst_294 = arith.constant dense<0.000000e+00> : vector<12x12xf32>
    %1026 = tpu.matmul %1024, %1025, %cst_294 {dimension_numbers = #tpu.dot_dimension_numbers<[1], [1], [0], [0], [0, 0, 1, 0], [], []>} : vector<12x8xbf16>, vector<12x8xbf16>, vector<12x12xf32> -> vector<12x12xf32>
    %cst_295 = arith.constant 0.353553385 : f32
    %1027 = vector.broadcast %cst_295 : f32 to vector<12x12xf32>
    %1028 = arith.mulf %1026, %1027 : vector<12x12xf32>
    %1029 = arith.addf %1028, %7 : vector<12x12xf32>
    %cst_296 = arith.constant dense<0xFF800000> : vector<12xf32>
    %1030 = vector.multi_reduction <maximumf>, %1029, %cst_296 [1] : vector<12x12xf32> to vector<12xf32>
    %1031 = vector.shape_cast %1030 : vector<12xf32> to vector<12x1xf32>
    %1032 = vector.broadcast %1031 : vector<12x1xf32> to vector<12x12xf32>
    %1033 = arith.subf %1029, %1032 : vector<12x12xf32>
    %1034 = math.exp %1033 : vector<12x12xf32>
    %cst_297 = arith.constant dense<0.000000e+00> : vector<12xf32>
    %1035 = vector.multi_reduction <add>, %1034, %cst_297 [1] : vector<12x12xf32> to vector<12xf32>
    %1036 = vector.shape_cast %1035 : vector<12xf32> to vector<12x1xf32>
    %1037 = tpu.reciprocal %1036 {approx = true} : vector<12x1xf32> -> vector<12x1xf32>
    %1038 = vector.broadcast %1037 : vector<12x1xf32> to vector<12x12xf32>
    %1039 = arith.mulf %1034, %1038 : vector<12x12xf32>
    %1040 = arith.truncf %1039 : vector<12x12xf32> to vector<12x12xbf16>
    %1041 = arith.truncf %1023 : vector<12x8xf32> to vector<12x8xbf16>
    %cst_298 = arith.constant dense<0.000000e+00> : vector<12x8xf32>
    %1042 = tpu.matmul %1040, %1041, %cst_298 {dimension_numbers = #tpu.dot_dimension_numbers<[1], [0], [0], [1], [0, 0, 1, 1], [], []>} : vector<12x12xbf16>, vector<12x8xbf16>, vector<12x8xf32> -> vector<12x8xf32>
    %1043 = vector.extract_strided_slice %1011 {offsets = [0, 0], sizes = [8, 32], strides = [1, 1]} : vector<16x32xbf16> to vector<8x32xbf16>
    %1044 = arith.truncf %1042 : vector<12x8xf32> to vector<12x8xbf16>
    %cst_299 = arith.constant dense<0.000000e+00> : vector<12x32xf32>
    %1045 = tpu.matmul %1044, %1043, %cst_299 {dimension_numbers = #tpu.dot_dimension_numbers<[1], [0], [0], [1], [0, 0, 1, 1], [], []>} : vector<12x8xbf16>, vector<8x32xbf16>, vector<12x32xf32> -> vector<12x32xf32>
    %1046 = vector.broadcast %1014 : vector<1x32xf32> to vector<12x32xf32>
    %1047 = arith.addf %1046, %1045 : vector<12x32xf32>
    %1048 = vector.extract_strided_slice %1008 {offsets = [0, 8], sizes = [12, 8], strides = [1, 1]} : vector<12x16xf32> to vector<12x8xf32>
    %1049 = vector.extract_strided_slice %1009 {offsets = [0, 8], sizes = [12, 8], strides = [1, 1]} : vector<12x16xf32> to vector<12x8xf32>
    %1050 = vector.extract_strided_slice %1010 {offsets = [0, 8], sizes = [12, 8], strides = [1, 1]} : vector<12x16xf32> to vector<12x8xf32>
    %1051 = arith.truncf %1048 : vector<12x8xf32> to vector<12x8xbf16>
    %1052 = arith.truncf %1049 : vector<12x8xf32> to vector<12x8xbf16>
    %cst_300 = arith.constant dense<0.000000e+00> : vector<12x12xf32>
    %1053 = tpu.matmul %1051, %1052, %cst_300 {dimension_numbers = #tpu.dot_dimension_numbers<[1], [1], [0], [0], [0, 0, 1, 0], [], []>} : vector<12x8xbf16>, vector<12x8xbf16>, vector<12x12xf32> -> vector<12x12xf32>
    %cst_301 = arith.constant 0.353553385 : f32
    %1054 = vector.broadcast %cst_301 : f32 to vector<12x12xf32>
    %1055 = arith.mulf %1053, %1054 : vector<12x12xf32>
    %1056 = arith.addf %1055, %7 : vector<12x12xf32>
    %cst_302 = arith.constant dense<0xFF800000> : vector<12xf32>
    %1057 = vector.multi_reduction <maximumf>, %1056, %cst_302 [1] : vector<12x12xf32> to vector<12xf32>
    %1058 = vector.shape_cast %1057 : vector<12xf32> to vector<12x1xf32>
    %1059 = vector.broadcast %1058 : vector<12x1xf32> to vector<12x12xf32>
    %1060 = arith.subf %1056, %1059 : vector<12x12xf32>
    %1061 = math.exp %1060 : vector<12x12xf32>
    %cst_303 = arith.constant dense<0.000000e+00> : vector<12xf32>
    %1062 = vector.multi_reduction <add>, %1061, %cst_303 [1] : vector<12x12xf32> to vector<12xf32>
    %1063 = vector.shape_cast %1062 : vector<12xf32> to vector<12x1xf32>
    %1064 = tpu.reciprocal %1063 {approx = true} : vector<12x1xf32> -> vector<12x1xf32>
    %1065 = vector.broadcast %1064 : vector<12x1xf32> to vector<12x12xf32>
    %1066 = arith.mulf %1061, %1065 : vector<12x12xf32>
    %1067 = arith.truncf %1066 : vector<12x12xf32> to vector<12x12xbf16>
    %1068 = arith.truncf %1050 : vector<12x8xf32> to vector<12x8xbf16>
    %cst_304 = arith.constant dense<0.000000e+00> : vector<12x8xf32>
    %1069 = tpu.matmul %1067, %1068, %cst_304 {dimension_numbers = #tpu.dot_dimension_numbers<[1], [0], [0], [1], [0, 0, 1, 1], [], []>} : vector<12x12xbf16>, vector<12x8xbf16>, vector<12x8xf32> -> vector<12x8xf32>
    %1070 = vector.extract_strided_slice %1011 {offsets = [8, 0], sizes = [8, 32], strides = [1, 1]} : vector<16x32xbf16> to vector<8x32xbf16>
    %1071 = arith.truncf %1069 : vector<12x8xf32> to vector<12x8xbf16>
    %cst_305 = arith.constant dense<0.000000e+00> : vector<12x32xf32>
    %1072 = tpu.matmul %1071, %1070, %cst_305 {dimension_numbers = #tpu.dot_dimension_numbers<[1], [0], [0], [1], [0, 0, 1, 1], [], []>} : vector<12x8xbf16>, vector<8x32xbf16>, vector<12x32xf32> -> vector<12x32xf32>
    %1073 = arith.addf %1047, %1072 : vector<12x32xf32>
    %1074 = arith.addf %1073, %589 : vector<12x32xf32>
    %cst_306 = arith.constant dense<0.000000e+00> : vector<12xf32>
    %1075 = vector.multi_reduction <add>, %1074, %cst_306 [1] : vector<12x32xf32> to vector<12xf32>
    %1076 = vector.shape_cast %1075 : vector<12xf32> to vector<12x1xf32>
    %cst_307 = arith.constant 3.200000e+01 : f32
    %1077 = vector.broadcast %cst_307 : f32 to vector<12x1xf32>
    %1078 = arith.divf %1076, %1077 : vector<12x1xf32>
    %1079 = vector.broadcast %1078 : vector<12x1xf32> to vector<12x32xf32>
    %1080 = arith.subf %1074, %1079 : vector<12x32xf32>
    %1081 = arith.mulf %1080, %1080 : vector<12x32xf32>
    %cst_308 = arith.constant dense<0.000000e+00> : vector<12xf32>
    %1082 = vector.multi_reduction <add>, %1081, %cst_308 [1] : vector<12x32xf32> to vector<12xf32>
    %1083 = vector.shape_cast %1082 : vector<12xf32> to vector<12x1xf32>
    %cst_309 = arith.constant 3.200000e+01 : f32
    %1084 = vector.broadcast %cst_309 : f32 to vector<12x1xf32>
    %1085 = arith.divf %1083, %1084 : vector<12x1xf32>
    %1086 = vector.broadcast %1078 : vector<12x1xf32> to vector<12x32xf32>
    %1087 = arith.subf %1074, %1086 : vector<12x32xf32>
    %cst_310 = arith.constant 9.99999974E-6 : f32
    %1088 = vector.broadcast %cst_310 : f32 to vector<12x1xf32>
    %1089 = arith.addf %1085, %1088 : vector<12x1xf32>
    %1090 = math.rsqrt %1089 : vector<12x1xf32>
    %1091 = vector.broadcast %1090 : vector<12x1xf32> to vector<12x32xf32>
    %1092 = arith.mulf %1087, %1091 : vector<12x32xf32>
    %1093 = vector.broadcast %1017 : vector<1x32xf32> to vector<12x32xf32>
    %1094 = arith.mulf %1092, %1093 : vector<12x32xf32>
    %1095 = vector.broadcast %1018 : vector<1x32xf32> to vector<12x32xf32>
    %1096 = arith.addf %1094, %1095 : vector<12x32xf32>
    %1097 = arith.truncf %1096 : vector<12x32xf32> to vector<12x32xbf16>
    %cst_311 = arith.constant dense<0.000000e+00> : vector<12x64xf32>
    %1098 = tpu.matmul %1097, %1012, %cst_311 {dimension_numbers = #tpu.dot_dimension_numbers<[1], [0], [0], [1], [0, 0, 1, 1], [], []>} : vector<12x32xbf16>, vector<32x64xbf16>, vector<12x64xf32> -> vector<12x64xf32>
    %1099 = vector.broadcast %1015 : vector<1x64xf32> to vector<12x64xf32>
    %1100 = arith.addf %1098, %1099 : vector<12x64xf32>
    %cst_312 = arith.constant 0.000000e+00 : f32
    %1101 = vector.broadcast %cst_312 : f32 to vector<12x64xf32>
    %1102 = arith.maximumf %1100, %1101 : vector<12x64xf32>
    %1103 = arith.truncf %1102 : vector<12x64xf32> to vector<12x64xbf16>
    %cst_313 = arith.constant dense<0.000000e+00> : vector<12x32xf32>
    %1104 = tpu.matmul %1103, %1013, %cst_313 {dimension_numbers = #tpu.dot_dimension_numbers<[1], [0], [0], [1], [0, 0, 1, 1], [], []>} : vector<12x64xbf16>, vector<64x32xbf16>, vector<12x32xf32> -> vector<12x32xf32>
    %1105 = vector.broadcast %1016 : vector<1x32xf32> to vector<12x32xf32>
    %1106 = arith.addf %1104, %1105 : vector<12x32xf32>
    %1107 = arith.addf %1106, %1096 : vector<12x32xf32>
    %cst_314 = arith.constant dense<0.000000e+00> : vector<12xf32>
    %1108 = vector.multi_reduction <add>, %1107, %cst_314 [1] : vector<12x32xf32> to vector<12xf32>
    %1109 = vector.shape_cast %1108 : vector<12xf32> to vector<12x1xf32>
    %cst_315 = arith.constant 3.200000e+01 : f32
    %1110 = vector.broadcast %cst_315 : f32 to vector<12x1xf32>
    %1111 = arith.divf %1109, %1110 : vector<12x1xf32>
    %1112 = vector.broadcast %1111 : vector<12x1xf32> to vector<12x32xf32>
    %1113 = arith.subf %1107, %1112 : vector<12x32xf32>
    %1114 = arith.mulf %1113, %1113 : vector<12x32xf32>
    %cst_316 = arith.constant dense<0.000000e+00> : vector<12xf32>
    %1115 = vector.multi_reduction <add>, %1114, %cst_316 [1] : vector<12x32xf32> to vector<12xf32>
    %1116 = vector.shape_cast %1115 : vector<12xf32> to vector<12x1xf32>
    %cst_317 = arith.constant 3.200000e+01 : f32
    %1117 = vector.broadcast %cst_317 : f32 to vector<12x1xf32>
    %1118 = arith.divf %1116, %1117 : vector<12x1xf32>
    %1119 = vector.broadcast %1111 : vector<12x1xf32> to vector<12x32xf32>
    %1120 = arith.subf %1107, %1119 : vector<12x32xf32>
    %cst_318 = arith.constant 9.99999974E-6 : f32
    %1121 = vector.broadcast %cst_318 : f32 to vector<12x1xf32>
    %1122 = arith.addf %1118, %1121 : vector<12x1xf32>
    %1123 = math.rsqrt %1122 : vector<12x1xf32>
    %1124 = vector.broadcast %1123 : vector<12x1xf32> to vector<12x32xf32>
    %1125 = arith.mulf %1120, %1124 : vector<12x32xf32>
    %1126 = vector.broadcast %1019 : vector<1x32xf32> to vector<12x32xf32>
    %1127 = arith.mulf %1125, %1126 : vector<12x32xf32>
    %1128 = vector.broadcast %1020 : vector<1x32xf32> to vector<12x32xf32>
    %1129 = arith.addf %1127, %1128 : vector<12x32xf32>
    %1130 = arith.addf %1007, %1129 : vector<12x32xf32>
    %1131 = arith.addf %1130, %863 : vector<12x32xf32>
    %c0_319 = arith.constant 0 : index
    %c0_320 = arith.constant 0 : index
    %1132 = vector.load %arg22[%c0_319, %c0_320] : memref<12x32xf32, #tpu.memory_space<vmem>>, vector<12x32xf32>
    tpu.vector_store %arg22[%c0_319, %c0_320], %1131 {strides = array<i32>} : memref<12x32xf32, #tpu.memory_space<vmem>>, vector<12x32xf32>,
    return
  }
}

</mosaic_0001>

<bundles_post_ra>
// kernel: sha_context_forward.1
= control target key start
LH: loop header
LB: loop body
LE: loop exit
PB: predicated region body
PF: predicated region fallthrough
CT: control target
= control target key end

     0   :  { %s6384_s0 = inlined_call_operand.vmem [shape: f32[12,64], index: 0, kind: input, shape index: {}]   ;;  %s6385_s1 = inlined_call_operand.vmem [shape: f32[12,16], index: 1, kind: input, shape index: {}]   ;;  %s6386_s2 = inlined_call_operand.vmem [shape: f32[12,16], index: 2, kind: input, shape index: {}]   ;;  %s6387_s3 = inlined_call_operand.vmem [shape: f32[12,16], index: 3, kind: input, shape index: {}]   ;;  %s6388_s4 = inlined_call_operand.vmem [shape: f32[12,1], index: 4, kind: input, shape index: {}]   ;;  %s6389_s5 = inlined_call_operand.vmem [shape: f32[1,12], index: 5, kind: input, shape index: {}]   ;;  %s6390_s6 = inlined_call_operand.vmem [shape: bf16[16,32], index: 6, kind: input, shape index: {}]   ;;  %s6391_s7 = inlined_call_operand.vmem [shape: bf16[32,128], index: 7, kind: input, shape index: {}]   ;;  %s6392_s8 = inlined_call_operand.vmem [shape: bf16[64,32], index: 8, kind: input, shape index: {}]   ;;  %s6393_s9 = inlined_call_operand.vmem [shape: bf16[128,32], index: 9, kind: input, shape index: {}]   ;;  %s6394_s10 = inlined_call_operand.vmem [shape: bf16[16,32], index: 10, kind: input, shape index: {}]   ;;  %s6395_s11 = inlined_call_operand.vmem [shape: f32[4,128], index: 11, kind: input, shape index: {}]   ;;  %s6396_s12 = inlined_call_operand.vmem [shape: bf16[64,32], index: 12, kind: input, shape index: {}]   ;;  %s6397_s13 = inlined_call_operand.vmem [shape: bf16[32,32], index: 13, kind: input, shape index: {}]   ;;  %s6398_s14 = inlined_call_operand.vmem [shape: bf16[16,32], index: 14, kind: input, shape index: {}]   ;;  %s6399_s15 = inlined_call_operand.vmem [shape: f32[2,32], index: 15, kind: input, shape index: {}]   ;;  %s6400_s16 = inlined_call_operand.vmem [shape: bf16[4,32,64], index: 16, kind: input, shape index: {}]   ;;  %s6401_s17 = inlined_call_operand.vmem [shape: bf16[4,32,32], index: 17, kind: input, shape index: {}]   ;;  %s6402_s18 = inlined_call_operand.vmem [shape: bf16[4,32,32], index: 18, kind: input, shape index: {}]   ;;  %s6403_s19 = inlined_call_operand.vmem [shape: bf16[4,64,64], index: 19, kind: input, shape index: {}]   ;;  %s6404_s20 = inlined_call_operand.vmem [shape: bf16[4,128,32], index: 20, kind: input, shape index: {}]   ;;  %s6405_s21 = inlined_call_operand.vmem [shape: f32[4,16,64], index: 21, kind: input, shape index: {}]   ;;  %s6406_s22 = inlined_call_operand.hbm [shape: f32[12,32], index: 22, kind: output, shape index: {}]  }
   0x1   :  { %6417 = sst [smem:[#allocation5_spill]] %s6384_s0 }
   0x2   :  { %6418 = sst [smem:[#allocation6_spill]] %s6385_s1 }
   0x3   :  { %6419 = sst [smem:[#allocation7_spill]] %s6386_s2 }
   0x4   :  { %6420 = sst [smem:[#allocation8_spill]] %s6387_s3 }
   0x5   :  { %6421 = sst [smem:[#allocation9_spill]] %s6388_s4 }
   0x6   :  { %6422 = sst [smem:[#allocation10_spill]] %s6389_s5 }
   0x7   :  { %6423 = sst [smem:[#allocation11_spill]] %s6390_s6 }
   0x8   :  { %6424 = sst [smem:[#allocation12_spill]] %s6397_s13 }
   0x9   :  { %s6425_s29 = sld [smem:[#allocation11_spill]]  ;;  %v4428_v4 = vld [vmem:[%s6394_s10] sm:$0xff]  ;;  %vm108_vm0 = vcmask 130048  }
   0xa   :  { %s6426_s13 = sld [smem:[#allocation6_spill]] }
   0xf   :  { %v4413_v0 = vld [vmem:[%s6425_s29] sm:$0xff] }
  0x10   :  { %v96_v1 = vld [vmem:[%s6426_s13] sm:$0xff]  ;;  %v97_v2 = vld [vmem:[%s6426_s13 + $0x8] sm:$0xf]  ;;  %119 = vmatpush.bf16.msra.mxu0 %v4413_v0 }
  0x11   :  { %v100_v3 = vpack.c.bf16 %v97_v2, %v96_v1 }
  0x12   :  { %27 = vsyncpa [#allocation3], 0  ;;  %s6427_s25 = sld [smem:[#allocation7_spill]]  ;;  %v4415_v8 = vld [vmem:[%s6391_s7 + $0x8] sm:$0xff]  ;;  %v4414_v9 = vld [vmem:[%s6391_s7] sm:$0xff]  ;;  %vm146_vm1 = vcmask 261120  }
  0x13   :  { %3876 = vmatmul.msk.bf16.vlgmr.msra.gmra.mxu0 %vm108_vm0, %v100_v3  ;;  %156 = vmatpush.bf16.msra.mxu1 %v4415_v8  ;;  %v4430_v10 = vld [vmem:[%s6400_s16 + $0x8] sm:$0xff]  ;;  %v4429_v11 = vld [vmem:[%s6400_s16] sm:$0xff]  ;;  %v4427_v12 = vld [vmem:[%s6393_s9 + $0x38] sm:$0xff]  ;;  %s6428_s24 = sld [smem:[#allocation5_spill]]  ;;  %vm6413_vm2 = vcmask 523264   ;;  %s4744_s10 = smov 120  }
  0x14   :  { %321 = vmatpush.bf16.msrb.mxu0 %v4428_v4  ;;  %v4909_v13 = vld [vmem:[%s6395_s11] sm:$0xf]  ;;  %v4419_v15 = vld [vmem:[%s6392_s8 + $0x18] sm:$0xff]  ;;  %240 = vmatpush.bf16.msra.mxu2 %v4427_v12  ;;  %v4426_v16 = vld [vmem:[%s6393_s9 + $0x30] sm:$0xff]  ;;  %s4745_s3 = smov 104   ;;  %s6429_s1 = sld [smem:[#allocation9_spill]] }
  0x15   :  { %286 = vmatpush.bf16.msra.mxu3 %v4419_v15  ;;  %v4418_v17 = vld [vmem:[%s6392_s8 + $0x10] sm:$0xff]  ;;  %v101_v18 = vperm.slane %v4909_v13, 0  ;;  %v4425_v19 = vld [vmem:[%s6393_s9 + $0x28] sm:$0xff]  ;;  %v4424_v23 = vld [vmem:[%s6393_s9 + $0x20] sm:$0xff]  ;;  %v304_v28 = vperm.slane %v4909_v13, 3  ;;  %v133_v43 = vperm.slane %v4909_v13, 1 }
  0x16   :  { %v4423_v33 = vld [vmem:[%s6393_s9 + $0x18] sm:$0xff]  ;;  %v4417_v34 = vld [vmem:[%s6392_s8 + $0x8] sm:$0xff]  ;;  %v4422_v35 = vld [vmem:[%s6393_s9 + $0x10] sm:$0xff]  ;;  %v4746_v60 = vmov 0   ;;  %vm432_vm3 = vcmask 64512   ;;  %vm457_vm5 = vcmask 97280  }
  0x17   :  { %157 = vmatpush.bf16.msra.mxu1 %v4414_v9  ;;  %v4416_v36 = vld [vmem:[%s6392_s8] sm:$0xff]  ;;  %v4421_v40 = vld [vmem:[%s6393_s9 + $0x8] sm:$0xff]  ;;  %4513 = vset.pattern.permute.xlu1 %v4746_v60  ;;  %vm461_vm7 = vcmask 93184   ;;  %s4748_s26 = smov 96   ;;  %vm6416_vm8 = vcmask 1045504   ;;  %s4749_s2 = smov 88  }
  0x18   :  { %v299_v5 = vld [vmem:[%s6427_s25] sm:$0xff]  ;;  %v300_v6 = vld [vmem:[%s6427_s25 + $0x8] sm:$0xf]  ;;  %241 = vmatpush.bf16.msra.mxu2 %v4426_v16  ;;  %4514 = vset.pattern.permute.xlu2 %v4746_v60  ;;  %s6430_s25 = sld [smem:[#allocation10_spill]]  ;;  %v4747_v16 = vmov -1e+09  }
  0x19   :  { %v303_v7 = vpack.c.bf16 %v300_v6, %v299_v5  ;;  %287 = vmatpush.bf16.msra.mxu3 %v4418_v17  ;;  %v93_v37 = vld [vmem:[%s6428_s24] sm:$0xff]  ;;  %v94_v38 = vld [vmem:[%s6428_s24 + $0x8] sm:$0xf]  ;;  %4515 = vset.pattern.permute.xlu0 %v4746_v60  ;;  %v296_v5 = vperm.slane %v4909_v13, 2  ;;  %s4750_s8 = smov 72   ;;  %vm6415_vm9 = vcmask 1043456  }
  0x1a   :  { %v4957_v39 = vpack.c.bf16 %v94_v38, %v93_v37  ;;  %v4420_v41 = vld [vmem:[%s6393_s9] sm:$0xff]  ;;  %s4743_s9 = smov 112   ;;  %v4432_v57 = vld [vmem:[%s6401_s17 + $0x8] sm:$0xff]  ;;  %vm6414_vm10 = vcmask 257024   ;;  %s4752_s24 = smov 80  }
  0x1b   :  { %389 = vmatpush.bf16.msrb.mxu1 %v4430_v10  ;;  %v4971_v50 = vld [vmem:[%s6405_s21] sm:$0xff]  ;;  %v74_v0 = vld [vmem:[%s6429_s1 + $0x8] sm:$0xf]  ;;  %s6431_s11 = sld [smem:[#allocation8_spill]]  ;;  %s3860_s5 = sshll.u32 %s6406_s22, 4  ;;  %s3861_s5 = int_to_ptr.hbm [resolvable:$true] %s3860_s5 }
  0x1c   :  { %242 = vmatpush.bf16.msra.mxu2 %v4425_v19  ;;  %v367_v52 = vperm.slane %v4971_v50, 0  ;;  %v4431_v58 = vld [vmem:[%s6401_s17] sm:$0xff]  ;;  %83 = vperm.xlu2 %4514, %v74_v0   ;;  %s6432_s28 = sld [smem:[#allocation12_spill]]  ;;  %s4754_s7 = smov 128  }
  0x1d   :  { %288 = vmatpush.bf16.msra.mxu3 %v4417_v34  ;;  %v73_v59 = vld [vmem:[%s6429_s1] sm:$0xff]  ;;  %s4755_s6 = smov 8  }
  0x1e   :  { %v4516_v13 = vld [vmem:[%s6430_s25] ss:$0 sm:$0xff] }
  0x1f   :  { %390 = vmatpush.bf16.msrb.mxu1 %v4429_v11 }
  0x20   :  { %243 = vmatpush.bf16.msra.mxu2 %v4424_v23 }
  0x21   :  { %289 = vmatpush.bf16.msra.mxu3 %v4416_v36 }
  0x23   :  { %3939 = vmatmul.msk.bf16.vlgmr.msrb.gmra.mxu0 %vm108_vm0, %v303_v7 }
  0x24   :  { %244 = vmatpush.bf16.msra.mxu2 %v4423_v33  ;;  %3934 = vmatmul.msk.bf16.vlgmr.msra.gmra.mxu3 %vm6413_vm2, %v4957_v39 }
  0x25   :  { %420 = vmatpush.bf16.msrb.mxu3 %v4432_v57 }
  0x28   :  { %245 = vmatpush.bf16.msra.mxu2 %v4422_v35 }
  0x29   :  { %421 = vmatpush.bf16.msrb.mxu3 %v4431_v58 }
  0x2c   :  { %246 = vmatpush.bf16.msra.mxu2 %v4421_v40 }
  0x30   :  { %247 = vmatpush.bf16.msra.mxu2 %v4420_v41 }
  0x76   :  { %v84_v19 = vpop.permute.xlu2 %83 }
  0x77   :  { %vm90_vm6 = vcmp.eq.f32.partialorder %v84_v19, %v4516_v13 }
  0x78   :  { %v5017_v23 = vsel %vm90_vm6, 0.0, %v4747_v16 }
  0x90   :  { %v121_v14 = vpop.f32.mrf.mxu0 }
  0x91   :  { %v122_v20 = vadd.f32 %v121_v14, %v101_v18 }
  0x93   :  { %v126_v24 = vmax.f32 %v122_v20, 0.0 }
  0x98   :  { %v123_v21 = vpop.f32.mrf.mxu0 }
  0x99   :  { %v124_v22 = vadd.f32 %v123_v21, %v101_v18 }
  0x9b   :  { %v127_v25 = vmax.f32 %v124_v22, 0.0 }
  0x9d   :  { %v132_v26 = vpack.c.bf16 %v127_v25, %v126_v24 }
  0x9f   :  { %3885 = vmatmul.msk.bf16.vlgmr.msra.gmra.mxu1 %vm146_vm1, %v132_v26 }
  0xa0   :  { %v323_v27 = vpop.f32.mrf.mxu0 }
  0xa1   :  { %v4929_v29 = vadd.f32 %v323_v27, %v304_v28 }
  0xa7   :  { %v291_v62 = vpop.f32.mrf.mxu3 }
  0xa8   :  { %v325_v30 = vpop.f32.mrf.mxu0 }
  0xa9   :  { %v4931_v31 = vadd.f32 %v325_v30, %v304_v28 }
  0xab   :  { %v4935_v32 = vpack.c.bf16 %v4931_v31, %v4929_v29 }
  0xaf   :  { %3948 = vmatmul.msk.bf16.vlgmr.msrb.gmra.mxu1 %vm146_vm1, %v4935_v32  ;;  %v293_v6 = vpop.f32.mrf.mxu3 }
 0x11c   :  { %v159_v42 = vpop.f32.mrf.mxu1 }
 0x11d   :  { %v160_v44 = vadd.f32 %v159_v42, %v133_v43 }
 0x11f   :  { %v164_v47 = vmax.f32 %v160_v44, 0.0 }
 0x124   :  { %v161_v45 = vpop.f32.mrf.mxu1 }
 0x125   :  { %v162_v46 = vadd.f32 %v161_v45, %v133_v43 }
 0x127   :  { %v165_v48 = vmax.f32 %v162_v46, 0.0 }
 0x129   :  { %v191_v49 = vpack.c.bf16 %v165_v48, %v164_v47 }
 0x12b   :  { %248 = vmatmul.bf16.vlgmr.msra.gmra.mxu2 %v191_v49 }
 0x12c   :  { %v392_v51 = vpop.f32.mrf.mxu1 }
 0x12d   :  { %v393_v53 = vadd.f32 %v392_v51, %v367_v52 }
 0x134   :  { %v394_v54 = vpop.f32.mrf.mxu1 }
 0x135   :  { %v395_v55 = vadd.f32 %v394_v54, %v367_v52 }
 0x137   :  { %v4974_v56 = vpack.c.bf16 %v395_v55, %v393_v53 }
 0x139   :  { %430 = vrot.lane.b32.xlu0 %v4974_v56, %s4743_s9  ;;  %530 = vrot.lane.b32.xlu1 %v4974_v56, %s4744_s10 }
 0x141   :  { %532 = vrot.lane.b32.xlu0 %v4974_v56, %s4745_s3  ;;  %78 = vperm.xlu1 %4513, %v73_v59  }
 0x1ab   :  { %v431_v61 = vpop.permute.xlu0 %430  ;;  %v531_v12 = vpop.permute.xlu1 %530 }
 0x1ac   :  { %v437_v63 = vsel %vm432_vm3, %v431_v61, 0 }
 0x1ad   :  { %446 = vmatpush.bf16.xpose.msra.mxu0 %v437_v63 }
 0x1ae   :  { %v249_v1 = vpop.f32.mrf.mxu2 }
 0x1af   :  { %v292_v4 = vadd.f32 %v291_v62, %v249_v1  ;;  %v398_v1 = vperm.slane %v4971_v50, 1 }
 0x1b1   :  { %v4999_v9 = vadd.f32 %v296_v5, %v292_v4 }
 0x1b3   :  { %v533_v2 = vpop.permute.xlu0 %532  ;;  %v79_v14 = vpop.permute.xlu1 %78 }
 0x1b4   :  { %v538_v3 = vsel %vm432_vm3, %v533_v2, 0  ;;  %3958 = vmatmul.msk.bf16.vlgmr.msra.gmra.mxu0 %vm432_vm3, %v4974_v56  ;;  %vm89_vm4 = vcmp.eq.f32.partialorder %v79_v14, %v4516_v13  ;;  %v4437_v14 = vld [vmem:[%s6404_s20] sm:$0xff] }
 0x1b5   :  { %547 = vmatpush.bf16.xpose.msra.mxu3 %v538_v3  ;;  %v5013_v17 = vsel %vm89_vm4, 0.0, %v4747_v16 }
 0x1b6   :  { %v251_v7 = vpop.f32.mrf.mxu2 }
 0x1b7   :  { %v294_v8 = vadd.f32 %v293_v6, %v251_v7  ;;  %v4439_v7 = vld [vmem:[%s6404_s20 + $0x10] sm:$0xff] }
 0x1b9   :  { %v5001_v10 = vadd.f32 %v296_v5, %v294_v8  ;;  %v4440_v5 = vld [vmem:[%s6404_s20 + $0x18] sm:$0xff] }
 0x1bb   :  { %v5005_v11 = vpack.c.bf16 %v5001_v10, %v4999_v9 }
 0x1bd   :  { %3957 = vmatmul.msk.bf16.vlgmr.msrb.gmra.mxu3 %vm146_vm1, %v5005_v11 }
 0x1be   :  { %752 = vmatpush.bf16.msrb.mxu3 %v4440_v5 }
 0x1c2   :  { %753 = vmatpush.bf16.msrb.mxu3 %v4439_v7 }
 0x1cd   :  { %3961 = vmatmul.msk.bf16.vlgmr.msra.gmra.mxu3 %vm432_vm3, %v531_v12  ;;  %v4438_v12 = vld [vmem:[%s6404_s20 + $0x8] sm:$0xff] }
 0x1ce   :  { %754 = vmatpush.bf16.msrb.mxu3 %v4438_v12 }
 0x1d2   :  { %755 = vmatpush.bf16.msrb.mxu3 %v4437_v14 }
 0x231   :  { %v448_v15 = vpop.f32.mrf.mxu0 }
 0x232   :  { %v453_v18 = vmul.f32 0.35355338, %v448_v15 }
 0x234   :  { %v455_v20 = vadd.f32 %v453_v18, %v5013_v17 }
 0x236   :  { %v458_v21 = vsel %vm457_vm5, %v455_v20, -inf }
 0x237   :  { %459 = vmax.xlane.f32.xlu2 %v458_v21 }
 0x239   :  { %v450_v22 = vpop.f32.mrf.mxu0 }
 0x23a   :  { %v454_v24 = vmul.f32 0.35355338, %v450_v22 }
 0x23c   :  { %v456_v25 = vadd.f32 %v454_v24, %v5017_v23 }
 0x23e   :  { %v462_v26 = vsel %vm461_vm7, %v456_v25, -inf }
 0x23f   :  { %463 = vmax.xlane.f32.xlu0 %v462_v26 }
 0x240   :  { %v423_v27 = vpop.f32.mrf.mxu3 }
 0x241   :  { %v424_v3 = vadd.f32 %v423_v27, %v398_v1 }
 0x248   :  { %v425_v28 = vpop.f32.mrf.mxu3 }
 0x249   :  { %v426_v2 = vadd.f32 %v425_v28, %v398_v1 }
 0x24b   :  { %v5035_v4 = vpack.c.bf16 %v426_v2, %v424_v3 }
 0x250   :  { %v549_v30 = vpop.f32.mrf.mxu3 }
 0x251   :  { %v554_v33 = vmul.f32 0.35355338, %v549_v30 }
 0x253   :  { %v556_v34 = vadd.f32 %v554_v33, %v5013_v17 }
 0x255   :  { %v558_v35 = vsel %vm457_vm5, %v556_v34, -inf }
 0x256   :  { %559 = vmax.xlane.f32.xlu1 %v558_v35 }
 0x258   :  { %v551_v36 = vpop.f32.mrf.mxu3 }
 0x259   :  { %v555_v37 = vmul.f32 0.35355338, %v551_v36  ;;  %v336_v36 = vld [vmem:[%s6402_s18] sm:$0xf] }
 0x25b   :  { %v557_v38 = vadd.f32 %v555_v37, %v5017_v23  ;;  %v511_v37 = vsel %vm6415_vm9, %v336_v36, 0 }
 0x25c   :  { %520 = vmatpush.bf16.msrb.mxu2 %v511_v37 }
 0x25d   :  { %v561_v40 = vsel %vm461_vm7, %v557_v38, -inf }
 0x25e   :  { %562 = vmax.xlane.f32.xlu2 %v561_v40  ;;  %v337_v40 = vld [vmem:[%s6402_s18 + $0x4] sm:$0xf] }
 0x26f   :  { %482 = vrot.lane.b32.xlu1 %v4974_v56, %s4748_s26 }
 0x2aa   :  { %v460_v41 = vpop.xlane.xlu2 %459 }
 0x2ab   :  { %v465_v42 = vsub.f32 %v455_v20, %v460_v41  ;;  %v608_v41 = vsel %vm6415_vm9, %v337_v40, 0 }
 0x2ad   :  { %v467_v43 = vmul.f32 1.442695, %v465_v42 }
 0x2af   :  { %4517 = vpow2.f32 %v467_v43 }
 0x2b2   :  { %v464_v44 = vpop.xlane.xlu0 %463 }
 0x2b3   :  { %v466_v45 = vsub.f32 %v456_v25, %v464_v44  ;;  %v821_v25 = vsel %vm432_vm3, %v5035_v4, 0 }
 0x2b5   :  { %v4518_v46 = vpop.eup %4517  ;;  %v469_v47 = vmul.f32 1.442695, %v466_v45 }
 0x2b6   :  { %v471_v48 = vsel %vm457_vm5, %v4518_v46, 0.0 }
 0x2b7   :  { %4519 = vpow2.f32 %v469_v47  ;;  %472 = vadd.xlane.f32.xlu2 %v471_v48  ;;  %v527_v48 = vperm.slane %v4971_v50, 2 }
 0x2bd   :  { %v4520_v49 = vpop.eup %4519 }
 0x2be   :  { %v474_v51 = vsel %vm461_vm7, %v4520_v49, 0.0 }
 0x2bf   :  { %475 = vadd.xlane.f32.xlu0 %v474_v51 }
 0x2c9   :  { %v560_v52 = vpop.xlane.xlu1 %559 }
 0x2ca   :  { %v564_v53 = vsub.f32 %v556_v34, %v560_v52 }
 0x2cc   :  { %v566_v54 = vmul.f32 1.442695, %v564_v53 }
 0x2ce   :  { %4521 = vpow2.f32 %v566_v54 }
 0x2d1   :  { %v563_v55 = vpop.xlane.xlu2 %562 }
 0x2d2   :  { %v565_v57 = vsub.f32 %v557_v38, %v563_v55 }
 0x2d4   :  { %v4522_v58 = vpop.eup %4521  ;;  %v568_v59 = vmul.f32 1.442695, %v565_v57 }
 0x2d5   :  { %v570_v60 = vsel %vm457_vm5, %v4522_v58, 0.0 }
 0x2d6   :  { %4523 = vpow2.f32 %v568_v59  ;;  %571 = vadd.xlane.f32.xlu2 %v570_v60 }
 0x2dc   :  { %v4524_v61 = vpop.eup %4523 }
 0x2dd   :  { %v573_v62 = vsel %vm461_vm7, %v4524_v61, 0.0 }
 0x2de   :  { %574 = vadd.xlane.f32.xlu0 %v573_v62  ;;  %v4751_v62 = vmov 32.0  }
 0x2e1   :  { %v483_v63 = vpop.permute.xlu1 %482 }
 0x2e2   :  { %v489_v0 = vsel %vm6416_vm8, %v483_v63, 0 }
 0x2e3   :  { %498 = vmatpush.bf16.msra.mxu1 %v489_v0 }
 0x2e7   :  { %617 = vmatpush.bf16.msrb.mxu1 %v608_v41 }
 0x2ee   :  { %581 = vrot.lane.b32.xlu2 %v4974_v56, %s4749_s2 }
 0x2f6   :  { %913 = vrot.lane.b32.xlu2 %v5035_v4, %s4744_s10 }
 0x2fe   :  { %911 = vrot.lane.b32.xlu2 %v4974_v56, %s4750_s8 }
 0x32a   :  { %v473_v6 = vpop.xlane.xlu2 %472 }
 0x32b   :  { %4525 = vrcp.f32 %v473_v6 }
 0x331   :  { %v4526_v13 = vpop.eup %4525 }
 0x332   :  { %v476_v8 = vpop.xlane.xlu0 %475  ;;  %v479_v16 = vmul.f32 %v4526_v13, %v4518_v46 }
 0x333   :  { %4527 = vrcp.f32 %v476_v8 }
 0x339   :  { %v4528_v15 = vpop.eup %4527 }
 0x33a   :  { %v480_v18 = vmul.f32 %v4528_v15, %v4520_v49 }
 0x33c   :  { %v481_v19 = vpack.c.bf16 %v480_v18, %v479_v16 }
 0x33e   :  { %3959 = vmatmul.msk.bf16.vlgmr.msra.gmra.mxu1 %vm457_vm5, %v481_v19 }
 0x349   :  { %v572_v20 = vpop.xlane.xlu2 %571 }
 0x34a   :  { %4529 = vrcp.f32 %v572_v20  ;;  %v4434_v20 = vld [vmem:[%s6403_s19 + $0x8] sm:$0xff] }
 0x34b   :  { %709 = vmatpush.bf16.msra.mxu2 %v4434_v20 }
 0x350   :  { %v4530_v26 = vpop.eup %4529 }
 0x351   :  { %v575_v21 = vpop.xlane.xlu0 %574  ;;  %v582_v22 = vpop.permute.xlu2 %581  ;;  %v578_v28 = vmul.f32 %v4530_v26, %v4522_v58 }
 0x352   :  { %4531 = vrcp.f32 %v575_v21  ;;  %v587_v24 = vsel %vm6416_vm8, %v582_v22, 0 }
 0x353   :  { %596 = vmatpush.bf16.msrb.mxu0 %v587_v24  ;;  %4533 = vrcp.f32 %v4751_v62  ;;  %v4433_v24 = vld [vmem:[%s6403_s19] sm:$0xff] }
 0x354   :  { %710 = vmatpush.bf16.msra.mxu2 %v4433_v24 }
 0x357   :  { %830 = vmatpush.bf16.xpose.msra.mxu0 %v821_v25 }
 0x358   :  { %v4532_v27 = vpop.eup %4531 }
 0x359   :  { %v579_v30 = vmul.f32 %v4532_v27, %v4524_v61  ;;  %v914_v33 = vpop.permute.xlu2 %913  ;;  %v4534_v63 = vpop.eup %4533 }
 0x35a   :  { %v919_v34 = vsel %vm432_vm3, %v914_v33, 0  ;;  %v636_v0 = vmul.f32 32.0, %v4534_v63  ;;  %vm640_vm11 = vweird.f32 %v4534_v63 }
 0x35b   :  { %v580_v35 = vpack.c.bf16 %v579_v30, %v578_v28  ;;  %928 = vmatpush.bf16.xpose.msra.mxu3 %v919_v34 }
 0x35c   :  { %v637_v1 = vsub.f32 1.0, %v636_v0 }
 0x35d   :  { %3962 = vmatmul.msk.bf16.vlgmr.msrb.gmra.mxu0 %vm457_vm5, %v580_v35 }
 0x35e   :  { %v638_v2 = vmul.f32 %v4534_v63, %v637_v1 }
 0x360   :  { %v639_v3 = vadd.f32 %v4534_v63, %v638_v2 }
 0x362   :  { %v5074_v5 = vsel %vm640_vm11, %v4534_v63, %v639_v3  ;;  %v687_v3 = vperm.slane %v4971_v50, 3 }
 0x3bb   :  { %v500_v38 = vpop.f32.mrf.mxu1 }
 0x3c3   :  { %v502_v42 = vpop.f32.mrf.mxu1 }
 0x3c4   :  { %v505_v43 = vpack.c.bf16 %v502_v42, %v500_v38 }
 0x3c6   :  { %3960 = vmatmul.msk.bf16.vlgmr.msrb.gmra.mxu2 %vm432_vm3, %v505_v43 }
 0x3da   :  { %v598_v44 = vpop.f32.mrf.mxu0 }
 0x3e2   :  { %v600_v45 = vpop.f32.mrf.mxu0 }
 0x3e3   :  { %v603_v46 = vpack.c.bf16 %v600_v45, %v598_v44  ;;  %v680_v44 = vperm.slane %v4971_v50, 5 }
 0x3e5   :  { %3963 = vmatmul.msk.bf16.vlgmr.msrb.gmra.mxu1 %vm432_vm3, %v603_v46 }
 0x449   :  { %v522_v47 = vpop.f32.mrf.mxu2 }
 0x44a   :  { %v528_v49 = vadd.f32 %v527_v48, %v522_v47 }
 0x451   :  { %v524_v54 = vpop.f32.mrf.mxu2 }
 0x452   :  { %v529_v57 = vadd.f32 %v527_v48, %v524_v54 }
 0x462   :  { %v619_v51 = vpop.f32.mrf.mxu1 }
 0x463   :  { %v624_v52 = vadd.f32 %v619_v51, %v528_v49  ;;  %v683_v51 = vperm.slane %v4971_v50, 6 }
 0x465   :  { %v626_v53 = vadd.f32 %v624_v52, %v4929_v29 }
 0x467   :  { %v628_v55 = vsel %vm146_vm1, %v626_v53, 0.0 }
 0x468   :  { %629 = vadd.xlane.f32.xlu0 %v628_v55 }
 0x46a   :  { %v621_v58 = vpop.f32.mrf.mxu1 }
 0x46b   :  { %v625_v59 = vadd.f32 %v621_v58, %v529_v57 }
 0x46d   :  { %v627_v60 = vadd.f32 %v625_v59, %v4931_v31 }
 0x46f   :  { %v632_v61 = vsel %vm6414_vm10, %v627_v60, 0.0 }
 0x470   :  { %633 = vadd.xlane.f32.xlu0 %v632_v61 }
 0x4db   :  { %v630_v6 = vpop.xlane.xlu0 %629 }
 0x4dc   :  { %v642_v7 = vmul.f32 %v5074_v5, %v630_v6 }
 0x4de   :  { %v644_v8 = vsub.f32 %v626_v53, %v642_v7 }
 0x4e0   :  { %v646_v12 = vmul.f32 %v644_v8, %v644_v8 }
 0x4e2   :  { %v648_v13 = vsel %vm146_vm1, %v646_v12, 0.0 }
 0x4e3   :  { %649 = vadd.xlane.f32.xlu1 %v648_v13  ;;  %v634_v14 = vpop.xlane.xlu0 %633 }
 0x4e4   :  { %v643_v15 = vmul.f32 %v5074_v5, %v634_v14 }
 0x4e6   :  { %v645_v16 = vsub.f32 %v627_v60, %v643_v15  ;;  %v912_v15 = vpop.permute.xlu2 %911 }
 0x4e8   :  { %v647_v18 = vmul.f32 %v645_v16, %v645_v16 }
 0x4ea   :  { %v651_v19 = vsel %vm6414_vm10, %v647_v18, 0.0 }
 0x4eb   :  { %652 = vadd.xlane.f32.xlu0 %v651_v19 }
 0x4ff   :  { %815 = vrot.lane.b32.xlu0 %v4974_v56, %s4752_s24 }
 0x556   :  { %v650_v21 = vpop.xlane.xlu1 %649 }
 0x557   :  { %v654_v22 = vmul.f32 %v650_v21, %v5074_v5 }
 0x559   :  { %v656_v25 = vadd.f32 1e-05, %v654_v22 }
 0x55b   :  { %4535 = vrsqrt.f32 %v656_v25  ;;  %vm664_vm13 = vweird.f32 %v656_v25 }
 0x55e   :  { %v653_v26 = vpop.xlane.xlu0 %652 }
 0x55f   :  { %v655_v27 = vmul.f32 %v653_v26, %v5074_v5 }
 0x561   :  { %v4536_v28 = vpop.eup %4535  ;;  %v657_v56 = vadd.f32 1e-05, %v655_v27 }
 0x562   :  { %v659_v30 = vmul.f32 %v4536_v28, %v656_v25  ;;  %vm665_vm12 = vweird.f32 %v4536_v28 }
 0x563   :  { %4537 = vrsqrt.f32 %v657_v56  ;;  %vm666_vm14 = vmor %vm664_vm13, %vm665_vm12  ;;  %vm674_vm4 = vweird.f32 %v657_v56 }
 0x564   :  { %v660_v33 = vmul.f32 %v4536_v28, %v659_v30 }
 0x566   :  { %v661_v34 = vmul.f32 0.5, %v660_v33 }
 0x568   :  { %v662_v35 = vsub.f32 1.5, %v661_v34 }
 0x569   :  { %v4538_v36 = vpop.eup %4537 }
 0x56a   :  { %v663_v37 = vmul.f32 %v4536_v28, %v662_v35  ;;  %v669_v38 = vmul.f32 %v4538_v36, %v657_v56  ;;  %vm675_vm15 = vweird.f32 %v4538_v36 }
 0x56b   :  { %vm676_vm6 = vmor %vm674_vm4, %vm675_vm15 }
 0x56c   :  { %v670_v40 = vmul.f32 %v4538_v36, %v669_v38  ;;  %v667_v41 = vsel %vm666_vm14, %v4536_v28, %v663_v37 }
 0x56d   :  { %v678_v45 = vmul.f32 %v667_v41, %v644_v8 }
 0x56e   :  { %v671_v42 = vmul.f32 0.5, %v670_v40 }
 0x56f   :  { %v681_v49 = vmul.f32 %v680_v44, %v678_v45 }
 0x570   :  { %v672_v43 = vsub.f32 1.5, %v671_v42 }
 0x571   :  { %v816_v46 = vpop.permute.xlu0 %815  ;;  %v5095_v55 = vadd.f32 %v683_v51, %v681_v49 }
 0x572   :  { %v673_v47 = vmul.f32 %v4538_v36, %v672_v43  ;;  %3990 = vmatmul.msk.bf16.vlgmr.msra.gmra.mxu0 %vm432_vm3, %v816_v46 }
 0x574   :  { %v677_v48 = vsel %vm676_vm6, %v4538_v36, %v673_v47 }
 0x575   :  { %v679_v52 = vmul.f32 %v677_v48, %v645_v16 }
 0x577   :  { %v682_v53 = vmul.f32 %v680_v44, %v679_v52 }
 0x579   :  { %v5093_v54 = vadd.f32 %v683_v51, %v682_v53 }
 0x57b   :  { %v686_v57 = vpack.c.bf16 %v5093_v54, %v5095_v55 }
 0x57d   :  { %3972 = vmatmul.msk.bf16.vlgmr.msra.gmra.mxu2 %vm146_vm1, %v686_v57 }
 0x5ef   :  { %v832_v58 = vpop.f32.mrf.mxu0 }
 0x5f0   :  { %v837_v59 = vmul.f32 0.35355338, %v832_v58 }
 0x5f2   :  { %v839_v60 = vadd.f32 %v837_v59, %v5013_v17 }
 0x5f4   :  { %v841_v61 = vsel %vm457_vm5, %v839_v60, -inf }
 0x5f5   :  { %842 = vmax.xlane.f32.xlu2 %v841_v61 }
 0x5f7   :  { %v834_v62 = vpop.f32.mrf.mxu0 }
 0x5f8   :  { %v838_v63 = vmul.f32 0.35355338, %v834_v62 }
 0x5fa   :  { %v840_v0 = vadd.f32 %v838_v63, %v5017_v23  ;;  %v338_v63 = vld [vmem:[%s6402_s18 + $0x8] sm:$0xf] }
 0x5fc   :  { %v844_v1 = vsel %vm461_vm7, %v840_v0, -inf }
 0x5fd   :  { %845 = vmax.xlane.f32.xlu0 %v844_v1 }
 0x600   :  { %v712_v2 = vpop.f32.mrf.mxu2 }
 0x601   :  { %v713_v6 = vadd.f32 %v712_v2, %v687_v3 }
 0x603   :  { %v717_v12 = vmax.f32 %v713_v6, 0.0 }
 0x608   :  { %v714_v7 = vpop.f32.mrf.mxu2 }
 0x609   :  { %v715_v8 = vadd.f32 %v714_v7, %v687_v3 }
 0x60b   :  { %v718_v13 = vmax.f32 %v715_v8, 0.0  ;;  %v4446_v8 = vld [vmem:[%s6400_s16 + $0x18] sm:$0xff] }
 0x60d   :  { %v719_v14 = vpack.c.bf16 %v718_v13, %v717_v12  ;;  %865 = vrot.lane.b32.xlu2 %v5035_v4, %s4743_s9 }
 0x60f   :  { %3989 = vmatmul.msk.bf16.vlgmr.msrb.gmra.mxu3 %vm6413_vm2, %v719_v14 }
 0x61f   :  { %3993 = vmatmul.msk.bf16.vlgmr.msra.gmra.mxu3 %vm432_vm3, %v912_v15  ;;  %v4445_v15 = vld [vmem:[%s6400_s16 + $0x10] sm:$0xff] }
 0x668   :  { %v843_v16 = vpop.xlane.xlu2 %842 }
 0x669   :  { %v847_v25 = vsub.f32 %v839_v60, %v843_v16 }
 0x66b   :  { %v849_v27 = vmul.f32 1.442695, %v847_v25  ;;  %v4447_v25 = vld [vmem:[%s6401_s17 + $0x10] sm:$0xff] }
 0x66d   :  { %4539 = vpow2.f32 %v849_v27 }
 0x670   :  { %v866_v18 = vpop.permute.xlu2 %865  ;;  %v846_v56 = vpop.xlane.xlu0 %845 }
 0x671   :  { %v871_v19 = vsel %vm6416_vm8, %v866_v18, 0  ;;  %v848_v34 = vsub.f32 %v840_v0, %v846_v56  ;;  %v892_v0 = vsel %vm6415_vm9, %v338_v63, 0  ;;  %v5154_v56 = vld [vmem:[%s6405_s21 + $0x10] sm:$0xff] }
 0x672   :  { %880 = vmatpush.bf16.msra.mxu1 %v871_v19  ;;  %901 = vmatpush.bf16.msrb.mxu2 %v892_v0 }
 0x673   :  { %v851_v36 = vmul.f32 1.442695, %v848_v34  ;;  %v4540_v37 = vpop.eup %4539 }
 0x674   :  { %v853_v38 = vsel %vm457_vm5, %v4540_v37, 0.0 }
 0x675   :  { %4541 = vpow2.f32 %v851_v36 }
 0x67b   :  { %v4542_v40 = vpop.eup %4541 }
 0x67c   :  { %v856_v41 = vsel %vm461_vm7, %v4542_v40, 0.0 }
 0x692   :  { %v5110_v50 = vpop.f32.mrf.mxu3 }
 0x69a   :  { %v5112_v20 = vpop.f32.mrf.mxu3 }
 0x6a2   :  { %v930_v21 = vpop.f32.mrf.mxu3 }
 0x6a3   :  { %v935_v22 = vmul.f32 0.35355338, %v930_v21  ;;  %v339_v21 = vld [vmem:[%s6402_s18 + $0xc] sm:$0xf] }
 0x6a5   :  { %v937_v24 = vadd.f32 %v935_v22, %v5013_v17  ;;  %v989_v22 = vsel %vm6415_vm9, %v339_v21, 0 }
 0x6a6   :  { %998 = vmatpush.bf16.msrb.mxu1 %v989_v22 }
 0x6a7   :  { %v939_v26 = vsel %vm457_vm5, %v937_v24, -inf }
 0x6a8   :  { %940 = vmax.xlane.f32.xlu1 %v939_v26 }
 0x6aa   :  { %v932_v28 = vpop.f32.mrf.mxu3 }
 0x6ab   :  { %v936_v30 = vmul.f32 0.35355338, %v932_v28 }
 0x6ad   :  { %v938_v33 = vadd.f32 %v936_v30, %v5017_v23  ;;  %v1233_v30 = vperm.slane %v5154_v56, 0 }
 0x6af   :  { %v942_v35 = vsel %vm461_vm7, %v938_v33, -inf }
 0x6b0   :  { %943 = vmax.xlane.f32.xlu1 %v942_v35 }
 0x6b8   :  { %854 = vadd.xlane.f32.xlu1 %v853_v38  ;;  %v4435_v38 = vld [vmem:[%s6403_s19 + $0x10] sm:$0xff] }
 0x6c0   :  { %857 = vadd.xlane.f32.xlu1 %v856_v41 }
 0x71b   :  { %v941_v42 = vpop.xlane.xlu1 %940 }
 0x71c   :  { %v945_v43 = vsub.f32 %v937_v24, %v941_v42  ;;  %v4448_v24 = vld [vmem:[%s6401_s17 + $0x18] sm:$0xff] }
 0x71e   :  { %v947_v44 = vmul.f32 1.442695, %v945_v43 }
 0x720   :  { %4543 = vpow2.f32 %v947_v44 }
 0x723   :  { %v944_v45 = vpop.xlane.xlu1 %943 }
 0x724   :  { %v946_v46 = vsub.f32 %v938_v33, %v944_v45 }
 0x726   :  { %v4544_v47 = vpop.eup %4543  ;;  %v949_v48 = vmul.f32 1.442695, %v946_v46 }
 0x727   :  { %v951_v49 = vsel %vm457_vm5, %v4544_v47, 0.0 }
 0x728   :  { %4545 = vpow2.f32 %v949_v48  ;;  %952 = vadd.xlane.f32.xlu1 %v951_v49 }
 0x72b   :  { %v855_v51 = vpop.xlane.xlu1 %854 }
 0x72c   :  { %4547 = vrcp.f32 %v855_v51 }
 0x72e   :  { %v4546_v52 = vpop.eup %4545 }
 0x72f   :  { %v954_v53 = vsel %vm461_vm7, %v4546_v52, 0.0 }
 0x730   :  { %955 = vadd.xlane.f32.xlu0 %v954_v53 }
 0x732   :  { %v4548_v58 = vpop.eup %4547 }
 0x733   :  { %v858_v57 = vpop.xlane.xlu1 %857  ;;  %v861_v60 = vmul.f32 %v4548_v58, %v4540_v37  ;;  %v4436_v37 = vld [vmem:[%s6403_s19 + $0x18] sm:$0xff] }
 0x734   :  { %4549 = vrcp.f32 %v858_v57  ;;  %1082 = vmatpush.bf16.msra.mxu2 %v4436_v37 }
 0x738   :  { %1083 = vmatpush.bf16.msra.mxu2 %v4435_v38 }
 0x73a   :  { %v4550_v59 = vpop.eup %4549 }
 0x73b   :  { %v862_v61 = vmul.f32 %v4550_v59, %v4542_v40 }
 0x73d   :  { %v863_v62 = vpack.c.bf16 %v862_v61, %v861_v60 }
 0x73f   :  { %3991 = vmatmul.msk.bf16.vlgmr.msra.gmra.mxu1 %vm457_vm5, %v863_v62 }
 0x740   :  { %1279 = vmatpush.bf16.msra.mxu1 %v4448_v24 }
 0x741   :  { %962 = vrot.lane.b32.xlu1 %v5035_v4, %s4745_s3 }
 0x744   :  { %1280 = vmatpush.bf16.msra.mxu1 %v4447_v25 }
 0x79b   :  { %v953_v2 = vpop.xlane.xlu1 %952 }
 0x7a3   :  { %v956_v1 = vpop.xlane.xlu0 %955 }
 0x7a4   :  { %4551 = vrcp.f32 %v956_v1 }
 0x7a5   :  { %4553 = vrcp.f32 %v953_v2 }
 0x7aa   :  { %v4552_v3 = vpop.eup %4551 }
 0x7ab   :  { %v4554_v6 = vpop.eup %4553  ;;  %v960_v7 = vmul.f32 %v4552_v3, %v4546_v52 }
 0x7ac   :  { %v959_v4 = vmul.f32 %v4554_v6, %v4544_v47 }
 0x7ae   :  { %v961_v14 = vpack.c.bf16 %v960_v7, %v959_v4 }
 0x7b3   :  { %v963_v12 = vpop.permute.xlu1 %962 }
 0x7b4   :  { %v968_v13 = vsel %vm6416_vm8, %v963_v12, 0 }
 0x7b5   :  { %977 = vmatpush.bf16.msrb.mxu0 %v968_v13 }
 0x7b8   :  { %3994 = vmatmul.msk.bf16.vlgmr.msrb.gmra.mxu0 %vm457_vm5, %v961_v14 }
 0x7b9   :  { %1252 = vmatpush.bf16.msra.mxu0 %v4446_v8 }
 0x7bc   :  { %v882_v16 = vpop.f32.mrf.mxu1 }
 0x7bd   :  { %1253 = vmatpush.bf16.msra.mxu0 %v4445_v15 }
 0x7c4   :  { %v884_v18 = vpop.f32.mrf.mxu1 }
 0x7c5   :  { %v887_v19 = vpack.c.bf16 %v884_v18, %v882_v16 }
 0x7c7   :  { %3992 = vmatmul.msk.bf16.vlgmr.msrb.gmra.mxu2 %vm432_vm3, %v887_v19 }
 0x7c8   :  { %4068 = vmatmul.msk.bf16.vlgmr.msra.gmra.mxu0 %vm146_vm1, %v5005_v11 }
 0x835   :  { %v979_v26 = vpop.f32.mrf.mxu0 }
 0x83d   :  { %v981_v27 = vpop.f32.mrf.mxu0 }
 0x83e   :  { %v984_v11 = vpack.c.bf16 %v981_v27, %v979_v26 }
 0x840   :  { %3995 = vmatmul.msk.bf16.vlgmr.msrb.gmra.mxu1 %vm432_vm3, %v984_v11 }
 0x845   :  { %v1255_v28 = vpop.f32.mrf.mxu0 }
 0x846   :  { %v1256_v34 = vadd.f32 %v1255_v28, %v1233_v30 }
 0x84a   :  { %v903_v40 = vpop.f32.mrf.mxu2 }
 0x84d   :  { %v1257_v33 = vpop.f32.mrf.mxu0 }
 0x84e   :  { %v1258_v35 = vadd.f32 %v1257_v33, %v1233_v30 }
 0x850   :  { %v5157_v36 = vpack.c.bf16 %v1258_v35, %v1256_v34  ;;  %4077 = vmatmul.msk.bf16.vlgmr.msra.gmra.mxu1 %vm146_vm1, %v4935_v32  ;;  %v5174_v32 = vld [vmem:[%s6405_s21 + $0x8] sm:$0xff] }
 0x851   :  { %v908_v41 = vperm.slane %v5174_v32, 1  ;;  %v1053_v11 = vperm.slane %v5174_v32, 4  ;;  %v1056_v37 = vperm.slane %v5174_v32, 5 }
 0x852   :  { %1289 = vrot.lane.b32.xlu1 %v5157_v36, %s4743_s9  ;;  %v905_v46 = vpop.f32.mrf.mxu2 }
 0x853   :  { %v909_v42 = vadd.f32 %v908_v41, %v903_v40  ;;  %v910_v48 = vadd.f32 %v908_v41, %v905_v46  ;;  %v4444_v46 = vld [vmem:[%s6404_s20 + $0x38] sm:$0xff] }
 0x854   :  { %1125 = vmatpush.bf16.msrb.mxu3 %v4444_v46 }
 0x85a   :  { %1384 = vrot.lane.b32.xlu1 %v5157_v36, %s4744_s10 }
 0x8bd   :  { %v1000_v43 = vpop.f32.mrf.mxu1 }
 0x8be   :  { %v1005_v44 = vadd.f32 %v1000_v43, %v909_v42 }
 0x8c0   :  { %v1007_v45 = vadd.f32 %v1005_v44, %v4929_v29 }
 0x8c2   :  { %v1009_v47 = vsel %vm146_vm1, %v1007_v45, 0.0 }
 0x8c3   :  { %1010 = vadd.xlane.f32.xlu0 %v1009_v47  ;;  %v4443_v47 = vld [vmem:[%s6404_s20 + $0x30] sm:$0xff] }
 0x8c4   :  { %v1290_v49 = vpop.permute.xlu1 %1289  ;;  %1126 = vmatpush.bf16.msrb.mxu3 %v4443_v47 }
 0x8c5   :  { %v1295_v51 = vsel %vm432_vm3, %v1290_v49, 0  ;;  %v1002_v52 = vpop.f32.mrf.mxu1  ;;  %v4442_v49 = vld [vmem:[%s6404_s20 + $0x28] sm:$0xff] }
 0x8c6   :  { %v1006_v53 = vadd.f32 %v1002_v52, %v910_v48  ;;  %1304 = vmatpush.bf16.xpose.msrb.mxu2 %v1295_v51  ;;  %v4441_v51 = vld [vmem:[%s6404_s20 + $0x20] sm:$0xff] }
 0x8c8   :  { %v1008_v57 = vadd.f32 %v1006_v53, %v4931_v31  ;;  %1127 = vmatpush.bf16.msrb.mxu3 %v4442_v49 }
 0x8ca   :  { %v1012_v58 = vsel %vm6414_vm10, %v1008_v57, 0.0 }
 0x8cb   :  { %1013 = vadd.xlane.f32.xlu0 %v1012_v58 }
 0x8cc   :  { %v1385_v42 = vpop.permute.xlu1 %1384  ;;  %1128 = vmatpush.bf16.msrb.mxu3 %v4441_v51 }
 0x8cd   :  { %v1282_v48 = vpop.f32.mrf.mxu1 }
 0x8d5   :  { %v1284_v52 = vpop.f32.mrf.mxu1 }
 0x936   :  { %v1011_v59 = vpop.xlane.xlu0 %1010 }
 0x937   :  { %v1015_v60 = vmul.f32 %v1011_v59, %v5074_v5 }
 0x939   :  { %v1017_v29 = vsub.f32 %v1007_v45, %v1015_v60 }
 0x93b   :  { %v1019_v61 = vmul.f32 %v1017_v29, %v1017_v29 }
 0x93d   :  { %v1021_v62 = vsel %vm146_vm1, %v1019_v61, 0.0 }
 0x93e   :  { %1022 = vadd.xlane.f32.xlu2 %v1021_v62  ;;  %v1014_v63 = vpop.xlane.xlu0 %1013 }
 0x93f   :  { %v1016_v0 = vmul.f32 %v1014_v63, %v5074_v5  ;;  %v1060_v63 = vperm.slane %v5174_v32, 2 }
 0x941   :  { %v1018_v1 = vsub.f32 %v1008_v57, %v1016_v0 }
 0x943   :  { %v1020_v2 = vmul.f32 %v1018_v1, %v1018_v1 }
 0x945   :  { %v1024_v3 = vsel %vm6414_vm10, %v1020_v2, 0.0 }
 0x946   :  { %1025 = vadd.xlane.f32.xlu0 %v1024_v3 }
 0x95a   :  { %1386 = vrot.lane.b32.xlu0 %v5157_v36, %s4745_s3 }
 0x9b1   :  { %v1023_v31 = vpop.xlane.xlu2 %1022 }
 0x9b2   :  { %v1027_v6 = vmul.f32 %v1023_v31, %v5074_v5 }
 0x9b4   :  { %v1029_v7 = vadd.f32 1e-05, %v1027_v6 }
 0x9b6   :  { %4555 = vrsqrt.f32 %v1029_v7  ;;  %vm1037_vm12 = vweird.f32 %v1029_v7 }
 0x9b9   :  { %v1026_v8 = vpop.xlane.xlu0 %1025 }
 0x9ba   :  { %v1028_v12 = vmul.f32 %v1026_v8, %v5074_v5 }
 0x9bc   :  { %v4556_v4 = vpop.eup %4555  ;;  %v1030_v13 = vadd.f32 1e-05, %v1028_v12 }
 0x9bd   :  { %v1032_v14 = vmul.f32 %v4556_v4, %v1029_v7  ;;  %vm1038_vm11 = vweird.f32 %v4556_v4 }
 0x9be   :  { %4557 = vrsqrt.f32 %v1030_v13  ;;  %vm1039_vm13 = vmor %vm1037_vm12, %vm1038_vm11  ;;  %vm1047_vm15 = vweird.f32 %v1030_v13 }
 0x9bf   :  { %v1033_v15 = vmul.f32 %v4556_v4, %v1032_v14 }
 0x9c1   :  { %v1034_v16 = vmul.f32 0.5, %v1033_v15 }
 0x9c3   :  { %v1035_v18 = vsub.f32 1.5, %v1034_v16 }
 0x9c4   :  { %v4558_v19 = vpop.eup %4557 }
 0x9c5   :  { %v1036_v21 = vmul.f32 %v4556_v4, %v1035_v18  ;;  %v1042_v22 = vmul.f32 %v4558_v19, %v1030_v13  ;;  %vm1048_vm14 = vweird.f32 %v4558_v19 }
 0x9c6   :  { %vm1049_vm4 = vmor %vm1047_vm15, %vm1048_vm14 }
 0x9c7   :  { %v1043_v24 = vmul.f32 %v4558_v19, %v1042_v22  ;;  %v1040_v25 = vsel %vm1039_vm13, %v4556_v4, %v1036_v21 }
 0x9c8   :  { %v1051_v28 = vmul.f32 %v1040_v25, %v1017_v29 }
 0x9c9   :  { %v1044_v26 = vmul.f32 0.5, %v1043_v24 }
 0x9ca   :  { %v1054_v38 = vmul.f32 %v1053_v11, %v1051_v28 }
 0x9cb   :  { %v1045_v27 = vsub.f32 1.5, %v1044_v26 }
 0x9cc   :  { %v1387_v30 = vpop.permute.xlu0 %1386  ;;  %v5193_v43 = vadd.f32 %v1056_v37, %v1054_v38 }
 0x9cd   :  { %v1046_v33 = vmul.f32 %v4558_v19, %v1045_v27  ;;  %v1392_v34 = vsel %vm432_vm3, %v1387_v30, 0  ;;  %v1260_v30 = vperm.slane %v5154_v56, 1 }
 0x9ce   :  { %1401 = vmatpush.bf16.xpose.msrb.mxu1 %v1392_v34 }
 0x9cf   :  { %v1050_v35 = vsel %vm1049_vm4, %v4558_v19, %v1046_v33  ;;  %v1285_v34 = vadd.f32 %v1284_v52, %v1260_v30 }
 0x9d0   :  { %v1052_v40 = vmul.f32 %v1050_v35, %v1018_v1  ;;  %v1283_v35 = vadd.f32 %v1282_v48, %v1260_v30 }
 0x9d2   :  { %v1055_v41 = vmul.f32 %v1053_v11, %v1052_v40 }
 0x9d4   :  { %v5195_v44 = vadd.f32 %v1056_v37, %v1055_v41  ;;  %v5230_v37 = vpack.c.bf16 %v1285_v34, %v1283_v35  ;;  %v1381_v35 = vperm.slane %v5154_v56, 2 }
 0x9d5   :  { %4081 = vmatmul.msk.bf16.vlgmr.msrb.gmra.mxu1 %vm432_vm3, %v1385_v42 }
 0x9d6   :  { %v1059_v45 = vpack.c.bf16 %v5195_v44, %v5193_v43  ;;  %v1667_v46 = vsel %vm432_vm3, %v5230_v37, 0 }
 0x9d8   :  { %4004 = vmatmul.msk.bf16.vlgmr.msra.gmra.mxu2 %vm146_vm1, %v1059_v45 }
 0x9e8   :  { %4078 = vmatmul.msk.bf16.vlgmr.msrb.gmra.mxu2 %vm432_vm3, %v5157_v36 }
 0xa52   :  { %v1403_v53 = vpop.f32.mrf.mxu1 }
 0xa53   :  { %v1408_v57 = vmul.f32 0.35355338, %v1403_v53 }
 0xa55   :  { %v1410_v58 = vadd.f32 %v1408_v57, %v5013_v17 }
 0xa57   :  { %v1412_v59 = vsel %vm457_vm5, %v1410_v58, -inf }
 0xa58   :  { %1413 = vmax.xlane.f32.xlu1 %v1412_v59 }
 0xa5a   :  { %v1405_v60 = vpop.f32.mrf.mxu1 }
 0xa5b   :  { %v1409_v29 = vmul.f32 0.35355338, %v1405_v60  ;;  %v1085_v61 = vpop.f32.mrf.mxu2  ;;  %v4456_v60 = vld [vmem:[%s6404_s20 + $0x58] sm:$0xff] }
 0xa5c   :  { %v1086_v1 = vadd.f32 %v1085_v61, %v1060_v63  ;;  %1598 = vmatpush.bf16.msra.mxu1 %v4456_v60 }
 0xa5d   :  { %v1411_v62 = vadd.f32 %v1409_v29, %v5017_v23 }
 0xa5e   :  { %v1090_v31 = vmax.f32 %v1086_v1, 0.0 }
 0xa5f   :  { %v1415_v0 = vsel %vm461_vm7, %v1411_v62, -inf }
 0xa60   :  { %1416 = vmax.xlane.f32.xlu0 %v1415_v0  ;;  %v4455_v0 = vld [vmem:[%s6404_s20 + $0x50] sm:$0xff] }
 0xa61   :  { %1599 = vmatpush.bf16.msra.mxu1 %v4455_v0 }
 0xa63   :  { %v1087_v2 = vpop.f32.mrf.mxu2 }
 0xa64   :  { %v1088_v3 = vadd.f32 %v1087_v2, %v1060_v63  ;;  %v4454_v2 = vld [vmem:[%s6404_s20 + $0x48] sm:$0xff] }
 0xa65   :  { %1600 = vmatpush.bf16.msra.mxu1 %v4454_v2  ;;  %v4450_v2 = vld [vmem:[%s6403_s19 + $0x28] sm:$0xff] }
 0xa66   :  { %v1091_v6 = vmax.f32 %v1088_v3, 0.0  ;;  %v4453_v3 = vld [vmem:[%s6404_s20 + $0x40] sm:$0xff] }
 0xa68   :  { %v1092_v7 = vpack.c.bf16 %v1091_v6, %v1090_v31 }
 0xa69   :  { %1601 = vmatpush.bf16.msra.mxu1 %v4453_v3 }
 0xa6a   :  { %4021 = vmatmul.msk.bf16.vlgmr.msrb.gmra.mxu3 %vm6413_vm2, %v1092_v7 }
 0xa6b   :  { %v1306_v8 = vpop.f32.mrf.mxu2 }
 0xa6c   :  { %v1311_v12 = vmul.f32 0.35355338, %v1306_v8 }
 0xa6e   :  { %v1313_v4 = vadd.f32 %v1311_v12, %v5013_v17 }
 0xa70   :  { %v1315_v13 = vsel %vm457_vm5, %v1313_v4, -inf }
 0xa71   :  { %1316 = vmax.xlane.f32.xlu2 %v1315_v13 }
 0xa73   :  { %v1308_v14 = vpop.f32.mrf.mxu2 }
 0xa74   :  { %v1312_v15 = vmul.f32 0.35355338, %v1308_v14  ;;  %1435 = vrot.lane.b32.xlu0 %v5157_v36, %s4749_s2 }
 0xa76   :  { %v1314_v16 = vadd.f32 %v1312_v15, %v5017_v23 }
 0xa78   :  { %v1318_v18 = vsel %vm461_vm7, %v1314_v16, -inf }
 0xa79   :  { %1319 = vmax.xlane.f32.xlu2 %v1318_v18 }
 0xacb   :  { %v1414_v19 = vpop.xlane.xlu1 %1413 }
 0xacc   :  { %v1418_v21 = vsub.f32 %v1410_v58, %v1414_v19  ;;  %v4031_v19 = vld [vmem:[%s6402_s18 + $0x14] sm:$0xf] }
 0xace   :  { %v1420_v22 = vmul.f32 1.442695, %v1418_v21  ;;  %v1462_v21 = vsel %vm6415_vm9, %v4031_v19, 0 }
 0xad0   :  { %4559 = vpow2.f32 %v1420_v22 }
 0xad3   :  { %v1417_v24 = vpop.xlane.xlu0 %1416 }
 0xad4   :  { %v1419_v25 = vsub.f32 %v1411_v62, %v1417_v24 }
 0xad6   :  { %v4560_v26 = vpop.eup %4559  ;;  %v1422_v27 = vmul.f32 1.442695, %v1419_v25  ;;  %v4030_v25 = vld [vmem:[%s6402_s18 + $0x10] sm:$0xf] }
 0xad7   :  { %v1424_v11 = vsel %vm457_vm5, %v4560_v26, 0.0 }
 0xad8   :  { %4561 = vpow2.f32 %v1422_v27  ;;  %1425 = vadd.xlane.f32.xlu2 %v1424_v11  ;;  %v1365_v27 = vsel %vm6415_vm9, %v4030_v25, 0 }
 0xad9   :  { %1374 = vmatpush.bf16.msrb.mxu0 %v1365_v27 }
 0xadd   :  { %1555 = vmatpush.bf16.msra.mxu0 %v4450_v2 }
 0xade   :  { %v4562_v28 = vpop.eup %4561 }
 0xadf   :  { %v1427_v33 = vsel %vm461_vm7, %v4562_v28, 0.0 }
 0xae0   :  { %1428 = vadd.xlane.f32.xlu2 %v1427_v33 }
 0xae4   :  { %v1317_v38 = vpop.xlane.xlu2 %1316 }
 0xae5   :  { %v1321_v40 = vsub.f32 %v1313_v4, %v1317_v38 }
 0xae6   :  { %v1436_v41 = vpop.permute.xlu0 %1435 }
 0xae7   :  { %v1323_v42 = vmul.f32 1.442695, %v1321_v40  ;;  %v1441_v45 = vsel %vm6416_vm8, %v1436_v41, 0 }
 0xae8   :  { %1450 = vmatpush.bf16.msra.mxu2 %v1441_v45 }
 0xae9   :  { %4563 = vpow2.f32 %v1323_v42 }
 0xaec   :  { %1676 = vmatpush.bf16.xpose.msrb.mxu2 %v1667_v46  ;;  %v1320_v47 = vpop.xlane.xlu2 %1319 }
 0xaed   :  { %v1322_v49 = vsub.f32 %v1314_v16, %v1320_v47  ;;  %v5268_v11 = vpop.f32.mrf.mxu3 }
 0xaef   :  { %v4564_v51 = vpop.eup %4563  ;;  %v1325_v52 = vmul.f32 1.442695, %v1322_v49 }
 0xaf0   :  { %v1327_v48 = vsel %vm457_vm5, %v4564_v51, 0.0 }
 0xaf1   :  { %4565 = vpow2.f32 %v1325_v52  ;;  %1328 = vadd.xlane.f32.xlu1 %v1327_v48 }
 0xaf7   :  { %v4566_v53 = vpop.eup %4565 }
 0xaf8   :  { %v1330_v57 = vsel %vm461_vm7, %v4566_v53, 0.0 }
 0xaf9   :  { %1331 = vadd.xlane.f32.xlu2 %v1330_v57 }
 0xb0a   :  { %1338 = vrot.lane.b32.xlu1 %v5157_v36, %s4748_s26 }
 0xb12   :  { %1759 = vrot.lane.b32.xlu1 %v5230_v37, %s4744_s10 }
 0xb1a   :  { %1757 = vrot.lane.b32.xlu1 %v5157_v36, %s4750_s8 }
 0xb4b   :  { %v1426_v58 = vpop.xlane.xlu2 %1425 }
 0xb4c   :  { %4567 = vrcp.f32 %v1426_v58 }
 0xb52   :  { %v4568_v29 = vpop.eup %4567 }
 0xb53   :  { %v1429_v59 = vpop.xlane.xlu2 %1428  ;;  %v1432_v62 = vmul.f32 %v4568_v29, %v4560_v26 }
 0xb54   :  { %4569 = vrcp.f32 %v1429_v59 }
 0xb5a   :  { %v4570_v61 = vpop.eup %4569 }
 0xb5b   :  { %v1433_v63 = vmul.f32 %v4570_v61, %v4562_v28  ;;  %v5270_v28 = vpop.f32.mrf.mxu3 }
 0xb5d   :  { %v1434_v1 = vpack.c.bf16 %v1433_v63, %v1432_v62 }
 0xb5f   :  { %4082 = vmatmul.msk.bf16.vlgmr.msra.gmra.mxu2 %vm457_vm5, %v1434_v1 }
 0xb64   :  { %v1329_v6 = vpop.xlane.xlu1 %1328 }
 0xb6c   :  { %v1332_v31 = vpop.xlane.xlu2 %1331 }
 0xb6d   :  { %4571 = vrcp.f32 %v1332_v31 }
 0xb6e   :  { %4573 = vrcp.f32 %v1329_v6  ;;  %v4449_v6 = vld [vmem:[%s6403_s19 + $0x20] sm:$0xff] }
 0xb6f   :  { %1556 = vmatpush.bf16.msra.mxu0 %v4449_v6 }
 0xb73   :  { %v4572_v7 = vpop.eup %4571 }
 0xb74   :  { %v4574_v8 = vpop.eup %4573  ;;  %v1336_v12 = vmul.f32 %v4572_v7, %v4566_v53 }
 0xb75   :  { %v1335_v13 = vmul.f32 %v4574_v8, %v4564_v51 }
 0xb77   :  { %v1337_v15 = vpack.c.bf16 %v1336_v12, %v1335_v13 }
 0xb7c   :  { %v1339_v4 = vpop.permute.xlu1 %1338 }
 0xb7d   :  { %v1344_v14 = vsel %vm6416_vm8, %v1339_v4, 0 }
 0xb7e   :  { %1353 = vmatpush.bf16.msra.mxu3 %v1344_v14 }
 0xb81   :  { %4079 = vmatmul.msk.bf16.vlgmr.msra.gmra.mxu3 %vm457_vm5, %v1337_v15 }
 0xb82   :  { %1471 = vmatpush.bf16.msrb.mxu3 %v1462_v21 }
 0xb84   :  { %v1760_v16 = vpop.permute.xlu1 %1759 }
 0xb85   :  { %v1765_v18 = vsel %vm432_vm3, %v1760_v16, 0 }
 0xb86   :  { %1774 = vmatpush.bf16.xpose.msrb.mxu1 %v1765_v18 }
 0xbe2   :  { %v1452_v22 = vpop.f32.mrf.mxu2 }
 0xbea   :  { %v1454_v24 = vpop.f32.mrf.mxu2 }
 0xbeb   :  { %v1457_v26 = vpack.c.bf16 %v1454_v24, %v1452_v22 }
 0xbed   :  { %4083 = vmatmul.msk.bf16.vlgmr.msrb.gmra.mxu3 %vm432_vm3, %v1457_v26 }
 0xc04   :  { %v1355_v30 = vpop.f32.mrf.mxu3 }
 0xc0c   :  { %v1357_v33 = vpop.f32.mrf.mxu3 }
 0xc0d   :  { %v1360_v34 = vpack.c.bf16 %v1357_v33, %v1355_v30  ;;  %v1526_v30 = vperm.slane %v5154_v56, 5 }
 0xc0f   :  { %4080 = vmatmul.msk.bf16.vlgmr.msrb.gmra.mxu0 %vm432_vm3, %v1360_v34 }
 0xc70   :  { %v1473_v38 = vpop.f32.mrf.mxu3 }
 0xc78   :  { %v1475_v51 = vpop.f32.mrf.mxu3 }
 0xc8c   :  { %v1376_v40 = vpop.f32.mrf.mxu0 }
 0xc8d   :  { %v1382_v41 = vadd.f32 %v1381_v35, %v1376_v40 }
 0xc8f   :  { %v1478_v42 = vadd.f32 %v1473_v38, %v1382_v41  ;;  %v1529_v38 = vperm.slane %v5154_v56, 6 }
 0xc91   :  { %v1480_v45 = vadd.f32 %v1478_v42, %v4999_v9 }
 0xc93   :  { %v1482_v46 = vsel %vm146_vm1, %v1480_v45, 0.0 }
 0xc94   :  { %v1378_v47 = vpop.f32.mrf.mxu0  ;;  %1483 = vadd.xlane.f32.xlu2 %v1482_v46 }
 0xc95   :  { %v1383_v49 = vadd.f32 %v1381_v35, %v1378_v47 }
 0xc97   :  { %v1479_v52 = vadd.f32 %v1475_v51, %v1383_v49 }
 0xc99   :  { %v1481_v48 = vadd.f32 %v1479_v52, %v5001_v10 }
 0xc9b   :  { %v1485_v53 = vsel %vm6414_vm10, %v1481_v48, 0.0 }
 0xc9c   :  { %1486 = vadd.xlane.f32.xlu2 %v1485_v53 }
 0xd07   :  { %v1484_v57 = vpop.xlane.xlu2 %1483 }
 0xd08   :  { %v1488_v58 = vmul.f32 %v1484_v57, %v5074_v5 }
 0xd0a   :  { %v1490_v59 = vsub.f32 %v1480_v45, %v1488_v58 }
 0xd0c   :  { %v1492_v60 = vmul.f32 %v1490_v59, %v1490_v59 }
 0xd0e   :  { %v1494_v29 = vsel %vm146_vm1, %v1492_v60, 0.0 }
 0xd0f   :  { %1495 = vadd.xlane.f32.xlu0 %v1494_v29  ;;  %v1487_v61 = vpop.xlane.xlu2 %1486  ;;  %v1533_v29 = vperm.slane %v5154_v56, 3 }
 0xd10   :  { %v1489_v62 = vmul.f32 %v1487_v61, %v5074_v5 }
 0xd12   :  { %v1491_v63 = vsub.f32 %v1481_v48, %v1489_v62 }
 0xd14   :  { %v1493_v0 = vmul.f32 %v1491_v63, %v1491_v63 }
 0xd16   :  { %v1497_v1 = vsel %vm6414_vm10, %v1493_v0, 0.0 }
 0xd17   :  { %1498 = vadd.xlane.f32.xlu2 %v1497_v1 }
 0xd2f   :  { %1661 = vrot.lane.b32.xlu2 %v5157_v36, %s4752_s24 }
 0xd82   :  { %v1496_v3 = vpop.xlane.xlu0 %1495 }
 0xd83   :  { %v1500_v31 = vmul.f32 %v1496_v3, %v5074_v5  ;;  %v1758_v3 = vpop.permute.xlu1 %1757 }
 0xd85   :  { %v1502_v7 = vadd.f32 1e-05, %v1500_v31 }
 0xd87   :  { %4575 = vrsqrt.f32 %v1502_v7  ;;  %vm1510_vm11 = vweird.f32 %v1502_v7 }
 0xd8a   :  { %v1499_v8 = vpop.xlane.xlu2 %1498 }
 0xd8b   :  { %v1501_v12 = vmul.f32 %v1499_v8, %v5074_v5 }
 0xd8d   :  { %v4576_v4 = vpop.eup %4575  ;;  %v1503_v36 = vadd.f32 1e-05, %v1501_v12 }
 0xd8e   :  { %v1505_v13 = vmul.f32 %v4576_v4, %v1502_v7  ;;  %vm1511_vm6 = vweird.f32 %v4576_v4 }
 0xd8f   :  { %4577 = vrsqrt.f32 %v1503_v36  ;;  %vm1512_vm12 = vmor %vm1510_vm11, %vm1511_vm6  ;;  %vm1520_vm14 = vweird.f32 %v1503_v36 }
 0xd90   :  { %v1506_v14 = vmul.f32 %v4576_v4, %v1505_v13 }
 0xd92   :  { %v1507_v15 = vmul.f32 0.5, %v1506_v14  ;;  %v1662_v16 = vpop.permute.xlu2 %1661 }
 0xd93   :  { %4110 = vmatmul.msk.bf16.vlgmr.msrb.gmra.mxu2 %vm432_vm3, %v1662_v16 }
 0xd94   :  { %v1508_v18 = vsub.f32 1.5, %v1507_v15 }
 0xd95   :  { %v4578_v19 = vpop.eup %4577 }
 0xd96   :  { %v1509_v21 = vmul.f32 %v4576_v4, %v1508_v18  ;;  %v1515_v22 = vmul.f32 %v4578_v19, %v1503_v36  ;;  %vm1521_vm13 = vweird.f32 %v4578_v19 }
 0xd97   :  { %vm1522_vm15 = vmor %vm1520_vm14, %vm1521_vm13 }
 0xd98   :  { %v1516_v24 = vmul.f32 %v4578_v19, %v1515_v22  ;;  %v1513_v25 = vsel %vm1512_vm12, %v4576_v4, %v1509_v21 }
 0xd99   :  { %v1524_v33 = vmul.f32 %v1513_v25, %v1490_v59 }
 0xd9a   :  { %v1517_v26 = vmul.f32 0.5, %v1516_v24  ;;  %v5326_v24 = vld [vmem:[%s6405_s21] sm:$0xff] }
 0xd9b   :  { %v1527_v40 = vmul.f32 %v1526_v30, %v1524_v33  ;;  %v720_v25 = vperm.slane %v5326_v24, 4 }
 0xd9c   :  { %v1518_v27 = vsub.f32 1.5, %v1517_v26 }
 0xd9d   :  { %v5295_v45 = vadd.f32 %v1529_v38, %v1527_v40  ;;  %v758_v26 = vadd.f32 %v5110_v50, %v720_v25 }
 0xd9e   :  { %v1519_v34 = vmul.f32 %v4578_v19, %v1518_v27 }
 0xd9f   :  { %v5333_v27 = vadd.f32 %v758_v26, %v5095_v55 }
 0xda0   :  { %v1523_v35 = vsel %vm1522_vm15, %v4578_v19, %v1519_v34 }
 0xda1   :  { %v1525_v41 = vmul.f32 %v1523_v35, %v1491_v63 }
 0xda3   :  { %v1528_v42 = vmul.f32 %v1526_v30, %v1525_v41  ;;  %v764_v30 = vsel %vm146_vm1, %v5333_v27, 0.0 }
 0xda5   :  { %v5297_v46 = vadd.f32 %v1529_v38, %v1528_v42 }
 0xda7   :  { %v1532_v47 = vpack.c.bf16 %v5297_v46, %v5295_v45 }
 0xda9   :  { %4092 = vmatmul.msk.bf16.vlgmr.msra.gmra.mxu0 %vm146_vm1, %v1532_v47 }
 0xe16   :  { %v1678_v49 = vpop.f32.mrf.mxu2 }
 0xe17   :  { %v1683_v51 = vmul.f32 0.35355338, %v1678_v49 }
 0xe19   :  { %v1685_v52 = vadd.f32 %v1683_v51, %v5013_v17 }
 0xe1b   :  { %v1687_v48 = vsel %vm457_vm5, %v1685_v52, -inf }
 0xe1c   :  { %1688 = vmax.xlane.f32.xlu0 %v1687_v48 }
 0xe1e   :  { %v1680_v53 = vpop.f32.mrf.mxu2 }
 0xe1f   :  { %v1684_v57 = vmul.f32 0.35355338, %v1680_v53 }
 0xe21   :  { %v1686_v58 = vadd.f32 %v1684_v57, %v5017_v23 }
 0xe23   :  { %v1690_v59 = vsel %vm461_vm7, %v1686_v58, -inf }
 0xe24   :  { %1691 = vmax.xlane.f32.xlu0 %v1690_v59 }
 0xe26   :  { %v1558_v60 = vpop.f32.mrf.mxu0 }
 0xe27   :  { %v1559_v61 = vadd.f32 %v1558_v60, %v1533_v29 }
 0xe29   :  { %v1563_v0 = vmax.f32 %v1559_v61, 0.0 }
 0xe2e   :  { %v1560_v62 = vpop.f32.mrf.mxu0 }
 0xe2f   :  { %v1561_v63 = vadd.f32 %v1560_v62, %v1533_v29 }
 0xe31   :  { %v1564_v1 = vmax.f32 %v1561_v63, 0.0 }
 0xe33   :  { %v1565_v2 = vpack.c.bf16 %v1564_v1, %v1563_v0 }
 0xe35   :  { %4109 = vmatmul.msk.bf16.vlgmr.msra.gmra.mxu1 %vm6413_vm2, %v1565_v2 }
 0xe45   :  { %4113 = vmatmul.msk.bf16.vlgmr.msrb.gmra.mxu1 %vm432_vm3, %v1758_v3 }
 0xe8f   :  { %v1689_v31 = vpop.xlane.xlu0 %1688 }
 0xe90   :  { %v1693_v6 = vsub.f32 %v1685_v52, %v1689_v31 }
 0xe92   :  { %v1695_v7 = vmul.f32 1.442695, %v1693_v6 }
 0xe94   :  { %4579 = vpow2.f32 %v1695_v7 }
 0xe97   :  { %v1692_v38 = vpop.xlane.xlu0 %1691 }
 0xe98   :  { %v1694_v47 = vsub.f32 %v1686_v58, %v1692_v38 }
 0xe9a   :  { %v5309_v8 = vpop.eup %4579  ;;  %v1697_v55 = vmul.f32 1.442695, %v1694_v47 }
 0xe9b   :  { %v1699_v12 = vsel %vm457_vm5, %v5309_v8, 0.0 }
 0xe9c   :  { %1700 = vadd.xlane.f32.xlu0 %v1699_v12 }
 0xeb2   :  { %v5313_v4 = vpop.f32.mrf.mxu1 }
 0xeba   :  { %v5315_v36 = vpop.f32.mrf.mxu1 }
 0xec2   :  { %v1776_v13 = vpop.f32.mrf.mxu1 }
 0xec3   :  { %v1781_v14 = vmul.f32 0.35355338, %v1776_v13 }
 0xec5   :  { %v1783_v15 = vadd.f32 %v1781_v14, %v5013_v17  ;;  %v4033_v14 = vld [vmem:[%s6402_s18 + $0x1c] sm:$0xf] }
 0xec7   :  { %v1785_v16 = vsel %vm457_vm5, %v1783_v15, -inf }
 0xec8   :  { %1786 = vmax.xlane.f32.xlu1 %v1785_v16  ;;  %v4032_v16 = vld [vmem:[%s6402_s18 + $0x18] sm:$0xf] }
 0xeca   :  { %v1778_v18 = vpop.f32.mrf.mxu1 }
 0xecb   :  { %v1782_v19 = vmul.f32 0.35355338, %v1778_v18  ;;  %v1738_v18 = vsel %vm6415_vm9, %v4032_v16, 0 }
 0xecc   :  { %1747 = vmatpush.bf16.msrb.mxu0 %v1738_v18 }
 0xecd   :  { %v1784_v21 = vadd.f32 %v1782_v19, %v5017_v23 }
 0xecf   :  { %v1788_v22 = vsel %vm461_vm7, %v1784_v21, -inf }
 0xed0   :  { %1789 = vmax.xlane.f32.xlu2 %v1788_v22 }
 0xee8   :  { %1711 = vrot.lane.b32.xlu2 %v5230_v37, %s4743_s9 }
 0xf0f   :  { %v1701_v58 = vpop.xlane.xlu0 %1700 }
 0xf11   :  { %765 = vadd.xlane.f32.xlu2 %v764_v30 }
 0xf3b   :  { %v1787_v33 = vpop.xlane.xlu1 %1786 }
 0xf3c   :  { %v1791_v34 = vsub.f32 %v1783_v15, %v1787_v33  ;;  %v1835_v15 = vsel %vm6415_vm9, %v4033_v14, 0  ;;  %v5360_v33 = vld [vmem:[%s6405_s21 + $0x18] sm:$0xff] }
 0xf3e   :  { %v1793_v35 = vmul.f32 1.442695, %v1791_v34  ;;  %v1754_v34 = vperm.slane %v5360_v33, 1 }
 0xf40   :  { %4581 = vpow2.f32 %v1793_v35 }
 0xf43   :  { %v1790_v40 = vpop.xlane.xlu2 %1789 }
 0xf44   :  { %v1792_v41 = vsub.f32 %v1784_v21, %v1790_v40 }
 0xf46   :  { %v4582_v42 = vpop.eup %4581  ;;  %v1795_v49 = vmul.f32 1.442695, %v1792_v41 }
 0xf47   :  { %v1797_v51 = vsel %vm457_vm5, %v4582_v42, 0.0 }
 0xf48   :  { %4583 = vpow2.f32 %v1795_v49  ;;  %1798 = vadd.xlane.f32.xlu0 %v1797_v51 }
 0xf49   :  { %4585 = vpow2.f32 %v1697_v55 }
 0xf4b   :  { %v1712_v50 = vpop.permute.xlu2 %1711 }
 0xf4c   :  { %v1717_v52 = vsel %vm6416_vm8, %v1712_v50, 0 }
 0xf4d   :  { %1726 = vmatpush.bf16.msra.mxu3 %v1717_v52 }
 0xf4e   :  { %v4584_v48 = vpop.eup %4583 }
 0xf4f   :  { %v1800_v53 = vsel %vm461_vm7, %v4584_v48, 0.0  ;;  %v4586_v57 = vpop.eup %4585 }
 0xf50   :  { %1801 = vadd.xlane.f32.xlu1 %v1800_v53  ;;  %v1702_v59 = vsel %vm461_vm7, %v4586_v57, 0.0 }
 0xf51   :  { %1844 = vmatpush.bf16.msrb.mxu3 %v1835_v15 }
 0xf58   :  { %1703 = vadd.xlane.f32.xlu1 %v1702_v59 }
 0xf5c   :  { %1808 = vrot.lane.b32.xlu0 %v5230_v37, %s4745_s3 }
 0xfbb   :  { %v1799_v60 = vpop.xlane.xlu0 %1798 }
 0xfc3   :  { %v1802_v29 = vpop.xlane.xlu1 %1801 }
 0xfc4   :  { %4587 = vrcp.f32 %v1802_v29 }
 0xfc5   :  { %4589 = vrcp.f32 %v1799_v60 }
 0xfc6   :  { %4591 = vrcp.f32 %v1701_v58  ;;  %v1566_v58 = vperm.slane %v5154_v56, 4 }
 0xfc8   :  { %v1606_v60 = vadd.f32 %v5315_v36, %v1566_v58  ;;  %v760_v36 = vadd.f32 %v5112_v20, %v720_v25 }
 0xfca   :  { %v4588_v61 = vpop.eup %4587 }
 0xfcb   :  { %v1704_v62 = vpop.xlane.xlu1 %1703  ;;  %v4590_v63 = vpop.eup %4589  ;;  %v1806_v0 = vmul.f32 %v4588_v61, %v4584_v48 }
 0xfcc   :  { %4593 = vrcp.f32 %v1704_v62  ;;  %v1805_v2 = vmul.f32 %v4590_v63, %v4582_v42  ;;  %v4592_v31 = vpop.eup %4591  ;;  %v766_v61 = vpop.xlane.xlu2 %765 }
 0xfcd   :  { %v1707_v37 = vmul.f32 %v4592_v31, %v5309_v8  ;;  %v770_v63 = vmul.f32 %v766_v61, %v5074_v5 }
 0xfce   :  { %v1809_v1 = vpop.permute.xlu0 %1808  ;;  %v1807_v6 = vpack.c.bf16 %v1806_v0, %v1805_v2 }
 0xfcf   :  { %v1814_v3 = vsel %vm6416_vm8, %v1809_v1, 0  ;;  %v5380_v1 = vadd.f32 %v1606_v60, %v5297_v46  ;;  %v5388_v2 = vsub.f32 %v5333_v27, %v770_v63  ;;  %v1093_v46 = vperm.slane %v5174_v32, 3 }
 0xfd0   :  { %1823 = vmatpush.bf16.msra.mxu2 %v1814_v3 }
 0xfd1   :  { %v1613_v3 = vsel %vm6414_vm10, %v5380_v1, 0.0  ;;  %v1131_v20 = vadd.f32 %v5268_v11, %v1093_v46  ;;  %v1133_v32 = vadd.f32 %v5270_v28, %v1093_v46  ;;  %v1604_v11 = vadd.f32 %v5313_v4, %v1566_v58  ;;  %v4452_v28 = vld [vmem:[%s6403_s19 + $0x38] sm:$0xff]  ;;  %v4451_v4 = vld [vmem:[%s6403_s19 + $0x30] sm:$0xff]  ;;  %v4457_v46 = vld [vmem:[%s6404_s20 + $0x60] sm:$0xff] }
 0xfd2   :  { %v4594_v7 = vpop.eup %4593  ;;  %1928 = vmatpush.bf16.msra.mxu0 %v4452_v28 }
 0xfd3   :  { %v1708_v12 = vmul.f32 %v4594_v7, %v4586_v57  ;;  %4114 = vmatmul.msk.bf16.vlgmr.msra.gmra.mxu2 %vm457_vm5, %v1807_v6  ;;  %v5395_v6 = vadd.f32 %v760_v36, %v5093_v54  ;;  %v774_v7 = vmul.f32 %v5388_v2, %v5388_v2  ;;  %v5413_v14 = vadd.f32 %v1604_v11, %v5295_v45  ;;  %v4459_v36 = vld [vmem:[%s6404_s20 + $0x70] sm:$0xff] }
 0xfd5   :  { %v1709_v13 = vpack.c.bf16 %v1708_v12, %v1707_v37  ;;  %v767_v25 = vsel %vm6414_vm10, %v5395_v6, 0.0  ;;  %v776_v27 = vsel %vm146_vm1, %v774_v7, 0.0  ;;  %v5404_v37 = vadd.f32 %v1131_v20, %v5193_v43  ;;  %v2121_v7 = vld [vmem:[%s6431_s11] sm:$0xff]  ;;  %v2122_v20 = vld [vmem:[%s6431_s11 + $0x8] sm:$0xf] }
 0xfd6   :  { %v1136_v12 = vadd.f32 %v1133_v32, %v5195_v44  ;;  %v1610_v43 = vsel %vm146_vm1, %v5413_v14, 0.0  ;;  %1929 = vmatpush.bf16.msra.mxu0 %v4451_v4  ;;  %v1906_v32 = vperm.slane %v5360_v33, 2 }
 0xfd7   :  { %4111 = vmatmul.msk.bf16.vlgmr.msra.gmra.mxu3 %vm457_vm5, %v1709_v13  ;;  %v1137_v54 = vsel %vm146_vm1, %v5404_v37, 0.0 }
 0xfd8   :  { %v1140_v13 = vsel %vm6414_vm10, %v1136_v12, 0.0 }
0x1056   :  { %v1825_v8 = vpop.f32.mrf.mxu2 }
0x105a   :  { %v1728_v19 = vpop.f32.mrf.mxu3 }
0x105e   :  { %v1827_v21 = vpop.f32.mrf.mxu2 }
0x105f   :  { %v1830_v22 = vpack.c.bf16 %v1827_v21, %v1825_v8 }
0x1061   :  { %4115 = vmatmul.msk.bf16.vlgmr.msrb.gmra.mxu3 %vm432_vm3, %v1830_v22 }
0x1062   :  { %v1730_v26 = vpop.f32.mrf.mxu3 }
0x1063   :  { %v1733_v30 = vpack.c.bf16 %v1730_v26, %v1728_v19 }
0x1065   :  { %4112 = vmatmul.msk.bf16.vlgmr.msrb.gmra.mxu0 %vm432_vm3, %v1733_v30 }
0x10e2   :  { %v1749_v35 = vpop.f32.mrf.mxu0 }
0x10e3   :  { %v1755_v38 = vadd.f32 %v1754_v34, %v1749_v35 }
0x10e4   :  { %v1846_v40 = vpop.f32.mrf.mxu3 }
0x10e5   :  { %v1851_v41 = vadd.f32 %v1846_v40, %v1755_v38 }
0x10e7   :  { %v1853_v42 = vadd.f32 %v1851_v41, %v4999_v9 }
0x10e9   :  { %v1855_v47 = vsel %vm146_vm1, %v1853_v42, 0.0 }
0x10ea   :  { %1856 = vadd.xlane.f32.xlu1 %v1855_v47  ;;  %v1751_v49 = vpop.f32.mrf.mxu0 }
0x10eb   :  { %v1756_v51 = vadd.f32 %v1754_v34, %v1751_v49 }
0x10ec   :  { %v1848_v55 = vpop.f32.mrf.mxu3 }
0x10ed   :  { %v1852_v50 = vadd.f32 %v1848_v55, %v1756_v51  ;;  %v1899_v55 = vperm.slane %v5360_v33, 4 }
0x10ef   :  { %v1854_v52 = vadd.f32 %v1852_v50, %v5001_v10 }
0x10f1   :  { %v1858_v48 = vsel %vm6414_vm10, %v1854_v52, 0.0 }
0x10f2   :  { %1859 = vadd.xlane.f32.xlu1 %v1858_v48 }
0x115d   :  { %v1857_v53 = vpop.xlane.xlu1 %1856 }
0x115e   :  { %v1861_v57 = vmul.f32 %v1857_v53, %v5074_v5  ;;  %v1902_v53 = vperm.slane %v5360_v33, 5 }
0x1160   :  { %v5368_v59 = vsub.f32 %v1853_v42, %v1861_v57 }
0x1162   :  { %v1865_v9 = vmul.f32 %v5368_v59, %v5368_v59 }
0x1164   :  { %v1867_v29 = vsel %vm146_vm1, %v1865_v9, 0.0 }
0x1165   :  { %1868 = vadd.xlane.f32.xlu0 %v1867_v29  ;;  %v1860_v10 = vpop.xlane.xlu1 %1859 }
0x1166   :  { %v1862_v62 = vmul.f32 %v1860_v10, %v5074_v5 }
0x1168   :  { %v5377_v0 = vsub.f32 %v1854_v52, %v1862_v62 }
0x116a   :  { %v1866_v56 = vmul.f32 %v5377_v0, %v5377_v0 }
0x116c   :  { %v1870_v31 = vsel %vm6414_vm10, %v1866_v56, 0.0 }
0x116d   :  { %1614 = vadd.xlane.f32.xlu0 %v1613_v3  ;;  %1871 = vadd.xlane.f32.xlu1 %v1870_v31  ;;  %v4458_v3 = vld [vmem:[%s6404_s20 + $0x68] sm:$0xff]  ;;  %v4467_v31 = vld [vmem:[%s6398_s14] sm:$0xff] }
0x116e   :  { %2143 = vmatpush.bf16.msrb.mxu0 %v4467_v31 }
0x1175   :  { %768 = vadd.xlane.f32.xlu1 %v767_v25  ;;  %777 = vadd.xlane.f32.xlu0 %v776_v27  ;;  %v2125_v25 = vpack.c.bf16 %v2122_v20, %v2121_v7 }
0x117d   :  { %1138 = vadd.xlane.f32.xlu1 %v1137_v54 }
0x1185   :  { %1141 = vadd.xlane.f32.xlu1 %v1140_v13 }
0x118d   :  { %1611 = vadd.xlane.f32.xlu1 %v1610_v43 }
0x11d8   :  { %v1869_v15 = vpop.xlane.xlu0 %1868 }
0x11d9   :  { %v1873_v44 = vmul.f32 %v1869_v15, %v5074_v5  ;;  %v5467_v15 = vld [vmem:[%s6399_s15] sm:$0x3] }
0x11da   :  { %v2126_v4 = vperm.slane %v5467_v15, 1 }
0x11db   :  { %v1875_v16 = vadd.f32 1e-05, %v1873_v44 }
0x11dd   :  { %4595 = vrsqrt.f32 %v1875_v16  ;;  %vm1883_vm6 = vweird.f32 %v1875_v16 }
0x11e0   :  { %v1872_v45 = vpop.xlane.xlu1 %1871 }
0x11e1   :  { %v1874_v18 = vmul.f32 %v1872_v45, %v5074_v5 }
0x11e3   :  { %v4596_v8 = vpop.eup %4595  ;;  %v1876_v19 = vadd.f32 1e-05, %v1874_v18 }
0x11e4   :  { %v1878_v21 = vmul.f32 %v4596_v8, %v1875_v16  ;;  %vm1884_vm4 = vweird.f32 %v4596_v8  ;;  %v4469_v16 = vld [vmem:[%s6400_s16 + $0x28] sm:$0xff] }
0x11e5   :  { %4597 = vrsqrt.f32 %v1876_v19  ;;  %vm1885_vm11 = vmor %vm1883_vm6, %vm1884_vm4  ;;  %vm1893_vm13 = vweird.f32 %v1876_v19 }
0x11e6   :  { %v1879_v22 = vmul.f32 %v4596_v8, %v1878_v21 }
0x11e8   :  { %v1880_v26 = vmul.f32 0.5, %v1879_v22  ;;  %v5425_v30 = vpop.xlane.xlu1 %768  ;;  %v1939_v22 = vperm.slane %v5360_v33, 3 }
0x11ea   :  { %v1881_v34 = vsub.f32 1.5, %v1880_v26 }
0x11eb   :  { %v4598_v35 = vpop.eup %4597 }
0x11ec   :  { %v1882_v38 = vmul.f32 %v4596_v8, %v1881_v34  ;;  %v1888_v40 = vmul.f32 %v4598_v35, %v1876_v19  ;;  %vm1894_vm12 = vweird.f32 %v4598_v35  ;;  %v771_v34 = vmul.f32 %v5425_v30, %v5074_v5 }
0x11ed   :  { %vm1895_vm14 = vmor %vm1893_vm13, %vm1894_vm12 }
0x11ee   :  { %v1889_v41 = vmul.f32 %v4598_v35, %v1888_v40  ;;  %v1886_v42 = vsel %vm1885_vm11, %v4596_v8, %v1882_v38  ;;  %v4468_v8 = vld [vmem:[%s6400_s16 + $0x20] sm:$0xff]  ;;  %v5490_v40 = vsub.f32 %v5395_v6, %v771_v34 }
0x11ef   :  { %v1897_v50 = vmul.f32 %v1886_v42, %v5368_v59 }
0x11f0   :  { %v1890_v47 = vmul.f32 0.5, %v1889_v41  ;;  %v5427_v49 = vpop.xlane.xlu1 %1138 }
0x11f1   :  { %v1900_v57 = vmul.f32 %v1899_v55, %v1897_v50 }
0x11f2   :  { %v1891_v51 = vsub.f32 1.5, %v1890_v47 }
0x11f3   :  { %v1903_v61 = vadd.f32 %v1902_v53, %v1900_v57 }
0x11f4   :  { %v1892_v52 = vmul.f32 %v4598_v35, %v1891_v51  ;;  %v1143_v51 = vmul.f32 %v5427_v49, %v5074_v5 }
0x11f6   :  { %v1896_v48 = vsel %vm1895_vm14, %v4598_v35, %v1892_v52  ;;  %v775_v52 = vmul.f32 %v5490_v40, %v5490_v40 }
0x11f7   :  { %v1898_v58 = vmul.f32 %v1896_v48, %v5377_v0  ;;  %v4460_v0 = vld [vmem:[%s6404_s20 + $0x78] sm:$0xff]  ;;  %v5499_v48 = vsub.f32 %v5404_v37, %v1143_v51 }
0x11f8   :  { %v1142_v9 = vpop.xlane.xlu1 %1141  ;;  %1971 = vmatpush.bf16.msra.mxu1 %v4460_v0  ;;  %v779_v57 = vsel %vm6414_vm10, %v775_v52, 0.0 }
0x11f9   :  { %v1901_v60 = vmul.f32 %v1899_v55, %v1898_v58  ;;  %v1144_v29 = vmul.f32 %v1142_v9, %v5074_v5  ;;  %v1615_v58 = vpop.xlane.xlu0 %1614  ;;  %v1147_v9 = vmul.f32 %v5499_v48, %v5499_v48 }
0x11fa   :  { %v1617_v49 = vmul.f32 %v1615_v58, %v5074_v5 }
0x11fb   :  { %v1904_v10 = vadd.f32 %v1902_v53, %v1901_v60  ;;  %v5434_v62 = vsub.f32 %v1136_v12, %v1144_v29 }
0x11fc   :  { %1972 = vmatpush.bf16.msra.mxu1 %v4459_v36  ;;  %v5512_v37 = vsub.f32 %v5380_v1, %v1617_v49 }
0x11fd   :  { %v1905_v63 = vpack.c.bf16 %v1904_v10, %v1903_v61  ;;  %v1148_v59 = vmul.f32 %v5434_v62, %v5434_v62 }
0x11ff   :  { %4124 = vmatmul.msk.bf16.vlgmr.msra.gmra.mxu0 %vm146_vm1, %v1905_v63  ;;  %v1152_v56 = vsel %vm6414_vm10, %v1148_v59, 0.0  ;;  %v5522_v59 = vld [vmem:[%s6405_s21 + $0x20] sm:$0xff] }
0x1200   :  { %1153 = vadd.xlane.f32.xlu0 %v1152_v56  ;;  %1973 = vmatpush.bf16.msra.mxu1 %v4458_v3  ;;  %v1612_v42 = vpop.xlane.xlu1 %1611  ;;  %v2195_v1 = vperm.slane %v5522_v59, 0 }
0x1201   :  { %v1616_v55 = vmul.f32 %v1612_v42, %v5074_v5 }
0x1203   :  { %v5502_v6 = vsub.f32 %v5413_v14, %v1616_v55  ;;  %v1149_v14 = vsel %vm146_vm1, %v1147_v9, 0.0 }
0x1204   :  { %1974 = vmatpush.bf16.msra.mxu1 %v4457_v46 }
0x1205   :  { %v1620_v60 = vmul.f32 %v5502_v6, %v5502_v6 }
0x1207   :  { %v1622_v29 = vsel %vm146_vm1, %v1620_v60, 0.0 }
0x1208   :  { %2217 = vmatpush.bf16.msrb.mxu1 %v4469_v16 }
0x120c   :  { %2218 = vmatpush.bf16.msrb.mxu1 %v4468_v8 }
0x120f   :  { %4172 = vmatmul.msk.bf16.vlgmr.msrb.gmra.mxu0 %vm108_vm0, %v2125_v25 }
0x127c   :  { %v1931_v27 = vpop.f32.mrf.mxu0 }
0x127d   :  { %v1932_v54 = vadd.f32 %v1931_v27, %v1906_v32 }
0x127f   :  { %v1936_v13 = vmax.f32 %v1932_v54, 0.0 }
0x1284   :  { %v1933_v12 = vpop.f32.mrf.mxu0 }
0x1285   :  { %v1934_v11 = vadd.f32 %v1933_v12, %v1906_v32 }
0x1287   :  { %v1937_v43 = vmax.f32 %v1934_v11, 0.0 }
0x1289   :  { %v1938_v28 = vpack.c.bf16 %v1937_v43, %v1936_v13  ;;  %v4464_v13 = vld [vmem:[%s6396_s12 + $0x18] sm:$0xff]  ;;  %v4463_v43 = vld [vmem:[%s6396_s12 + $0x10] sm:$0xff] }
0x128a   :  { %2108 = vmatpush.bf16.msra.mxu3 %v4464_v13 }
0x128b   :  { %4141 = vmatmul.msk.bf16.vlgmr.msra.gmra.mxu1 %vm6413_vm2, %v1938_v28  ;;  %v778_v28 = vpop.xlane.xlu0 %777 }
0x128c   :  { %v2145_v44 = vpop.f32.mrf.mxu0 }
0x128d   :  { %v5473_v45 = vadd.f32 %v2145_v44, %v2126_v4 }
0x128e   :  { %2109 = vmatpush.bf16.msra.mxu3 %v4463_v43 }
0x1293   :  { %v1154_v8 = vpop.xlane.xlu0 %1153 }
0x1294   :  { %v2147_v18 = vpop.f32.mrf.mxu0  ;;  %v1156_v34 = vmul.f32 %v1154_v8, %v5074_v5 }
0x1295   :  { %v5478_v19 = vadd.f32 %v2147_v18, %v2126_v4  ;;  %v4462_v4 = vld [vmem:[%s6396_s12 + $0x8] sm:$0xff]  ;;  %v4461_v18 = vld [vmem:[%s6396_s12] sm:$0xff] }
0x1296   :  { %2110 = vmatpush.bf16.msra.mxu3 %v4462_v4  ;;  %v5566_v51 = vadd.f32 1e-05, %v1156_v34 }
0x1297   :  { %v5482_v21 = vpack.c.bf16 %v5478_v19, %v5473_v45 }
0x129a   :  { %2111 = vmatpush.bf16.msra.mxu3 %v4461_v18 }
0x129b   :  { %4219 = vmatmul.msk.bf16.vlgmr.msrb.gmra.mxu1 %vm146_vm1, %v5482_v21 }
0x129d   :  { %4167 = vmatmul.msk.bf16.vlgmr.msra.gmra.mxu3 %vm6413_vm2, %v4957_v39 }
0x1308   :  { %v1976_v26 = vpop.f32.mrf.mxu1 }
0x1309   :  { %v1977_v35 = vadd.f32 %v1976_v26, %v1939_v22 }
0x130b   :  { %v1981_v38 = vadd.f32 %v1977_v35, %v1903_v61  ;;  %v1621_v61 = vmul.f32 %v5512_v37, %v5512_v37 }
0x130d   :  { %v1983_v41 = vsel %vm146_vm1, %v1981_v38, 0.0 }
0x130e   :  { %1984 = vadd.xlane.f32.xlu1 %v1983_v41 }
0x1310   :  { %v1978_v47 = vpop.f32.mrf.mxu1 }
0x1311   :  { %v1979_v50 = vadd.f32 %v1978_v47, %v1939_v22  ;;  %v782_v22 = vmul.f32 %v778_v28, %v5074_v5 }
0x1313   :  { %v1982_v30 = vadd.f32 %v1979_v50, %v1904_v10  ;;  %v1625_v10 = vsel %vm6414_vm10, %v1621_v61, 0.0  ;;  %v5563_v42 = vadd.f32 1e-05, %v782_v22 }
0x1315   :  { %v1986_v53 = vsel %vm6414_vm10, %v1982_v30, 0.0  ;;  %4599 = vrsqrt.f32 %v5563_v42  ;;  %vm792_vm15 = vweird.f32 %v5563_v42 }
0x1316   :  { %1987 = vadd.xlane.f32.xlu2 %v1986_v53  ;;  %780 = vadd.xlane.f32.xlu1 %v779_v57  ;;  %4601 = vrsqrt.f32 %v5566_v51 }
0x1318   :  { %v2220_v63 = vpop.f32.mrf.mxu1 }
0x1319   :  { %v2221_v56 = vadd.f32 %v2220_v63, %v2195_v1 }
0x131b   :  { %v5583_v53 = vpop.eup %4599 }
0x131c   :  { %v5585_v57 = vpop.eup %4601  ;;  %vm793_vm0 = vweird.f32 %v5583_v53 }
0x131d   :  { %vm1176_vm6 = vweird.f32 %v5585_v57  ;;  %vm5634_vm12 = vmor %vm792_vm15, %vm793_vm0 }
0x131e   :  { %1150 = vadd.xlane.f32.xlu2 %v1149_v14  ;;  %1623 = vadd.xlane.f32.xlu1 %v1622_v29  ;;  %v787_v14 = vmul.f32 %v5583_v53, %v5563_v42 }
0x1320   :  { %v2222_v0 = vpop.f32.mrf.mxu1 }
0x1321   :  { %v2223_v36 = vadd.f32 %v2222_v0, %v2195_v1 }
0x1323   :  { %v5525_v3 = vpack.c.bf16 %v2223_v36, %v2221_v56  ;;  %v1170_v56 = vmul.f32 %v5585_v57, %v5566_v51 }
0x1326   :  { %1626 = vadd.xlane.f32.xlu2 %v1625_v10 }
0x133e   :  { %2355 = vrot.lane.b32.xlu2 %v5525_v3, %s4745_s3 }
0x1381   :  { %v1985_v31 = vpop.xlane.xlu1 %1984 }
0x1382   :  { %v1989_v46 = vmul.f32 %v1985_v31, %v5074_v5  ;;  %v4466_v31 = vld [vmem:[%s6432_s28 + $0x8] sm:$0xff] }
0x1383   :  { %2072 = vmatpush.bf16.msrb.mxu2 %v4466_v31 }
0x1384   :  { %v5530_v7 = vsub.f32 %v1981_v38, %v1989_v46  ;;  %v788_v46 = vmul.f32 %v5583_v53, %v787_v14 }
0x1386   :  { %v1993_v20 = vmul.f32 %v5530_v7, %v5530_v7  ;;  %v789_v13 = vmul.f32 0.5, %v788_v46 }
0x1388   :  { %v1995_v25 = vsel %vm146_vm1, %v1993_v20, 0.0  ;;  %v790_v34 = vsub.f32 1.5, %v789_v13 }
0x1389   :  { %1996 = vadd.xlane.f32.xlu0 %v1995_v25  ;;  %v1988_v27 = vpop.xlane.xlu2 %1987  ;;  %v781_v44 = vpop.xlane.xlu1 %780  ;;  %v4465_v25 = vld [vmem:[%s6432_s28] sm:$0xff] }
0x138a   :  { %v1990_v32 = vmul.f32 %v1988_v27, %v5074_v5  ;;  %v783_v35 = vmul.f32 %v781_v44, %v5074_v5  ;;  %2073 = vmatpush.bf16.msrb.mxu2 %v4465_v25 }
0x138c   :  { %v5536_v54 = vsub.f32 %v1982_v30, %v1990_v32  ;;  %v5569_v50 = vadd.f32 1e-05, %v783_v35 }
0x138e   :  { %v1994_v12 = vmul.f32 %v5536_v54, %v5536_v54  ;;  %4603 = vrsqrt.f32 %v5569_v50  ;;  %vm802_vm13 = vweird.f32 %v5569_v50 }
0x1390   :  { %v1998_v11 = vsel %vm6414_vm10, %v1994_v12, 0.0  ;;  %v1171_v12 = vmul.f32 %v5585_v57, %v1170_v56 }
0x1391   :  { %1999 = vadd.xlane.f32.xlu1 %v1998_v11  ;;  %v1151_v16 = vpop.xlane.xlu2 %1150  ;;  %v1624_v26 = vpop.xlane.xlu1 %1623 }
0x1392   :  { %v1628_v41 = vmul.f32 %v1624_v26, %v5074_v5  ;;  %v1155_v47 = vmul.f32 %v1151_v16, %v5074_v5  ;;  %v1172_v8 = vmul.f32 0.5, %v1171_v12 }
0x1394   :  { %v5571_v52 = vadd.f32 1e-05, %v1628_v41  ;;  %v5574_v39 = vadd.f32 1e-05, %v1155_v47  ;;  %v5587_v58 = vpop.eup %4603  ;;  %v1173_v14 = vsub.f32 1.5, %v1172_v8  ;;  %v4712_v8 = vld [vmem:[%s6405_s21 + $0x10] sm:$0xff] }
0x1395   :  { %v797_v61 = vmul.f32 %v5587_v58, %v5569_v50  ;;  %vm803_vm4 = vweird.f32 %v5587_v58 }
0x1396   :  { %4605 = vrsqrt.f32 %v5571_v52  ;;  %vm1638_vm14 = vweird.f32 %v5571_v52  ;;  %vm5642_vm10 = vmor %vm802_vm13, %vm803_vm4  ;;  %vm1165_vm9 = vweird.f32 %v5574_v39 }
0x1397   :  { %4607 = vrsqrt.f32 %v5574_v39  ;;  %v798_v20 = vmul.f32 %v5587_v58, %v797_v61  ;;  %v791_v61 = vmul.f32 %v5583_v53, %v790_v34 }
0x1399   :  { %v1627_v38 = vpop.xlane.xlu2 %1626  ;;  %v799_v28 = vmul.f32 0.5, %v798_v20  ;;  %v1174_v20 = vmul.f32 %v5585_v57, %v1173_v14 }
0x139a   :  { %v1629_v55 = vmul.f32 %v1627_v38, %v5074_v5 }
0x139b   :  { %v800_v38 = vsub.f32 1.5, %v799_v28 }
0x139c   :  { %v5577_v30 = vadd.f32 1e-05, %v1629_v55  ;;  %v5589_v49 = vpop.eup %4605 }
0x139d   :  { %2258 = vrot.lane.b32.xlu0 %v5525_v3, %s4743_s9  ;;  %v5591_v9 = vpop.eup %4607  ;;  %v1633_v63 = vmul.f32 %v5589_v49, %v5571_v52  ;;  %vm1639_vm11 = vweird.f32 %v5589_v49 }
0x139e   :  { %4609 = vrsqrt.f32 %v5577_v30  ;;  %v1160_v1 = vmul.f32 %v5591_v9, %v5574_v39  ;;  %vm1166_vm2 = vweird.f32 %v5591_v9  ;;  %vm5649_vm15 = vmor %vm1638_vm14, %vm1639_vm11  ;;  %vm1175_vm11 = vweird.f32 %v5566_v51 }
0x139f   :  { %v1634_v27 = vmul.f32 %v5589_v49, %v1633_v63  ;;  %vm5656_vm13 = vmor %vm1165_vm9, %vm1166_vm2  ;;  %vm1648_vm14 = vweird.f32 %v5577_v30 }
0x13a0   :  { %v1161_v32 = vmul.f32 %v5591_v9, %v1160_v1  ;;  %v801_v1 = vmul.f32 %v5587_v58, %v800_v38  ;;  %vm5671_vm9 = vmor %vm1175_vm11, %vm1176_vm6  ;;  %vm6449_vm11 = vcmask 257024  }
0x13a1   :  { %v1635_v4 = vmul.f32 0.5, %v1634_v27  ;;  %v2356_v13 = vpop.permute.xlu2 %2355 }
0x13a2   :  { %v1162_v16 = vmul.f32 0.5, %v1161_v32  ;;  %v805_v39 = vsel %vm5642_vm10, %v5587_v58, %v801_v1 }
0x13a3   :  { %v1636_v41 = vsub.f32 1.5, %v1635_v4  ;;  %v808_v4 = vperm.slane %v5326_v24, 7 }
0x13a4   :  { %v5593_v60 = vpop.eup %4609  ;;  %v1163_v47 = vsub.f32 1.5, %v1162_v16 }
0x13a5   :  { %v1643_v0 = vmul.f32 %v5593_v60, %v5577_v30  ;;  %v1637_v56 = vmul.f32 %v5589_v49, %v1636_v41  ;;  %vm1649_vm4 = vweird.f32 %v5593_v60  ;;  %v795_v30 = vsel %vm5634_vm12, %v5583_v53, %v791_v61 }
0x13a6   :  { %v806_v34 = vmul.f32 %v795_v30, %v5388_v2  ;;  %v2030_v41 = vperm.slane %v5360_v33, 7 }
0x13a7   :  { %v1644_v11 = vmul.f32 %v5593_v60, %v1643_v0  ;;  %v1164_v0 = vmul.f32 %v5591_v9, %v1163_v47 }
0x13a8   :  { %v809_v61 = vmul.f32 %v808_v4, %v806_v34 }
0x13a9   :  { %v1645_v22 = vmul.f32 0.5, %v1644_v11  ;;  %v1168_v51 = vsel %vm5656_vm13, %v5591_v9, %v1164_v0  ;;  %v1178_v9 = vsel %vm5671_vm9, %v5585_v57, %v1174_v20  ;;  %v4713_v57 = vld [vmem:[%s6405_s21 + $0x8] sm:$0xff] }
0x13aa   :  { %2353 = vrot.lane.b32.xlu1 %v5525_v3, %s4744_s10  ;;  %v1179_v24 = vmul.f32 %v1168_v51, %v5499_v48  ;;  %v1657_v48 = vperm.slane %v5360_v33, 0  ;;  %v2361_v51 = vsel %vm432_vm3, %v2356_v13, 0 }
0x13fc   :  { %v1997_v29 = vpop.xlane.xlu0 %1996 }
0x13fd   :  { %v2001_v10 = vmul.f32 %v1997_v29, %v5074_v5  ;;  %v1646_v29 = vsub.f32 1.5, %v1645_v22  ;;  %v1654_v22 = vperm.slane %v4712_v8, 7 }
0x13ff   :  { %v5608_v36 = vadd.f32 1e-05, %v2001_v10  ;;  %v1647_v50 = vmul.f32 %v5593_v60, %v1646_v29  ;;  %v811_v29 = vperm.slane %v4713_v57, 0 }
0x1401   :  { %4611 = vrsqrt.f32 %v5608_v36  ;;  %vm2011_vm8 = vweird.f32 %v5608_v36  ;;  %v812_v20 = vadd.f32 %v811_v29, %v809_v61 }
0x1404   :  { %v2000_v43 = vpop.xlane.xlu1 %1999 }
0x1405   :  { %v2002_v44 = vmul.f32 %v2000_v43, %v5074_v5 }
0x1407   :  { %v4612_v18 = vpop.eup %4611  ;;  %v5624_v26 = vadd.f32 1e-05, %v2002_v44  ;;  %v2027_v44 = vperm.slane %v5360_v33, 6 }
0x1408   :  { %v2006_v35 = vmul.f32 %v4612_v18, %v5608_v36  ;;  %vm2012_vm0 = vweird.f32 %v4612_v18  ;;  %v1641_v36 = vsel %vm5649_vm15, %v5589_v49, %v1637_v56 }
0x1409   :  { %4613 = vrsqrt.f32 %v5624_v26  ;;  %vm2013_vm2 = vmor %vm2011_vm8, %vm2012_vm0  ;;  %vm2021_vm6 = vweird.f32 %v5624_v26  ;;  %vm6445_vm0 = vcmask 1045504  }
0x140a   :  { %v2007_v55 = vmul.f32 %v4612_v18, %v2006_v35  ;;  %vm5686_vm8 = vmor %vm1648_vm14, %vm1649_vm4  ;;  %v1181_v35 = vperm.slane %v4713_v57, 6  ;;  %vm6447_vm4 = vcmask 1043456  }
0x140b   :  { %v1651_v53 = vsel %vm5686_vm8, %v5593_v60, %v1647_v50  ;;  %vm6446_vm15 = vmmov %vm6445_vm0 }
0x140c   :  { %v2008_v10 = vmul.f32 0.5, %v2007_v55  ;;  %v1653_v38 = vmul.f32 %v1651_v53, %v5512_v37  ;;  %v1182_v14 = vmul.f32 %v1181_v35, %v1179_v24  ;;  %v2118_v53 = vperm.slane %v5467_v15, 0  ;;  %vm6448_vm13 = vmmov %vm6447_vm4 }
0x140d   :  { %vm6450_vm14 = vmmov %vm6449_vm11 }
0x140e   :  { %v2009_v31 = vsub.f32 1.5, %v2008_v10  ;;  %v1656_v63 = vmul.f32 %v1654_v22, %v1653_v38 }
0x140f   :  { %v4614_v46 = vpop.eup %4613  ;;  %v2259_v52 = vpop.permute.xlu0 %2258 }
0x1410   :  { %v2010_v32 = vmul.f32 %v4612_v18, %v2009_v31  ;;  %v2016_v12 = vmul.f32 %v4614_v46, %v5624_v26  ;;  %v2264_v11 = vsel %vm432_vm3, %v2259_v52, 0  ;;  %vm2022_vm10 = vweird.f32 %v4614_v46 }
0x1411   :  { %2273 = vmatpush.bf16.xpose.msrb.mxu3 %v2264_v11  ;;  %vm2023_vm12 = vmor %vm2021_vm6, %vm2022_vm10  ;;  %v1659_v50 = vadd.f32 %v1657_v48, %v1656_v63 }
0x1412   :  { %v2014_v58 = vsel %vm2013_vm2, %v4612_v18, %v2010_v32  ;;  %v2017_v43 = vmul.f32 %v4614_v46, %v2016_v12  ;;  %v807_v18 = vmul.f32 %v805_v39, %v5490_v40  ;;  %v1180_v40 = vmul.f32 %v1178_v9, %v5434_v62 }
0x1413   :  { %v2025_v49 = vmul.f32 %v2014_v58, %v5530_v7  ;;  %v1652_v7 = vmul.f32 %v1641_v36, %v5502_v6  ;;  %v1184_v62 = vperm.slane %v4713_v57, 7  ;;  %v4470_v36 = vld [vmem:[%s6401_s17 + $0x20] sm:$0xff]  ;;  %v2113_v58 = vpop.f32.mrf.mxu3  ;;  %v2226_v57 = vperm.slane %v5522_v59, 1 }
0x1414   :  { %v2018_v16 = vmul.f32 0.5, %v2017_v43  ;;  %v810_v2 = vmul.f32 %v808_v4, %v807_v18  ;;  %v1183_v37 = vmul.f32 %v1181_v35, %v1180_v40 }
0x1415   :  { %v2028_v47 = vmul.f32 %v2027_v44, %v2025_v49  ;;  %v1655_v6 = vmul.f32 %v1654_v22, %v1652_v7  ;;  %v1185_v0 = vadd.f32 %v1184_v62, %v1182_v14 }
0x1416   :  { %v2019_v60 = vsub.f32 1.5, %v2018_v16  ;;  %v813_v56 = vadd.f32 %v811_v29, %v810_v2  ;;  %v1186_v25 = vadd.f32 %v1184_v62, %v1183_v37 }
0x1417   :  { %v2031_v1 = vadd.f32 %v2030_v41, %v2028_v47  ;;  %v1658_v26 = vadd.f32 %v1657_v48, %v1655_v6  ;;  %v1187_v32 = vadd.f32 %v1185_v0, %v812_v20 }
0x1418   :  { %v2020_v55 = vmul.f32 %v4614_v46, %v2019_v60  ;;  %4229 = vmatmul.msk.bf16.vlgmr.msrb.gmra.mxu3 %vm432_vm3, %v5525_v3  ;;  %v1188_v27 = vadd.f32 %v1186_v25, %v813_v56 }
0x1419   :  { %v2033_v33 = vadd.f32 %v2031_v1, %v1658_v26 }
0x141a   :  { %v2024_v10 = vsel %vm2023_vm12, %v4614_v46, %v2020_v55 }
0x141b   :  { %v2026_v42 = vmul.f32 %v2024_v10, %v5536_v54  ;;  %v2035_v11 = vadd.f32 %v2033_v33, %v1187_v32  ;;  %v4471_v54 = vld [vmem:[%s6401_s17 + $0x28] sm:$0xff]  ;;  %v2115_v43 = vpop.f32.mrf.mxu3 }
0x141c   :  { %2248 = vmatpush.bf16.msra.mxu2 %v4471_v54  ;;  %v2354_v24 = vpop.permute.xlu1 %2353 }
0x141d   :  { %v2029_v31 = vmul.f32 %v2027_v44, %v2026_v42 }
0x141f   :  { %v2032_v52 = vadd.f32 %v2030_v41, %v2029_v31 }
0x1420   :  { %2249 = vmatpush.bf16.msra.mxu2 %v4470_v36 }
0x1421   :  { %v2034_v12 = vadd.f32 %v2032_v52, %v1659_v50 }
0x1423   :  { %v2036_v39 = vadd.f32 %v2034_v12, %v1188_v27 }
0x1425   :  { %v2050_v46 = vpack.c.bf16 %v2036_v39, %v2035_v11 }
0x1427   :  { %4150 = vmatmul.msk.bf16.vlgmr.msrb.gmra.mxu2 %vm146_vm1, %v2050_v46 }
0x1428   :  { %2370 = vmatpush.bf16.xpose.msrb.mxu2 %v2361_v51 }
0x149b   :  { %v2275_v30 = vpop.f32.mrf.mxu3 }
0x149c   :  { %v2280_v28 = vmul.f32 0.35355338, %v2275_v30  ;;  %v4478_v30 = vld [vmem:[%s6404_s20 + $0x90] sm:$0xff] }
0x149e   :  { %v2282_v44 = vadd.f32 %v2280_v28, %v5013_v17  ;;  %v4477_v28 = vld [vmem:[%s6404_s20 + $0x88] sm:$0xff] }
0x14a0   :  { %v2284_v49 = vsel %vm457_vm5, %v2282_v44, -inf }
0x14a1   :  { %2285 = vmax.xlane.f32.xlu1 %v2284_v49  ;;  %v4476_v49 = vld [vmem:[%s6404_s20 + $0x80] sm:$0xff] }
0x14a3   :  { %v2277_v55 = vpop.f32.mrf.mxu3 }
0x14a4   :  { %v2281_v6 = vmul.f32 0.35355338, %v2277_v55 }
0x14a6   :  { %v2283_v10 = vadd.f32 %v2281_v6, %v5017_v23  ;;  %v4181_v6 = vld [vmem:[%s6402_s18 + $0x20] sm:$0xf] }
0x14a8   :  { %v2287_v63 = vsel %vm461_vm7, %v2283_v10, -inf }
0x14aa   :  { %v2075_v4 = vpop.f32.mrf.mxu2 }
0x14ab   :  { %v2114_v9 = vadd.f32 %v2113_v58, %v2075_v4  ;;  %v4479_v58 = vld [vmem:[%s6404_s20 + $0x98] sm:$0xff] }
0x14ad   :  { %v5728_v8 = vadd.f32 %v2118_v53, %v2114_v9 }
0x14b2   :  { %v2077_v16 = vpop.f32.mrf.mxu2 }
0x14b3   :  { %v2116_v18 = vadd.f32 %v2115_v43, %v2077_v16 }
0x14b5   :  { %v5730_v22 = vadd.f32 %v2118_v53, %v2116_v18 }
0x14b7   :  { %v5734_v7 = vpack.c.bf16 %v5730_v22, %v5728_v8 }
0x14b9   :  { %4228 = vmatmul.msk.bf16.vlgmr.msra.gmra.mxu2 %vm146_vm1, %v5734_v7 }
0x14ba   :  { %2567 = vmatpush.bf16.msra.mxu2 %v4479_v58 }
0x14be   :  { %2568 = vmatpush.bf16.msra.mxu2 %v4478_v30 }
0x14c2   :  { %2569 = vmatpush.bf16.msra.mxu2 %v4477_v28 }
0x14c6   :  { %2570 = vmatpush.bf16.msra.mxu2 %v4476_v49 }
0x14c9   :  { %4232 = vmatmul.msk.bf16.vlgmr.msrb.gmra.mxu2 %vm432_vm3, %v2354_v24 }
0x1514   :  { %v2286_v41 = vpop.xlane.xlu1 %2285 }
0x1515   :  { %v2290_v48 = vsub.f32 %v2282_v44, %v2286_v41 }
0x1517   :  { %v2292_v29 = vmul.f32 1.442695, %v2290_v48 }
0x1519   :  { %4615 = vpow2.f32 %v2292_v29  ;;  %v4182_v29 = vld [vmem:[%s6402_s18 + $0x24] sm:$0xf] }
0x151f   :  { %v4616_v42 = vpop.eup %4615 }
0x1520   :  { %v2296_v56 = vsel %vm457_vm5, %v4616_v42, 0.0 }
0x153c   :  { %v2251_v34 = vpop.f32.mrf.mxu2 }
0x153d   :  { %v2252_v35 = vadd.f32 %v2251_v34, %v2226_v57 }
0x1544   :  { %v2253_v15 = vpop.f32.mrf.mxu2 }
0x1545   :  { %v2254_v60 = vadd.f32 %v2253_v15, %v2226_v57 }
0x1547   :  { %v5740_v40 = vpack.c.bf16 %v2254_v60, %v2252_v35 }
0x1549   :  { %v2636_v41 = vsel %vm432_vm3, %v5740_v40, 0 }
0x154c   :  { %v2372_v38 = vpop.f32.mrf.mxu2 }
0x154d   :  { %v2377_v47 = vmul.f32 0.35355338, %v2372_v38 }
0x154f   :  { %v2379_v2 = vadd.f32 %v2377_v47, %v5013_v17 }
0x1551   :  { %v2381_v14 = vsel %vm457_vm5, %v2379_v2, -inf }
0x1552   :  { %2382 = vmax.xlane.f32.xlu2 %v2381_v14  ;;  %v2334_v14 = vsel %vm6447_vm4, %v4181_v6, 0  ;;  %vm6452_vm4 = vmmov %vm6446_vm15 }
0x1553   :  { %2343 = vmatpush.bf16.msra.mxu1 %v2334_v14 }
0x1554   :  { %v2374_v61 = vpop.f32.mrf.mxu2 }
0x1555   :  { %v2378_v62 = vmul.f32 0.35355338, %v2374_v61  ;;  %v2431_v61 = vsel %vm6448_vm13, %v4182_v29, 0 }
0x1557   :  { %v2380_v37 = vadd.f32 %v2378_v62, %v5017_v23 }
0x1559   :  { %v2384_v1 = vsel %vm461_vm7, %v2380_v37, -inf }
0x155a   :  { %2288 = vmax.xlane.f32.xlu2 %v2287_v63  ;;  %2385 = vmax.xlane.f32.xlu0 %v2384_v1 }
0x1562   :  { %2297 = vadd.xlane.f32.xlu2 %v2296_v56 }
0x157a   :  { %2307 = vrot.lane.b32.xlu2 %v5525_v3, %s4748_s26 }
0x15c5   :  { %v2383_v26 = vpop.xlane.xlu2 %2382 }
0x15c6   :  { %v2387_v0 = vsub.f32 %v2379_v2, %v2383_v26  ;;  %v2350_v26 = vperm.slane %v5522_v59, 2 }
0x15c8   :  { %v2389_v31 = vmul.f32 1.442695, %v2387_v0 }
0x15ca   :  { %4617 = vpow2.f32 %v2389_v31 }
0x15cd   :  { %v2289_v20 = vpop.xlane.xlu2 %2288  ;;  %v2386_v25 = vpop.xlane.xlu0 %2385 }
0x15ce   :  { %v2291_v50 = vsub.f32 %v2283_v10, %v2289_v20  ;;  %v2388_v33 = vsub.f32 %v2380_v37, %v2386_v25 }
0x15d0   :  { %v4618_v52 = vpop.eup %4617  ;;  %v2294_v27 = vmul.f32 1.442695, %v2291_v50  ;;  %v2391_v32 = vmul.f32 1.442695, %v2388_v33 }
0x15d1   :  { %v2393_v12 = vsel %vm457_vm5, %v4618_v52, 0.0 }
0x15d2   :  { %4619 = vpow2.f32 %v2294_v27  ;;  %2394 = vadd.xlane.f32.xlu0 %v2393_v12 }
0x15d3   :  { %4621 = vpow2.f32 %v2391_v32 }
0x15d5   :  { %v2298_v11 = vpop.xlane.xlu2 %2297 }
0x15d6   :  { %4623 = vrcp.f32 %v2298_v11 }
0x15d8   :  { %v4620_v39 = vpop.eup %4619 }
0x15d9   :  { %v4622_v46 = vpop.eup %4621  ;;  %v2299_v54 = vsel %vm461_vm7, %v4620_v39, 0.0 }
0x15da   :  { %2300 = vadd.xlane.f32.xlu0 %v2299_v54  ;;  %v2396_v13 = vsel %vm461_vm7, %v4622_v46, 0.0 }
0x15db   :  { %2397 = vadd.xlane.f32.xlu1 %v2396_v13 }
0x15dc   :  { %v4624_v4 = vpop.eup %4623 }
0x15dd   :  { %v2308_v36 = vpop.permute.xlu2 %2307  ;;  %v2304_v53 = vmul.f32 %v4624_v4, %v4616_v42 }
0x15de   :  { %v2313_v51 = vsel %vm6445_vm0, %v2308_v36, 0  ;;  %vm6451_vm0 = vcmask 523264  }
0x15df   :  { %2322 = vmatpush.bf16.msra.mxu0 %v2313_v51 }
0x15e3   :  { %2440 = vmatpush.bf16.msrb.mxu0 %v2431_v61 }
0x15f4   :  { %2404 = vrot.lane.b32.xlu1 %v5525_v3, %s4749_s2 }
0x15fc   :  { %2728 = vrot.lane.b32.xlu1 %v5740_v40, %s4744_s10 }
0x1604   :  { %2630 = vrot.lane.b32.xlu1 %v5525_v3, %s4752_s24 }
0x1645   :  { %v2395_v43 = vpop.xlane.xlu0 %2394 }
0x164d   :  { %v2301_v44 = vpop.xlane.xlu0 %2300 }
0x164e   :  { %4625 = vrcp.f32 %v2301_v44  ;;  %v2398_v24 = vpop.xlane.xlu1 %2397 }
0x164f   :  { %4627 = vrcp.f32 %v2398_v24 }
0x1650   :  { %4629 = vrcp.f32 %v2395_v43 }
0x1654   :  { %v4626_v9 = vpop.eup %4625 }
0x1655   :  { %v2305_v16 = vmul.f32 %v4626_v9, %v4620_v39  ;;  %v4628_v34 = vpop.eup %4627 }
0x1656   :  { %v4630_v57 = vpop.eup %4629  ;;  %v2402_v15 = vmul.f32 %v4628_v34, %v4622_v46  ;;  %v4473_v34 = vld [vmem:[%s6403_s19 + $0x48] sm:$0xff] }
0x1657   :  { %v2306_v18 = vpack.c.bf16 %v2305_v16, %v2304_v53  ;;  %v2401_v60 = vmul.f32 %v4630_v57, %v4618_v52  ;;  %2524 = vmatpush.bf16.msrb.mxu1 %v4473_v34 }
0x1659   :  { %4230 = vmatmul.msk.bf16.vlgmr.msra.gmra.mxu0 %vm457_vm5, %v2306_v18  ;;  %v2403_v47 = vpack.c.bf16 %v2402_v15, %v2401_v60 }
0x1666   :  { %v2405_v35 = vpop.permute.xlu1 %2404 }
0x1667   :  { %v2410_v38 = vsel %vm6446_vm15, %v2405_v35, 0  ;;  %v4472_v35 = vld [vmem:[%s6403_s19 + $0x40] sm:$0xff] }
0x1668   :  { %2419 = vmatpush.bf16.msra.mxu3 %v2410_v38  ;;  %2525 = vmatpush.bf16.msrb.mxu1 %v4472_v35 }
0x166b   :  { %4233 = vmatmul.msk.bf16.vlgmr.msra.gmra.mxu3 %vm457_vm5, %v2403_v47 }
0x166c   :  { %2645 = vmatpush.bf16.xpose.msrb.mxu3 %v2636_v41 }
0x166e   :  { %v2729_v55 = vpop.permute.xlu1 %2728 }
0x166f   :  { %v2734_v2 = vsel %vm432_vm3, %v2729_v55, 0 }
0x1670   :  { %2743 = vmatpush.bf16.xpose.msrb.mxu2 %v2734_v2 }
0x1676   :  { %v2631_v48 = vpop.permute.xlu1 %2630 }
0x167b   :  { %4261 = vmatmul.msk.bf16.vlgmr.msrb.gmra.mxu3 %vm432_vm3, %v2631_v48 }
0x16d6   :  { %v2324_v62 = vpop.f32.mrf.mxu0 }
0x16de   :  { %v2326_v10 = vpop.f32.mrf.mxu0 }
0x16df   :  { %v2329_v37 = vpack.c.bf16 %v2326_v10, %v2324_v62 }
0x16e1   :  { %4231 = vmatmul.msk.bf16.vlgmr.msra.gmra.mxu1 %vm432_vm3, %v2329_v37 }
0x16ee   :  { %v2421_v63 = vpop.f32.mrf.mxu3 }
0x16f6   :  { %v2423_v1 = vpop.f32.mrf.mxu3 }
0x16f7   :  { %v2426_v42 = vpack.c.bf16 %v2423_v1, %v2421_v63  ;;  %v2495_v1 = vperm.slane %v5522_v59, 5 }
0x16f9   :  { %4234 = vmatmul.msk.bf16.vlgmr.msrb.gmra.mxu0 %vm432_vm3, %v2426_v42 }
0x16fe   :  { %v2647_v43 = vpop.f32.mrf.mxu3 }
0x16ff   :  { %v2652_v44 = vmul.f32 0.35355338, %v2647_v43 }
0x1701   :  { %v5800_v4 = vadd.f32 %v2652_v44, %v5013_v17 }
0x1703   :  { %v2656_v16 = vsel %vm457_vm5, %v5800_v4, -inf }
0x1706   :  { %v2649_v9 = vpop.f32.mrf.mxu3 }
0x1707   :  { %v2653_v53 = vmul.f32 0.35355338, %v2649_v9 }
0x1709   :  { %v5805_v18 = vadd.f32 %v2653_v53, %v5017_v23 }
0x170b   :  { %v2659_v24 = vsel %vm461_vm7, %v5805_v18, -inf }
0x175e   :  { %v2345_v56 = vpop.f32.mrf.mxu1 }
0x175f   :  { %v2351_v0 = vadd.f32 %v2350_v26, %v2345_v56 }
0x1766   :  { %v2347_v50 = vpop.f32.mrf.mxu1 }
0x1767   :  { %v2352_v52 = vadd.f32 %v2350_v26, %v2347_v50 }
0x1776   :  { %v2442_v31 = vpop.f32.mrf.mxu0 }
0x1777   :  { %v2447_v20 = vadd.f32 %v2442_v31, %v2351_v0  ;;  %v2498_v0 = vperm.slane %v5522_v59, 6 }
0x1779   :  { %v2449_v25 = vadd.f32 %v2447_v20, %v5473_v45 }
0x177b   :  { %v2451_v33 = vsel %vm146_vm1, %v2449_v25, 0.0 }
0x177c   :  { %2452 = vadd.xlane.f32.xlu0 %v2451_v33 }
0x177e   :  { %v2444_v27 = vpop.f32.mrf.mxu0 }
0x177f   :  { %v2448_v32 = vadd.f32 %v2444_v27, %v2352_v52 }
0x1781   :  { %v2450_v12 = vadd.f32 %v2448_v32, %v5478_v19  ;;  %v2502_v32 = vperm.slane %v5522_v59, 3 }
0x1783   :  { %v2454_v11 = vsel %vm6449_vm11, %v2450_v12, 0.0  ;;  %vm6453_vm11 = vmmov %vm6448_vm13 }
0x1784   :  { %2455 = vadd.xlane.f32.xlu0 %v2454_v11 }
0x17ef   :  { %v2453_v39 = vpop.xlane.xlu0 %2452 }
0x17f0   :  { %v2457_v46 = vmul.f32 %v2453_v39, %v5074_v5 }
0x17f2   :  { %v2459_v54 = vsub.f32 %v2449_v25, %v2457_v46 }
0x17f4   :  { %v2461_v13 = vmul.f32 %v2459_v54, %v2459_v54 }
0x17f6   :  { %v2463_v36 = vsel %vm146_vm1, %v2461_v13, 0.0 }
0x17f7   :  { %2464 = vadd.xlane.f32.xlu0 %v2463_v36  ;;  %v2456_v51 = vpop.xlane.xlu0 %2455 }
0x17f8   :  { %v2458_v58 = vmul.f32 %v2456_v51, %v5074_v5 }
0x17fa   :  { %v2460_v30 = vsub.f32 %v2450_v12, %v2458_v58 }
0x17fc   :  { %v2462_v28 = vmul.f32 %v2460_v30, %v2460_v30 }
0x17fe   :  { %v2466_v49 = vsel %vm6450_vm14, %v2462_v28, 0.0 }
0x17ff   :  { %2467 = vadd.xlane.f32.xlu2 %v2466_v49 }
0x1807   :  { %2657 = vmax.xlane.f32.xlu2 %v2656_v16 }
0x180b   :  { %2726 = vrot.lane.b32.xlu0 %v5525_v3, %s4750_s8 }
0x180f   :  { %2660 = vmax.xlane.f32.xlu2 %v2659_v24 }
0x186a   :  { %v2465_v57 = vpop.xlane.xlu0 %2464 }
0x186b   :  { %v2469_v15 = vmul.f32 %v2465_v57, %v5074_v5 }
0x186d   :  { %v2471_v60 = vadd.f32 1e-05, %v2469_v15 }
0x186f   :  { %4631 = vrsqrt.f32 %v2471_v60  ;;  %vm2479_vm9 = vweird.f32 %v2471_v60 }
0x1872   :  { %v2468_v3 = vpop.xlane.xlu2 %2467 }
0x1873   :  { %v2470_v38 = vmul.f32 %v2468_v3, %v5074_v5 }
0x1875   :  { %v4632_v41 = vpop.eup %4631  ;;  %v2472_v47 = vadd.f32 1e-05, %v2470_v38 }
0x1876   :  { %v2474_v55 = vmul.f32 %v4632_v41, %v2471_v60  ;;  %vm2480_vm2 = vweird.f32 %v4632_v41 }
0x1877   :  { %4633 = vrsqrt.f32 %v2472_v47  ;;  %vm2481_vm8 = vmor %vm2479_vm9, %vm2480_vm2  ;;  %vm2489_vm6 = vweird.f32 %v2472_v47 }
0x1878   :  { %v2475_v2 = vmul.f32 %v4632_v41, %v2474_v55  ;;  %vm6454_vm2 = vmmov %vm6450_vm14 }
0x187a   :  { %v2476_v48 = vmul.f32 0.5, %v2475_v2 }
0x187c   :  { %v2477_v6 = vsub.f32 1.5, %v2476_v48 }
0x187d   :  { %v4634_v14 = vpop.eup %4633  ;;  %v2727_v36 = vpop.permute.xlu0 %2726 }
0x187e   :  { %v2478_v29 = vmul.f32 %v4632_v41, %v2477_v6  ;;  %v2484_v61 = vmul.f32 %v4634_v14, %v2472_v47  ;;  %vm2490_vm10 = vweird.f32 %v4634_v14 }
0x187f   :  { %vm2491_vm12 = vmor %vm2489_vm6, %vm2490_vm10 }
0x1880   :  { %v2485_v62 = vmul.f32 %v4634_v14, %v2484_v61  ;;  %v2482_v10 = vsel %vm2481_vm8, %v4632_v41, %v2478_v29 }
0x1881   :  { %v2493_v42 = vmul.f32 %v2482_v10, %v2459_v54 }
0x1882   :  { %v2486_v37 = vmul.f32 0.5, %v2485_v62 }
0x1883   :  { %v2496_v31 = vmul.f32 %v2495_v1, %v2493_v42 }
0x1884   :  { %v2487_v63 = vsub.f32 1.5, %v2486_v37 }
0x1885   :  { %v5821_v50 = vadd.f32 %v2498_v0, %v2496_v31 }
0x1886   :  { %v2488_v56 = vmul.f32 %v4634_v14, %v2487_v63 }
0x1888   :  { %v2492_v26 = vsel %vm2491_vm12, %v4634_v14, %v2488_v56 }
0x1889   :  { %v2494_v20 = vmul.f32 %v2492_v26, %v2460_v30  ;;  %v2658_v30 = vpop.xlane.xlu2 %2657 }
0x188a   :  { %v2662_v44 = vsub.f32 %v5800_v4, %v2658_v30 }
0x188b   :  { %v2497_v25 = vmul.f32 %v2495_v1, %v2494_v20 }
0x188c   :  { %v2664_v9 = vmul.f32 1.442695, %v2662_v44  ;;  %v4486_v44 = vld [vmem:[%s6401_s17 + $0x30] sm:$0xff] }
0x188d   :  { %v5823_v33 = vadd.f32 %v2498_v0, %v2497_v25 }
0x188e   :  { %4635 = vpow2.f32 %v2664_v9 }
0x188f   :  { %v2501_v52 = vpack.c.bf16 %v5823_v33, %v5821_v50 }
0x1891   :  { %4243 = vmatmul.msk.bf16.vlgmr.msrb.gmra.mxu1 %vm146_vm1, %v2501_v52  ;;  %v2661_v4 = vpop.xlane.xlu2 %2660 }
0x1892   :  { %v2663_v3 = vsub.f32 %v5805_v18, %v2661_v4 }
0x1894   :  { %v4636_v57 = vpop.eup %4635  ;;  %v2666_v41 = vmul.f32 1.442695, %v2663_v3  ;;  %v4474_v3 = vld [vmem:[%s6403_s19 + $0x50] sm:$0xff] }
0x1895   :  { %v2668_v15 = vsel %vm457_vm5, %v4636_v57, 0.0 }
0x190e   :  { %v2527_v27 = vpop.f32.mrf.mxu1 }
0x190f   :  { %v2528_v12 = vadd.f32 %v2527_v27, %v2502_v32 }
0x1911   :  { %v2532_v46 = vmax.f32 %v2528_v12, 0.0 }
0x1916   :  { %v2529_v11 = vpop.f32.mrf.mxu1 }
0x1917   :  { %v2530_v39 = vadd.f32 %v2529_v11, %v2502_v32 }
0x1919   :  { %v2533_v54 = vmax.f32 %v2530_v39, 0.0 }
0x191b   :  { %v2534_v13 = vpack.c.bf16 %v2533_v54, %v2532_v46  ;;  %v4484_v46 = vld [vmem:[%s6400_s16 + $0x30] sm:$0xff]  ;;  %v4183_v54 = vld [vmem:[%s6402_s18 + $0x28] sm:$0xf] }
0x191d   :  { %4260 = vmatmul.msk.bf16.vlgmr.msra.gmra.mxu2 %vm6451_vm0, %v2534_v13  ;;  %v2707_v13 = vsel %vm6448_vm13, %v4183_v54, 0  ;;  %vm6456_vm13 = vmmov %vm6452_vm4 }
0x191e   :  { %2716 = vmatpush.bf16.msra.mxu1 %v2707_v13 }
0x192d   :  { %4264 = vmatmul.msk.bf16.vlgmr.msrb.gmra.mxu2 %vm432_vm3, %v2727_v36  ;;  %v4184_v36 = vld [vmem:[%s6402_s18 + $0x2c] sm:$0xf] }
0x19a0   :  { %v5831_v51 = vpop.f32.mrf.mxu2 }
0x19a8   :  { %v5833_v58 = vpop.f32.mrf.mxu2 }
0x19b0   :  { %v2745_v43 = vpop.f32.mrf.mxu2 }
0x19b1   :  { %v2750_v28 = vmul.f32 0.35355338, %v2745_v43  ;;  %v2804_v43 = vsel %vm6453_vm11, %v4184_v36, 0 }
0x19b3   :  { %v2752_v59 = vadd.f32 %v2750_v28, %v5013_v17 }
0x19b5   :  { %v2754_v49 = vsel %vm457_vm5, %v2752_v59, -inf }
0x19b6   :  { %2755 = vmax.xlane.f32.xlu1 %v2754_v49 }
0x19b8   :  { %v2747_v53 = vpop.f32.mrf.mxu2 }
0x19b9   :  { %v2751_v16 = vmul.f32 0.35355338, %v2747_v53 }
0x19bb   :  { %v2753_v24 = vadd.f32 %v2751_v16, %v5017_v23 }
0x19bd   :  { %v2757_v34 = vsel %vm461_vm7, %v2753_v24, -inf }
0x19be   :  { %2758 = vmax.xlane.f32.xlu0 %v2757_v34 }
0x19c6   :  { %2669 = vadd.xlane.f32.xlu0 %v2668_v15 }
0x19da   :  { %2680 = vrot.lane.b32.xlu0 %v5740_v40, %s4743_s9 }
0x1a29   :  { %v2756_v35 = vpop.xlane.xlu1 %2755 }
0x1a2a   :  { %v2760_v60 = vsub.f32 %v2752_v59, %v2756_v35 }
0x1a2c   :  { %v2762_v38 = vmul.f32 1.442695, %v2760_v60  ;;  %v4475_v60 = vld [vmem:[%s6403_s19 + $0x58] sm:$0xff] }
0x1a2d   :  { %2897 = vmatpush.bf16.msrb.mxu1 %v4475_v60 }
0x1a2e   :  { %4637 = vpow2.f32 %v2762_v38 }
0x1a2f   :  { %4639 = vpow2.f32 %v2666_v41 }
0x1a31   :  { %v2759_v47 = vpop.xlane.xlu0 %2758  ;;  %2898 = vmatpush.bf16.msrb.mxu1 %v4474_v3 }
0x1a32   :  { %v2761_v55 = vsub.f32 %v2753_v24, %v2759_v47  ;;  %v5880_v24 = vld [vmem:[%s6405_s21 + $0x30] sm:$0xff] }
0x1a33   :  { %v3048_v34 = vperm.slane %v5880_v24, 0 }
0x1a34   :  { %v4638_v2 = vpop.eup %4637  ;;  %v2764_v48 = vmul.f32 1.442695, %v2761_v55 }
0x1a35   :  { %v2766_v6 = vsel %vm457_vm5, %v4638_v2, 0.0  ;;  %v4640_v14 = vpop.eup %4639 }
0x1a36   :  { %4641 = vpow2.f32 %v2764_v48  ;;  %2767 = vadd.xlane.f32.xlu2 %v2766_v6  ;;  %v2671_v61 = vsel %vm461_vm7, %v4640_v14, 0.0 }
0x1a39   :  { %v2670_v18 = vpop.xlane.xlu0 %2669 }
0x1a3a   :  { %4643 = vrcp.f32 %v2670_v18 }
0x1a3c   :  { %v4642_v29 = vpop.eup %4641 }
0x1a3d   :  { %v2769_v62 = vsel %vm461_vm7, %v4642_v29, 0.0 }
0x1a3e   :  { %2672 = vadd.xlane.f32.xlu2 %v2671_v61  ;;  %2770 = vadd.xlane.f32.xlu1 %v2769_v62 }
0x1a40   :  { %v4644_v42 = vpop.eup %4643 }
0x1a41   :  { %v2676_v26 = vmul.f32 %v4644_v42, %v4636_v57 }
0x1a4c   :  { %v2681_v10 = vpop.permute.xlu0 %2680 }
0x1a4d   :  { %v2686_v37 = vsel %vm6446_vm15, %v2681_v10, 0  ;;  %vm6455_vm15 = vcmask 523264  }
0x1a4e   :  { %2695 = vmatpush.bf16.msra.mxu0 %v2686_v37 }
0x1a52   :  { %2813 = vmatpush.bf16.msrb.mxu0 %v2804_v43 }
0x1a57   :  { %2777 = vrot.lane.b32.xlu1 %v5740_v40, %s4745_s3  ;;  %v4485_v40 = vld [vmem:[%s6400_s16 + $0x38] sm:$0xff] }
0x1aa9   :  { %v2768_v63 = vpop.xlane.xlu2 %2767 }
0x1ab1   :  { %v2673_v1 = vpop.xlane.xlu2 %2672  ;;  %v2771_v20 = vpop.xlane.xlu1 %2770 }
0x1ab2   :  { %4645 = vrcp.f32 %v2673_v1 }
0x1ab3   :  { %4647 = vrcp.f32 %v2771_v20 }
0x1ab4   :  { %4649 = vrcp.f32 %v2768_v63 }
0x1ab8   :  { %v4646_v56 = vpop.eup %4645 }
0x1ab9   :  { %v2677_v0 = vmul.f32 %v4646_v56, %v4640_v14  ;;  %v4648_v25 = vpop.eup %4647 }
0x1aba   :  { %v4650_v52 = vpop.eup %4649  ;;  %v2775_v27 = vmul.f32 %v4648_v25, %v4642_v29 }
0x1abb   :  { %v2678_v31 = vpack.c.bf16 %v2677_v0, %v2676_v26  ;;  %v2774_v12 = vmul.f32 %v4650_v52, %v4638_v2 }
0x1abd   :  { %4262 = vmatmul.msk.bf16.vlgmr.msra.gmra.mxu0 %vm457_vm5, %v2678_v31  ;;  %v2776_v39 = vpack.c.bf16 %v2775_v27, %v2774_v12 }
0x1ac9   :  { %v2778_v32 = vpop.permute.xlu1 %2777 }
0x1aca   :  { %v2783_v11 = vsel %vm6452_vm4, %v2778_v32, 0 }
0x1acb   :  { %2792 = vmatpush.bf16.msra.mxu3 %v2783_v11 }
0x1ace   :  { %4265 = vmatmul.msk.bf16.vlgmr.msra.gmra.mxu3 %vm457_vm5, %v2776_v39 }
0x1acf   :  { %3067 = vmatpush.bf16.msrb.mxu3 %v4485_v40 }
0x1ad3   :  { %3068 = vmatpush.bf16.msrb.mxu3 %v4484_v46 }
0x1ade   :  { %4339 = vmatmul.msk.bf16.vlgmr.msrb.gmra.mxu3 %vm146_vm1, %v5734_v7  ;;  %v4487_v7 = vld [vmem:[%s6401_s17 + $0x38] sm:$0xff] }
0x1adf   :  { %3094 = vmatpush.bf16.msra.mxu0 %v4487_v7 }
0x1ae3   :  { %3095 = vmatpush.bf16.msra.mxu0 %v4486_v44 }
0x1b3a   :  { %v2697_v30 = vpop.f32.mrf.mxu0 }
0x1b42   :  { %v2699_v28 = vpop.f32.mrf.mxu0 }
0x1b43   :  { %v2702_v59 = vpack.c.bf16 %v2699_v28, %v2697_v30 }
0x1b45   :  { %4263 = vmatmul.msk.bf16.vlgmr.msra.gmra.mxu1 %vm432_vm3, %v2702_v59 }
0x1b51   :  { %v2794_v49 = vpop.f32.mrf.mxu3 }
0x1b59   :  { %v2796_v9 = vpop.f32.mrf.mxu3 }
0x1b5a   :  { %v2799_v53 = vpack.c.bf16 %v2796_v9, %v2794_v49 }
0x1b5c   :  { %4266 = vmatmul.msk.bf16.vlgmr.msrb.gmra.mxu0 %vm432_vm3, %v2799_v53 }
0x1b61   :  { %v3070_v16 = vpop.f32.mrf.mxu3 }
0x1b62   :  { %v3071_v15 = vadd.f32 %v3070_v16, %v3048_v34 }
0x1b69   :  { %v3072_v57 = vpop.f32.mrf.mxu3 }
0x1b6a   :  { %v3073_v4 = vadd.f32 %v3072_v57, %v3048_v34 }
0x1b6c   :  { %v5883_v35 = vpack.c.bf16 %v3073_v4, %v3071_v15  ;;  %4348 = vmatmul.msk.bf16.vlgmr.msra.gmra.mxu0 %vm146_vm1, %v5482_v21  ;;  %v5900_v21 = vld [vmem:[%s6405_s21 + $0x28] sm:$0xff] }
0x1b6d   :  { %v2723_v41 = vperm.slane %v5900_v21, 1  ;;  %v2868_v34 = vperm.slane %v5900_v21, 4  ;;  %v2871_v60 = vperm.slane %v5900_v21, 5 }
0x1b6e   :  { %3104 = vrot.lane.b32.xlu1 %v5883_v35, %s4743_s9 }
0x1b76   :  { %3199 = vrot.lane.b32.xlu1 %v5883_v35, %s4744_s10 }
0x1bc2   :  { %v2718_v38 = vpop.f32.mrf.mxu1 }
0x1bc3   :  { %v2724_v47 = vadd.f32 %v2723_v41, %v2718_v38 }
0x1bca   :  { %v2720_v6 = vpop.f32.mrf.mxu1 }
0x1bcb   :  { %v2725_v29 = vadd.f32 %v2723_v41, %v2720_v6  ;;  %v4483_v6 = vld [vmem:[%s6404_s20 + $0xb8] sm:$0xff] }
0x1bcc   :  { %2940 = vmatpush.bf16.msra.mxu2 %v4483_v6 }
0x1bd9   :  { %v2815_v55 = vpop.f32.mrf.mxu0 }
0x1bda   :  { %v2820_v2 = vadd.f32 %v2815_v55, %v2724_v47 }
0x1bdc   :  { %v2822_v48 = vadd.f32 %v2820_v2, %v5473_v45 }
0x1bde   :  { %v2824_v14 = vsel %vm146_vm1, %v2822_v48, 0.0 }
0x1bdf   :  { %2825 = vadd.xlane.f32.xlu2 %v2824_v14 }
0x1be0   :  { %v3105_v61 = vpop.permute.xlu1 %3104 }
0x1be1   :  { %v3110_v62 = vsel %vm432_vm3, %v3105_v61, 0  ;;  %v2817_v18 = vpop.f32.mrf.mxu0  ;;  %v4481_v61 = vld [vmem:[%s6404_s20 + $0xa8] sm:$0xff] }
0x1be2   :  { %v2821_v10 = vadd.f32 %v2817_v18, %v2725_v29  ;;  %3119 = vmatpush.bf16.xpose.msra.mxu1 %v3110_v62  ;;  %v4482_v29 = vld [vmem:[%s6404_s20 + $0xb0] sm:$0xff] }
0x1be3   :  { %2941 = vmatpush.bf16.msra.mxu2 %v4482_v29 }
0x1be4   :  { %v2823_v37 = vadd.f32 %v2821_v10, %v5478_v19  ;;  %v4480_v10 = vld [vmem:[%s6404_s20 + $0xa0] sm:$0xff] }
0x1be6   :  { %v2827_v63 = vsel %vm6450_vm14, %v2823_v37, 0.0  ;;  %vm6457_vm14 = vmmov %vm6453_vm11 }
0x1be7   :  { %2828 = vadd.xlane.f32.xlu2 %v2827_v63  ;;  %2942 = vmatpush.bf16.msra.mxu2 %v4481_v61 }
0x1be8   :  { %v3200_v43 = vpop.permute.xlu1 %3199 }
0x1beb   :  { %2943 = vmatpush.bf16.msra.mxu2 %v4480_v10 }
0x1c52   :  { %v2826_v1 = vpop.xlane.xlu2 %2825 }
0x1c53   :  { %v2830_v42 = vmul.f32 %v2826_v1, %v5074_v5 }
0x1c55   :  { %v2832_v45 = vsub.f32 %v2822_v48, %v2830_v42  ;;  %v5929_v48 = vpop.f32.mrf.mxu0 }
0x1c57   :  { %v2834_v56 = vmul.f32 %v2832_v45, %v2832_v45 }
0x1c59   :  { %v2836_v26 = vsel %vm146_vm1, %v2834_v56, 0.0 }
0x1c5a   :  { %2837 = vadd.xlane.f32.xlu2 %v2836_v26  ;;  %v2829_v0 = vpop.xlane.xlu2 %2828 }
0x1c5b   :  { %v2831_v31 = vmul.f32 %v2829_v0, %v5074_v5  ;;  %v2875_v0 = vperm.slane %v5900_v21, 2 }
0x1c5d   :  { %v2833_v20 = vsub.f32 %v2823_v37, %v2831_v31  ;;  %v5934_v14 = vpop.f32.mrf.mxu0 }
0x1c5f   :  { %v2835_v25 = vmul.f32 %v2833_v20, %v2833_v20 }
0x1c61   :  { %v2839_v52 = vsel %vm6454_vm2, %v2835_v25, 0.0 }
0x1c62   :  { %2840 = vadd.xlane.f32.xlu0 %v2839_v52 }
0x1c72   :  { %3201 = vrot.lane.b32.xlu2 %v5883_v35, %s4745_s3 }
0x1ccd   :  { %v2838_v19 = vpop.xlane.xlu2 %2837 }
0x1cce   :  { %v2842_v27 = vmul.f32 %v2838_v19, %v5074_v5 }
0x1cd0   :  { %v2844_v40 = vadd.f32 1e-05, %v2842_v27 }
0x1cd2   :  { %4651 = vrsqrt.f32 %v2844_v40  ;;  %vm2852_vm8 = vweird.f32 %v2844_v40 }
0x1cd5   :  { %v2841_v32 = vpop.xlane.xlu0 %2840  ;;  %v3202_v12 = vpop.permute.xlu2 %3201 }
0x1cd6   :  { %v2843_v11 = vmul.f32 %v2841_v32, %v5074_v5  ;;  %v3207_v39 = vsel %vm432_vm3, %v3202_v12, 0 }
0x1cd7   :  { %3216 = vmatpush.bf16.xpose.msrb.mxu0 %v3207_v39 }
0x1cd8   :  { %v4652_v46 = vpop.eup %4651  ;;  %v2845_v54 = vadd.f32 1e-05, %v2843_v11 }
0x1cd9   :  { %v2847_v13 = vmul.f32 %v4652_v46, %v2844_v40  ;;  %vm2853_vm9 = vweird.f32 %v4652_v46 }
0x1cda   :  { %4653 = vrsqrt.f32 %v2845_v54  ;;  %vm2854_vm10 = vmor %vm2852_vm8, %vm2853_vm9  ;;  %vm2862_vm12 = vweird.f32 %v2845_v54 }
0x1cdb   :  { %v2848_v36 = vmul.f32 %v4652_v46, %v2847_v13  ;;  %vm6458_vm9 = vmmov %vm6452_vm4 }
0x1cdc   :  { %vm6459_vm8 = vmmov %vm6454_vm2 }
0x1cdd   :  { %v2849_v30 = vmul.f32 0.5, %v2848_v36 }
0x1cde   :  { %4352 = vmatmul.msk.bf16.vlgmr.msrb.gmra.mxu0 %vm432_vm3, %v3200_v43 }
0x1cdf   :  { %v2850_v28 = vsub.f32 1.5, %v2849_v30 }
0x1ce0   :  { %v4654_v7 = vpop.eup %4653 }
0x1ce1   :  { %v2851_v59 = vmul.f32 %v4652_v46, %v2850_v28  ;;  %v2857_v44 = vmul.f32 %v4654_v7, %v2845_v54  ;;  %vm2863_vm6 = vweird.f32 %v4654_v7 }
0x1ce2   :  { %vm2864_vm0 = vmor %vm2862_vm12, %vm2863_vm6 }
0x1ce3   :  { %v2858_v49 = vmul.f32 %v4654_v7, %v2857_v44  ;;  %v2855_v9 = vsel %vm2854_vm10, %v4652_v46, %v2851_v59 }
0x1ce4   :  { %v2866_v57 = vmul.f32 %v2855_v9, %v2832_v45 }
0x1ce5   :  { %v2859_v53 = vmul.f32 0.5, %v2858_v49 }
0x1ce6   :  { %v2869_v3 = vmul.f32 %v2868_v34, %v2866_v57 }
0x1ce7   :  { %v2860_v16 = vsub.f32 1.5, %v2859_v53 }
0x1ce8   :  { %v5920_v47 = vadd.f32 %v2871_v60, %v2869_v3 }
0x1ce9   :  { %v2861_v15 = vmul.f32 %v4654_v7, %v2860_v16 }
0x1ceb   :  { %v2865_v4 = vsel %vm2864_vm0, %v4654_v7, %v2861_v15 }
0x1cec   :  { %v2867_v38 = vmul.f32 %v2865_v4, %v2833_v20 }
0x1cee   :  { %v2870_v41 = vmul.f32 %v2868_v34, %v2867_v38 }
0x1cf0   :  { %v5922_v55 = vadd.f32 %v2871_v60, %v2870_v41 }
0x1cf2   :  { %v2874_v2 = vpack.c.bf16 %v5922_v55, %v5920_v47 }
0x1cf4   :  { %4275 = vmatmul.msk.bf16.vlgmr.msrb.gmra.mxu1 %vm146_vm1, %v2874_v2 }
0x1d04   :  { %4349 = vmatmul.msk.bf16.vlgmr.msra.gmra.mxu1 %vm432_vm3, %v5883_v35 }
0x1d5b   :  { %v3218_v62 = vpop.f32.mrf.mxu0 }
0x1d5c   :  { %v3223_v18 = vmul.f32 0.35355338, %v3218_v62 }
0x1d5e   :  { %v3225_v37 = vadd.f32 %v3223_v18, %v5013_v17 }
0x1d60   :  { %v3227_v63 = vsel %vm457_vm5, %v3225_v37, -inf }
0x1d61   :  { %3228 = vmax.xlane.f32.xlu0 %v3227_v63 }
0x1d63   :  { %v3220_v1 = vpop.f32.mrf.mxu0 }
0x1d64   :  { %v3224_v42 = vmul.f32 0.35355338, %v3220_v1 }
0x1d66   :  { %v3226_v45 = vadd.f32 %v3224_v42, %v5017_v23 }
0x1d68   :  { %v3230_v56 = vsel %vm461_vm7, %v3226_v45, -inf }
0x1d69   :  { %3231 = vmax.xlane.f32.xlu0 %v3230_v56  ;;  %v3075_v56 = vperm.slane %v5880_v24, 1 }
0x1d71   :  { %v2900_v26 = vpop.f32.mrf.mxu1 }
0x1d72   :  { %v2901_v31 = vadd.f32 %v2900_v26, %v2875_v0 }
0x1d74   :  { %v2905_v52 = vmax.f32 %v2901_v31, 0.0 }
0x1d79   :  { %v2902_v20 = vpop.f32.mrf.mxu1 }
0x1d7a   :  { %v2903_v25 = vadd.f32 %v2902_v20, %v2875_v0  ;;  %v3098_v0 = vadd.f32 %v5929_v48, %v3075_v56  ;;  %v4301_v48 = vld [vmem:[%s6402_s18 + $0x30] sm:$0xf] }
0x1d7c   :  { %v2906_v19 = vmax.f32 %v2903_v25, 0.0 }
0x1d7e   :  { %v2907_v27 = vpack.c.bf16 %v2906_v19, %v2905_v52 }
0x1d80   :  { %4292 = vmatmul.msk.bf16.vlgmr.msra.gmra.mxu2 %vm6455_vm15, %v2907_v27 }
0x1d81   :  { %v3121_v40 = vpop.f32.mrf.mxu1 }
0x1d82   :  { %v3126_v32 = vmul.f32 0.35355338, %v3121_v40 }
0x1d84   :  { %v3128_v12 = vadd.f32 %v3126_v32, %v5013_v17 }
0x1d86   :  { %v3130_v11 = vsel %vm457_vm5, %v3128_v12, -inf }
0x1d87   :  { %3131 = vmax.xlane.f32.xlu1 %v3130_v11 }
0x1d89   :  { %v3123_v39 = vpop.f32.mrf.mxu1 }
0x1d8a   :  { %v3127_v46 = vmul.f32 0.35355338, %v3123_v39  ;;  %v4302_v39 = vld [vmem:[%s6402_s18 + $0x34] sm:$0xf] }
0x1d8c   :  { %v3129_v54 = vadd.f32 %v3127_v46, %v5017_v23  ;;  %v3277_v46 = vsel %vm6457_vm14, %v4302_v39, 0 }
0x1d8e   :  { %v3133_v13 = vsel %vm461_vm7, %v3129_v54, -inf }
0x1d8f   :  { %3134 = vmax.xlane.f32.xlu2 %v3133_v13 }
0x1dd4   :  { %v3229_v36 = vpop.xlane.xlu0 %3228 }
0x1dd5   :  { %v3233_v43 = vsub.f32 %v3225_v37, %v3229_v36 }
0x1dd7   :  { %v3235_v30 = vmul.f32 1.442695, %v3233_v43 }
0x1dd9   :  { %4655 = vpow2.f32 %v3235_v30 }
0x1ddc   :  { %v3232_v28 = vpop.xlane.xlu0 %3231 }
0x1ddd   :  { %v3234_v7 = vsub.f32 %v3226_v45, %v3232_v28 }
0x1ddf   :  { %v4656_v59 = vpop.eup %4655  ;;  %v3237_v44 = vmul.f32 1.442695, %v3234_v7 }
0x1de0   :  { %v3239_v49 = vsel %vm457_vm5, %v4656_v59, 0.0 }
0x1de1   :  { %4657 = vpow2.f32 %v3237_v44  ;;  %3240 = vadd.xlane.f32.xlu1 %v3239_v49 }
0x1de7   :  { %v4658_v9 = vpop.eup %4657 }
0x1de8   :  { %v3242_v53 = vsel %vm461_vm7, %v4658_v9, 0.0 }
0x1de9   :  { %3243 = vadd.xlane.f32.xlu2 %v3242_v53 }
0x1dfa   :  { %v3132_v16 = vpop.xlane.xlu1 %3131 }
0x1dfb   :  { %v3136_v34 = vsub.f32 %v3128_v12, %v3132_v16  ;;  %v3180_v12 = vsel %vm6453_vm11, %v4301_v48, 0  ;;  %v3196_v16 = vperm.slane %v5880_v24, 2  ;;  %v4492_v48 = vld [vmem:[%s6404_s20 + $0xc0] sm:$0xff] }
0x1dfc   :  { %3189 = vmatpush.bf16.msra.mxu3 %v3180_v12  ;;  %v4489_v12 = vld [vmem:[%s6403_s19 + $0x68] sm:$0xff] }
0x1dfd   :  { %v3138_v57 = vmul.f32 1.442695, %v3136_v34 }
0x1dff   :  { %4659 = vpow2.f32 %v3138_v57 }
0x1e00   :  { %3370 = vmatpush.bf16.msrb.mxu3 %v4489_v12 }
0x1e02   :  { %v3135_v15 = vpop.xlane.xlu2 %3134 }
0x1e03   :  { %v3137_v4 = vsub.f32 %v3129_v54, %v3135_v15  ;;  %v5983_v11 = vpop.f32.mrf.mxu2 }
0x1e05   :  { %v4660_v60 = vpop.eup %4659  ;;  %v3140_v3 = vmul.f32 1.442695, %v3137_v4 }
0x1e06   :  { %v3142_v38 = vsel %vm457_vm5, %v4660_v60, 0.0 }
0x1e07   :  { %4661 = vpow2.f32 %v3140_v3  ;;  %3143 = vadd.xlane.f32.xlu0 %v3142_v38 }
0x1e0b   :  { %v5989_v54 = vpop.f32.mrf.mxu2 }
0x1e0d   :  { %v4662_v41 = vpop.eup %4661 }
0x1e0e   :  { %v3145_v2 = vsel %vm461_vm7, %v4662_v41, 0.0 }
0x1e0f   :  { %3146 = vadd.xlane.f32.xlu1 %v3145_v2 }
0x1e1b   :  { %3153 = vrot.lane.b32.xlu0 %v5883_v35, %s4748_s26 }
0x1e28   :  { %3250 = vrot.lane.b32.xlu1 %v5883_v35, %s4749_s2 }
0x1e30   :  { %3476 = vrot.lane.b32.xlu1 %v5883_v35, %s4752_s24 }
0x1e38   :  { %3572 = vrot.lane.b32.xlu1 %v5883_v35, %s4750_s8  ;;  %v3100_v35 = vadd.f32 %v5934_v14, %v3075_v56 }
0x1e3a   :  { %v5972_v20 = vpack.c.bf16 %v3100_v35, %v3098_v0 }
0x1e3c   :  { %v3482_v40 = vsel %vm432_vm3, %v5972_v20, 0 }
0x1e54   :  { %v3241_v6 = vpop.xlane.xlu1 %3240 }
0x1e5c   :  { %v3244_v37 = vpop.xlane.xlu2 %3243 }
0x1e7a   :  { %v3144_v29 = vpop.xlane.xlu0 %3143 }
0x1e82   :  { %v3147_v61 = vpop.xlane.xlu1 %3146 }
0x1e83   :  { %4663 = vrcp.f32 %v3147_v61 }
0x1e84   :  { %4665 = vrcp.f32 %v3144_v29 }
0x1e85   :  { %4667 = vrcp.f32 %v3244_v37 }
0x1e86   :  { %4669 = vrcp.f32 %v3241_v6 }
0x1e89   :  { %v4664_v62 = vpop.eup %4663 }
0x1e8a   :  { %v4666_v18 = vpop.eup %4665  ;;  %v3151_v10 = vmul.f32 %v4664_v62, %v4662_v41 }
0x1e8b   :  { %v3150_v1 = vmul.f32 %v4666_v18, %v4660_v60  ;;  %v4668_v26 = vpop.eup %4667 }
0x1e8c   :  { %v4670_v31 = vpop.eup %4669  ;;  %v3248_v25 = vmul.f32 %v4668_v26, %v4658_v9 }
0x1e8d   :  { %v3154_v63 = vpop.permute.xlu0 %3153  ;;  %v3152_v45 = vpack.c.bf16 %v3151_v10, %v3150_v1  ;;  %v3247_v19 = vmul.f32 %v4670_v31, %v4656_v59 }
0x1e8e   :  { %v3159_v42 = vsel %vm6452_vm4, %v3154_v63, 0 }
0x1e8f   :  { %3168 = vmatpush.bf16.msrb.mxu2 %v3159_v42  ;;  %v3249_v32 = vpack.c.bf16 %v3248_v25, %v3247_v19 }
0x1e92   :  { %4350 = vmatmul.msk.bf16.vlgmr.msrb.gmra.mxu2 %vm457_vm5, %v3152_v45 }
0x1e93   :  { %3286 = vmatpush.bf16.msra.mxu2 %v3277_v46 }
0x1e9a   :  { %v3251_v52 = vpop.permute.xlu1 %3250 }
0x1e9b   :  { %v3256_v27 = vsel %vm6456_vm13, %v3251_v52, 0  ;;  %vm6460_vm13 = vcmask 523264  }
0x1e9c   :  { %3265 = vmatpush.bf16.msrb.mxu1 %v3256_v27 }
0x1e9f   :  { %4353 = vmatmul.msk.bf16.vlgmr.msrb.gmra.mxu1 %vm457_vm5, %v3249_v32  ;;  %v4494_v32 = vld [vmem:[%s6404_s20 + $0xd0] sm:$0xff] }
0x1ea0   :  { %3491 = vmatpush.bf16.xpose.msra.mxu1 %v3482_v40  ;;  %v4495_v40 = vld [vmem:[%s6404_s20 + $0xd8] sm:$0xff] }
0x1ea1   :  { %3413 = vmatpush.bf16.msra.mxu0 %v4495_v40 }
0x1ea2   :  { %v3477_v14 = vpop.permute.xlu1 %3476 }
0x1ea5   :  { %3414 = vmatpush.bf16.msra.mxu0 %v4494_v32 }
0x1eaa   :  { %v6001_v4 = vpop.permute.xlu1 %3572 }
0x1eaf   :  { %4381 = vmatmul.msk.bf16.vlgmr.msra.gmra.mxu1 %vm432_vm3, %v3477_v14  ;;  %v4493_v14 = vld [vmem:[%s6404_s20 + $0xc8] sm:$0xff] }
0x1eb0   :  { %3415 = vmatpush.bf16.msra.mxu0 %v4493_v14 }
0x1eb4   :  { %3416 = vmatpush.bf16.msra.mxu0 %v4492_v48 }
0x1f15   :  { %v3170_v13 = vpop.f32.mrf.mxu2 }
0x1f1c   :  { %v3267_v36 = vpop.f32.mrf.mxu1 }
0x1f1d   :  { %v3172_v43 = vpop.f32.mrf.mxu2 }
0x1f1e   :  { %v3175_v30 = vpack.c.bf16 %v3172_v43, %v3170_v13 }
0x1f20   :  { %4351 = vmatmul.msk.bf16.vlgmr.msra.gmra.mxu3 %vm432_vm3, %v3175_v30 }
0x1f24   :  { %v3269_v28 = vpop.f32.mrf.mxu1 }
0x1f25   :  { %v3272_v7 = vpack.c.bf16 %v3269_v28, %v3267_v36  ;;  %v4488_v36 = vld [vmem:[%s6403_s19 + $0x60] sm:$0xff] }
0x1f26   :  { %3371 = vmatpush.bf16.msrb.mxu3 %v4488_v36 }
0x1f27   :  { %4354 = vmatmul.msk.bf16.vlgmr.msra.gmra.mxu2 %vm432_vm3, %v3272_v7 }
0x1f2c   :  { %v3493_v59 = vpop.f32.mrf.mxu1 }
0x1f2d   :  { %v3498_v44 = vmul.f32 0.35355338, %v3493_v59 }
0x1f2f   :  { %v5994_v49 = vadd.f32 %v3498_v44, %v5013_v17 }
0x1f31   :  { %v3502_v9 = vsel %vm457_vm5, %v5994_v49, -inf }
0x1f32   :  { %3503 = vmax.xlane.f32.xlu1 %v3502_v9 }
0x1f34   :  { %v3495_v25 = vpop.f32.mrf.mxu1 }
0x1f35   :  { %v3499_v52 = vmul.f32 0.35355338, %v3495_v25 }
0x1f37   :  { %v6017_v19 = vadd.f32 %v3499_v52, %v5017_v23 }
0x1f39   :  { %v3505_v27 = vsel %vm461_vm7, %v6017_v19, -inf }
0x1f4b   :  { %3526 = vrot.lane.b32.xlu1 %v5972_v20, %s4743_s9 }
0x1fa3   :  { %v3191_v53 = vpop.f32.mrf.mxu3 }
0x1fa4   :  { %v3197_v34 = vadd.f32 %v3196_v16, %v3191_v53 }
0x1fa5   :  { %v6005_v29 = vpop.xlane.xlu1 %3503 }
0x1fa6   :  { %v3508_v36 = vsub.f32 %v5994_v49, %v6005_v29 }
0x1faa   :  { %v3288_v57 = vpop.f32.mrf.mxu2 }
0x1fab   :  { %v3293_v15 = vadd.f32 %v3288_v57, %v3197_v34  ;;  %v3193_v3 = vpop.f32.mrf.mxu3 }
0x1fac   :  { %v3198_v41 = vadd.f32 %v3196_v16, %v3193_v3 }
0x1fad   :  { %v3295_v60 = vadd.f32 %v3293_v15, %v5728_v8 }
0x1faf   :  { %v3297_v38 = vsel %vm146_vm1, %v3295_v60, 0.0 }
0x1fb0   :  { %3298 = vadd.xlane.f32.xlu2 %v3297_v38 }
0x1fb2   :  { %v3290_v2 = vpop.f32.mrf.mxu2 }
0x1fb3   :  { %v3294_v6 = vadd.f32 %v3290_v2, %v3198_v41 }
0x1fb5   :  { %v3296_v61 = vadd.f32 %v3294_v6, %v5730_v22  ;;  %v3341_v6 = vperm.slane %v5880_v24, 5 }
0x1fb7   :  { %v3300_v62 = vsel %vm6454_vm2, %v3296_v61, 0.0 }
0x1fb8   :  { %3301 = vadd.xlane.f32.xlu0 %v3300_v62 }
0x1fbd   :  { %v3527_v18 = vpop.permute.xlu1 %3526 }
0x1fbe   :  { %v3532_v10 = vsel %vm6458_vm9, %v3527_v18, 0 }
0x1fbf   :  { %3541 = vmatpush.bf16.msrb.mxu2 %v3532_v10  ;;  %v3344_v10 = vperm.slane %v5880_v24, 6 }
0x2023   :  { %v3299_v37 = vpop.xlane.xlu2 %3298 }
0x2024   :  { %v3303_v63 = vmul.f32 %v3299_v37, %v5074_v5 }
0x2026   :  { %v3305_v1 = vsub.f32 %v3295_v60, %v3303_v63 }
0x2028   :  { %v3307_v42 = vmul.f32 %v3305_v1, %v3305_v1 }
0x202a   :  { %v3309_v45 = vsel %vm146_vm1, %v3307_v42, 0.0 }
0x202b   :  { %3310 = vadd.xlane.f32.xlu2 %v3309_v45  ;;  %v3302_v56 = vpop.xlane.xlu0 %3301 }
0x202c   :  { %v3304_v35 = vmul.f32 %v3302_v56, %v5074_v5 }
0x202e   :  { %v3306_v26 = vsub.f32 %v3296_v61, %v3304_v35 }
0x2030   :  { %v3308_v0 = vmul.f32 %v3306_v26, %v3306_v26 }
0x2032   :  { %v3312_v31 = vsel %vm6459_vm8, %v3308_v0, 0.0  ;;  %vm6467_vm8 = vmmov %vm6454_vm2 }
0x2033   :  { %3313 = vadd.xlane.f32.xlu2 %v3312_v31 }
0x204b   :  { %3574 = vrot.lane.b32.xlu2 %v5972_v20, %s4744_s10 }
0x2074   :  { %3506 = vmax.xlane.f32.xlu2 %v3505_v27 }
0x209e   :  { %v3311_v39 = vpop.xlane.xlu2 %3310 }
0x209f   :  { %v3315_v46 = vmul.f32 %v3311_v39, %v5074_v5 }
0x20a1   :  { %v3317_v13 = vadd.f32 1e-05, %v3315_v46 }
0x20a3   :  { %4671 = vrsqrt.f32 %v3317_v13  ;;  %vm3325_vm6 = vweird.f32 %v3317_v13 }
0x20a6   :  { %v3314_v43 = vpop.xlane.xlu2 %3313 }
0x20a7   :  { %v3316_v30 = vmul.f32 %v3314_v43, %v5074_v5 }
0x20a9   :  { %v4672_v28 = vpop.eup %4671  ;;  %v3318_v7 = vadd.f32 1e-05, %v3316_v30 }
0x20aa   :  { %v3320_v59 = vmul.f32 %v4672_v28, %v3317_v13  ;;  %vm3326_vm10 = vweird.f32 %v4672_v28 }
0x20ab   :  { %4673 = vrsqrt.f32 %v3318_v7  ;;  %vm3327_vm12 = vmor %vm3325_vm6, %vm3326_vm10  ;;  %vm3335_vm15 = vweird.f32 %v3318_v7 }
0x20ac   :  { %v3321_v44 = vmul.f32 %v4672_v28, %v3320_v59 }
0x20ae   :  { %v3322_v9 = vmul.f32 0.5, %v3321_v44  ;;  %v3575_v53 = vpop.permute.xlu2 %3574 }
0x20af   :  { %v3580_v16 = vsel %vm432_vm3, %v3575_v53, 0 }
0x20b0   :  { %v3323_v34 = vsub.f32 1.5, %v3322_v9  ;;  %3589 = vmatpush.bf16.xpose.msrb.mxu0 %v3580_v16 }
0x20b1   :  { %v4674_v57 = vpop.eup %4673 }
0x20b2   :  { %v3324_v15 = vmul.f32 %v4672_v28, %v3323_v34  ;;  %v3330_v60 = vmul.f32 %v4674_v57, %v3318_v7  ;;  %vm3336_vm0 = vweird.f32 %v4674_v57 }
0x20b3   :  { %vm3337_vm4 = vmor %vm3335_vm15, %vm3336_vm0 }
0x20b4   :  { %v3331_v3 = vmul.f32 %v4674_v57, %v3330_v60  ;;  %v3328_v38 = vsel %vm3327_vm12, %v4672_v28, %v3324_v15 }
0x20b5   :  { %v3339_v61 = vmul.f32 %v3328_v38, %v3305_v1  ;;  %v3348_v1 = vperm.slane %v5880_v24, 3 }
0x20b6   :  { %v3332_v41 = vmul.f32 0.5, %v3331_v3 }
0x20b7   :  { %v3342_v37 = vmul.f32 %v3341_v6, %v3339_v61 }
0x20b8   :  { %v3333_v2 = vsub.f32 1.5, %v3332_v41 }
0x20b9   :  { %v6044_v45 = vadd.f32 %v3344_v10, %v3342_v37 }
0x20ba   :  { %v3334_v62 = vmul.f32 %v4674_v57, %v3333_v2 }
0x20bc   :  { %v3338_v18 = vsel %vm3337_vm4, %v4674_v57, %v3334_v62 }
0x20bd   :  { %v3340_v63 = vmul.f32 %v3338_v18, %v3306_v26  ;;  %v3381_v26 = vperm.slane %v5880_v24, 4 }
0x20bf   :  { %v3343_v42 = vmul.f32 %v3341_v6, %v3340_v63 }
0x20c1   :  { %v6046_v56 = vadd.f32 %v3344_v10, %v3343_v42 }
0x20c3   :  { %v3347_v35 = vpack.c.bf16 %v6046_v56, %v6044_v45 }
0x20c5   :  { %4363 = vmatmul.msk.bf16.vlgmr.msrb.gmra.mxu3 %vm146_vm1, %v3347_v35 }
0x20e7   :  { %v3507_v28 = vpop.xlane.xlu2 %3506 }
0x20e8   :  { %v3509_v44 = vsub.f32 %v6017_v19, %v3507_v28  ;;  %v6091_v28 = vld [vmem:[%s6405_s21 + $0x38] sm:$0xff] }
0x20ea   :  { %v3512_v53 = vmul.f32 1.442695, %v3509_v44 }
0x2148   :  { %v3373_v0 = vpop.f32.mrf.mxu3 }
0x2149   :  { %v3374_v31 = vadd.f32 %v3373_v0, %v3348_v1  ;;  %v4303_v0 = vld [vmem:[%s6402_s18 + $0x38] sm:$0xf] }
0x214b   :  { %v3378_v27 = vmax.f32 %v3374_v31, 0.0 }
0x2150   :  { %v3375_v25 = vpop.f32.mrf.mxu3 }
0x2151   :  { %v3376_v52 = vadd.f32 %v3375_v25, %v3348_v1 }
0x2153   :  { %v3379_v40 = vmax.f32 %v3376_v52, 0.0 }
0x2155   :  { %v3380_v32 = vpack.c.bf16 %v3379_v40, %v3378_v27 }
0x2157   :  { %4380 = vmatmul.msk.bf16.vlgmr.msra.gmra.mxu0 %vm6460_vm13, %v3380_v32  ;;  %vm6468_vm13 = vmmov %vm6454_vm2 }
0x2167   :  { %4384 = vmatmul.msk.bf16.vlgmr.msrb.gmra.mxu0 %vm432_vm3, %v6001_v4  ;;  %v3510_v4 = vmul.f32 1.442695, %v3508_v36 }
0x2169   :  { %4675 = vpow2.f32 %v3510_v4 }
0x216a   :  { %4677 = vpow2.f32 %v3512_v53 }
0x21d4   :  { %v3418_v14 = vpop.f32.mrf.mxu0 }
0x21d5   :  { %v6058_v48 = vadd.f32 %v3418_v14, %v3381_v26 }
0x21dc   :  { %v6060_v12 = vpop.f32.mrf.mxu0 }
0x21e4   :  { %v3591_v39 = vpop.f32.mrf.mxu0 }
0x21e5   :  { %v3596_v46 = vmul.f32 0.35355338, %v3591_v39 }
0x21e7   :  { %v3598_v13 = vadd.f32 %v3596_v46, %v5013_v17  ;;  %v4676_v17 = vpop.eup %4675 }
0x21e8   :  { %v3514_v49 = vsel %vm457_vm5, %v4676_v17, 0.0  ;;  %v4678_v29 = vpop.eup %4677 }
0x21e9   :  { %v3600_v43 = vsel %vm457_vm5, %v3598_v13, -inf  ;;  %v3517_v16 = vsel %vm461_vm7, %v4678_v29, 0.0 }
0x21ea   :  { %3601 = vmax.xlane.f32.xlu0 %v3600_v43 }
0x21ec   :  { %v3593_v30 = vpop.f32.mrf.mxu0 }
0x21ed   :  { %v3597_v7 = vmul.f32 0.35355338, %v3593_v30 }
0x21ef   :  { %v3599_v59 = vadd.f32 %v3597_v7, %v5017_v23 }
0x21f1   :  { %v3603_v9 = vsel %vm461_vm7, %v3599_v59, -inf }
0x21f2   :  { %3604 = vmax.xlane.f32.xlu0 %v3603_v9 }
0x21fa   :  { %3515 = vadd.xlane.f32.xlu0 %v3514_v49 }
0x2202   :  { %3518 = vadd.xlane.f32.xlu0 %v3517_v16 }
0x225d   :  { %v3602_v34 = vpop.xlane.xlu0 %3601 }
0x225e   :  { %v3606_v57 = vsub.f32 %v3598_v13, %v3602_v34  ;;  %v4304_v13 = vld [vmem:[%s6402_s18 + $0x3c] sm:$0xf] }
0x2260   :  { %v3608_v15 = vmul.f32 1.442695, %v3606_v57 }
0x2262   :  { %4679 = vpow2.f32 %v3608_v15 }
0x2265   :  { %v3605_v23 = vpop.xlane.xlu0 %3604 }
0x2266   :  { %v3607_v60 = vsub.f32 %v3599_v59, %v3605_v23  ;;  %v3569_v59 = vperm.slane %v6091_v28, 1  ;;  %v3421_v23 = vadd.f32 %v6060_v12, %v3381_v26 }
0x2268   :  { %v4680_v19 = vpop.eup %4679  ;;  %v3610_v3 = vmul.f32 1.442695, %v3607_v60 }
0x2269   :  { %v3612_v38 = vsel %vm457_vm5, %v4680_v19, 0.0 }
0x226a   :  { %4681 = vpow2.f32 %v3610_v3  ;;  %3613 = vadd.xlane.f32.xlu0 %v3612_v38 }
0x226d   :  { %v3516_v41 = vpop.xlane.xlu0 %3515 }
0x226e   :  { %4683 = vrcp.f32 %v3516_v41 }
0x2270   :  { %v4682_v2 = vpop.eup %4681 }
0x2271   :  { %v3615_v6 = vsel %vm461_vm7, %v4682_v2, 0.0  ;;  %vm6461_vm7 = vmmov %vm6453_vm11 }
0x2272   :  { %3616 = vadd.xlane.f32.xlu2 %v3615_v6  ;;  %v3553_v31 = vsel %vm6461_vm7, %v4303_v0, 0  ;;  %vm6462_vm11 = vmmov %vm6458_vm9 }
0x2273   :  { %3562 = vmatpush.bf16.msra.mxu3 %v3553_v31  ;;  %vm6463_vm14 = vmmov %vm6461_vm7  ;;  %vm6469_vm7 = vcmask 523264  }
0x2274   :  { %v4684_v62 = vpop.eup %4683  ;;  %v3650_v36 = vsel %vm6463_vm14, %v4304_v13, 0  ;;  %vm6466_vm9 = vmmov %vm6454_vm2 }
0x2275   :  { %v3519_v61 = vpop.xlane.xlu0 %3518  ;;  %v3522_v10 = vmul.f32 %v4684_v62, %v4676_v17  ;;  %3659 = vmatpush.bf16.msra.mxu2 %v3650_v36  ;;  %vm6471_vm14 = vmmov %vm6454_vm2 }
0x2276   :  { %4685 = vrcp.f32 %v3519_v61 }
0x227c   :  { %v4686_v18 = vpop.eup %4685 }
0x227d   :  { %v3523_v37 = vmul.f32 %v4686_v18, %v4678_v29 }
0x227e   :  { %3623 = vrot.lane.b32.xlu0 %v5972_v20, %s4745_s3 }
0x227f   :  { %v3524_v63 = vpack.c.bf16 %v3523_v37, %v3522_v10 }
0x2281   :  { %4382 = vmatmul.msk.bf16.vlgmr.msrb.gmra.mxu2 %vm457_vm5, %v3524_v63 }
0x22dd   :  { %v3614_v42 = vpop.xlane.xlu0 %3613 }
0x22e5   :  { %v3617_v35 = vpop.xlane.xlu2 %3616 }
0x22e6   :  { %4687 = vrcp.f32 %v3617_v35 }
0x22e7   :  { %4689 = vrcp.f32 %v3614_v42  ;;  %v2908_v42 = vperm.slane %v5900_v21, 3  ;;  %v6145_v21 = vadd.f32 %v6058_v48, %v6044_v45 }
0x22ec   :  { %v4688_v1 = vpop.eup %4687 }
0x22ed   :  { %v4690_v25 = vpop.eup %4689  ;;  %v3621_v52 = vmul.f32 %v4688_v1, %v4682_v2 }
0x22ee   :  { %v3620_v40 = vmul.f32 %v4690_v25, %v4680_v19  ;;  %v6102_v19 = vadd.f32 %v3421_v23, %v6046_v56  ;;  %v3717_v23 = vperm.slane %v6091_v28, 5 }
0x22f0   :  { %v3624_v27 = vpop.permute.xlu0 %3623  ;;  %v3622_v32 = vpack.c.bf16 %v3621_v52, %v3620_v40  ;;  %v4490_v52 = vld [vmem:[%s6403_s19 + $0x70] sm:$0xff] }
0x22f1   :  { %v3629_v20 = vsel %vm6462_vm11, %v3624_v27, 0  ;;  %vm6470_vm11 = vmmov %vm6454_vm2 }
0x22f2   :  { %3638 = vmatpush.bf16.msrb.mxu1 %v3629_v20 }
0x22f5   :  { %4385 = vmatmul.msk.bf16.vlgmr.msrb.gmra.mxu1 %vm457_vm5, %v3622_v32  ;;  %vm6465_vm5 = vmmov %vm6454_vm2 }
0x2304   :  { %v3543_v14 = vpop.f32.mrf.mxu2 }
0x230c   :  { %v3545_v39 = vpop.f32.mrf.mxu2 }
0x230d   :  { %v3548_v46 = vpack.c.bf16 %v3545_v39, %v3543_v14 }
0x230f   :  { %4383 = vmatmul.msk.bf16.vlgmr.msra.gmra.mxu3 %vm432_vm3, %v3548_v46 }
0x2372   :  { %v3640_v43 = vpop.f32.mrf.mxu1 }
0x237a   :  { %v3642_v4 = vpop.f32.mrf.mxu1 }
0x237b   :  { %v3645_v30 = vpack.c.bf16 %v3642_v4, %v3640_v43 }
0x237d   :  { %4386 = vmatmul.msk.bf16.vlgmr.msra.gmra.mxu2 %vm432_vm3, %v3645_v30  ;;  %vm6464_vm3 = vmmov %vm6454_vm2 }
0x2392   :  { %v3564_v7 = vpop.f32.mrf.mxu3 }
0x2393   :  { %v3570_v44 = vadd.f32 %v3569_v59, %v3564_v7 }
0x239a   :  { %v3566_v49 = vpop.f32.mrf.mxu3 }
0x239b   :  { %v3571_v16 = vadd.f32 %v3569_v59, %v3566_v49 }
0x2400   :  { %v3661_v9 = vpop.f32.mrf.mxu2 }
0x2401   :  { %v3666_v53 = vadd.f32 %v3661_v9, %v3570_v44 }
0x2403   :  { %v3668_v17 = vadd.f32 %v3666_v53, %v5728_v8  ;;  %v3428_v8 = vsel %vm6465_vm5, %v6102_v19, 0.0  ;;  %vm6473_vm5 = vmmov %vm6454_vm2 }
0x2405   :  { %v3670_v29 = vsel %vm146_vm1, %v3668_v17, 0.0 }
0x2406   :  { %3671 = vadd.xlane.f32.xlu2 %v3670_v29 }
0x2408   :  { %v3663_v34 = vpop.f32.mrf.mxu2 }
0x2409   :  { %v3667_v57 = vadd.f32 %v3663_v34, %v3571_v16  ;;  %v3714_v16 = vperm.slane %v6091_v28, 4 }
0x240b   :  { %v3669_v15 = vadd.f32 %v3667_v57, %v5730_v22  ;;  %v6110_v22 = vld [vmem:[%s6405_s21 + $0x20] sm:$0xff] }
0x240c   :  { %v2535_v24 = vperm.slane %v6110_v22, 4 }
0x240d   :  { %v3673_v60 = vsel %vm6464_vm3, %v3669_v15, 0.0  ;;  %vm6472_vm3 = vmmov %vm6454_vm2 }
0x240e   :  { %3674 = vadd.xlane.f32.xlu1 %v3673_v60  ;;  %v2573_v12 = vadd.f32 %v5831_v51, %v2535_v24  ;;  %v2575_v10 = vadd.f32 %v5833_v58, %v2535_v24  ;;  %v2948_v58 = vadd.f32 %v5989_v54, %v2908_v42 }
0x2410   :  { %v2577_v61 = vadd.f32 %v2573_v12, %v5821_v50  ;;  %v6129_v51 = vadd.f32 %v2575_v10, %v5823_v33  ;;  %v2946_v50 = vadd.f32 %v5983_v11, %v2908_v42  ;;  %v2951_v33 = vadd.f32 %v2948_v58, %v5922_v55  ;;  %v4496_v10 = vld [vmem:[%s6404_s20 + $0xe0] sm:$0xff] }
0x2411   :  { %v3425_v11 = vsel %vm146_vm1, %v6145_v21, 0.0 }
0x2412   :  { %v2579_v37 = vsel %vm146_vm1, %v2577_v61, 0.0  ;;  %v2582_v35 = vsel %vm6466_vm9, %v6129_v51, 0.0  ;;  %v6136_v0 = vadd.f32 %v2946_v50, %v5920_v47  ;;  %v2955_v31 = vsel %vm6467_vm8, %v2951_v33, 0.0  ;;  %v4491_v47 = vld [vmem:[%s6403_s19 + $0x78] sm:$0xff] }
0x2413   :  { %3743 = vmatpush.bf16.msrb.mxu3 %v4491_v47 }
0x2414   :  { %v2952_v1 = vsel %vm146_vm1, %v6136_v0, 0.0 }
0x2416   :  { %3429 = vadd.xlane.f32.xlu1 %v3428_v8 }
0x2417   :  { %3744 = vmatpush.bf16.msrb.mxu3 %v4490_v52 }
0x2479   :  { %v3672_v3 = vpop.xlane.xlu2 %3671 }
0x247a   :  { %v3676_v38 = vmul.f32 %v3672_v3, %v5074_v5 }
0x247c   :  { %v6113_v26 = vsub.f32 %v3668_v17, %v3676_v38 }
0x247e   :  { %v3680_v56 = vmul.f32 %v6113_v26, %v6113_v26 }
0x2480   :  { %v3682_v41 = vsel %vm146_vm1, %v3680_v56, 0.0 }
0x2481   :  { %3683 = vadd.xlane.f32.xlu2 %v3682_v41  ;;  %v3675_v2 = vpop.xlane.xlu1 %3674 }
0x2482   :  { %v3677_v6 = vmul.f32 %v3675_v2, %v5074_v5 }
0x2484   :  { %v6121_v62 = vsub.f32 %v3669_v15, %v3677_v6 }
0x2486   :  { %v3681_v18 = vmul.f32 %v6121_v62, %v6121_v62 }
0x2488   :  { %v3685_v63 = vsel %vm6454_vm2, %v3681_v18, 0.0  ;;  %v4497_v18 = vld [vmem:[%s6404_s20 + $0xe8] sm:$0xff] }
0x2489   :  { %2580 = vadd.xlane.f32.xlu2 %v2579_v37  ;;  %3686 = vadd.xlane.f32.xlu0 %v3685_v63  ;;  %v3721_v63 = vperm.slane %v6091_v28, 2 }
0x2491   :  { %2583 = vadd.xlane.f32.xlu2 %v2582_v35 }
0x2499   :  { %2953 = vadd.xlane.f32.xlu2 %v2952_v1 }
0x24a1   :  { %2956 = vadd.xlane.f32.xlu2 %v2955_v31  ;;  %v3754_v31 = vperm.slane %v6091_v28, 3 }
0x24a9   :  { %3426 = vadd.xlane.f32.xlu2 %v3425_v11 }
0x24f4   :  { %v3684_v54 = vpop.xlane.xlu2 %3683 }
0x24f5   :  { %v3688_v25 = vmul.f32 %v3684_v54, %v5074_v5 }
0x24f7   :  { %v3690_v55 = vadd.f32 1e-05, %v3688_v25 }
0x24f9   :  { %4691 = vrsqrt.f32 %v3690_v55  ;;  %vm3698_vm6 = vweird.f32 %v3690_v55 }
0x24fc   :  { %v2581_v45 = vpop.xlane.xlu2 %2580  ;;  %v3687_v48 = vpop.xlane.xlu0 %3686 }
0x24fd   :  { %v2585_v27 = vmul.f32 %v2581_v45, %v5074_v5  ;;  %v3689_v40 = vmul.f32 %v3687_v48, %v5074_v5 }
0x24ff   :  { %v4692_v20 = vpop.eup %4691  ;;  %v6158_v32 = vsub.f32 %v2577_v61, %v2585_v27  ;;  %v3691_v14 = vadd.f32 1e-05, %v3689_v40  ;;  %v4499_v61 = vld [vmem:[%s6404_s20 + $0xf8] sm:$0xff] }
0x2500   :  { %v3693_v39 = vmul.f32 %v4692_v20, %v3690_v55  ;;  %vm3699_vm10 = vweird.f32 %v4692_v20  ;;  %3786 = vmatpush.bf16.msra.mxu0 %v4499_v61 }
0x2501   :  { %4693 = vrsqrt.f32 %v3691_v14  ;;  %v2589_v46 = vmul.f32 %v6158_v32, %v6158_v32  ;;  %vm3700_vm12 = vmor %vm3698_vm6, %vm3699_vm10  ;;  %vm3708_vm15 = vweird.f32 %v3691_v14 }
0x2502   :  { %v3694_v13 = vmul.f32 %v4692_v20, %v3693_v39 }
0x2503   :  { %v2591_v36 = vsel %vm146_vm1, %v2589_v46, 0.0 }
0x2504   :  { %v3695_v43 = vmul.f32 0.5, %v3694_v13  ;;  %v2584_v4 = vpop.xlane.xlu2 %2583  ;;  %2592 = vadd.xlane.f32.xlu1 %v2591_v36 }
0x2505   :  { %v2586_v47 = vmul.f32 %v2584_v4, %v5074_v5 }
0x2506   :  { %v3696_v30 = vsub.f32 1.5, %v3695_v43  ;;  %v3430_v43 = vpop.xlane.xlu1 %3429 }
0x2507   :  { %v4694_v7 = vpop.eup %4693  ;;  %v6191_v55 = vsub.f32 %v6129_v51, %v2586_v47  ;;  %v3432_v4 = vmul.f32 %v3430_v43, %v5074_v5 }
0x2508   :  { %v3697_v59 = vmul.f32 %v4692_v20, %v3696_v30  ;;  %v3703_v44 = vmul.f32 %v4694_v7, %v3691_v14  ;;  %vm3709_vm0 = vweird.f32 %v4694_v7 }
0x2509   :  { %vm3710_vm4 = vmor %vm3708_vm15, %vm3709_vm0  ;;  %v2590_v14 = vmul.f32 %v6191_v55, %v6191_v55 }
0x250a   :  { %v3704_v9 = vmul.f32 %v4694_v7, %v3703_v44  ;;  %v3701_v53 = vsel %vm3700_vm12, %v4692_v20, %v3697_v59 }
0x250b   :  { %v3712_v34 = vmul.f32 %v3701_v53, %v6113_v26  ;;  %v2594_v36 = vsel %vm6471_vm14, %v2590_v14, 0.0 }
0x250c   :  { %v3705_v17 = vmul.f32 0.5, %v3704_v9  ;;  %v2954_v49 = vpop.xlane.xlu2 %2953 }
0x250d   :  { %v3715_v60 = vmul.f32 %v3714_v16, %v3712_v34  ;;  %v2958_v27 = vmul.f32 %v2954_v49, %v5074_v5 }
0x250e   :  { %v3706_v29 = vsub.f32 1.5, %v3705_v17 }
0x250f   :  { %v3718_v56 = vadd.f32 %v3717_v23, %v3715_v60  ;;  %v6199_v46 = vsub.f32 %v6136_v0, %v2958_v27  ;;  %v6212_v0 = vsub.f32 %v6102_v19, %v3432_v4 }
0x2510   :  { %v3707_v57 = vmul.f32 %v4694_v7, %v3706_v29 }
0x2511   :  { %v2962_v30 = vmul.f32 %v6199_v46, %v6199_v46  ;;  %v3436_v44 = vmul.f32 %v6212_v0, %v6212_v0 }
0x2512   :  { %v3711_v15 = vsel %vm3710_vm4, %v4694_v7, %v3707_v57 }
0x2513   :  { %v3713_v8 = vmul.f32 %v3711_v15, %v6121_v62  ;;  %v4498_v62 = vld [vmem:[%s6404_s20 + $0xf0] sm:$0xff]  ;;  %v3440_v9 = vsel %vm6472_vm3, %v3436_v44, 0.0 }
0x2514   :  { %v2957_v3 = vpop.xlane.xlu2 %2956  ;;  %3787 = vmatpush.bf16.msra.mxu0 %v4498_v62 }
0x2515   :  { %v3716_v38 = vmul.f32 %v3714_v16, %v3713_v8  ;;  %v2959_v24 = vmul.f32 %v2957_v3, %v5074_v5 }
0x2517   :  { %v3719_v12 = vadd.f32 %v3717_v23, %v3716_v38  ;;  %v6168_v41 = vsub.f32 %v2951_v33, %v2959_v24 }
0x2518   :  { %3788 = vmatpush.bf16.msra.mxu0 %v4497_v18 }
0x2519   :  { %v3720_v2 = vpack.c.bf16 %v3719_v12, %v3718_v56  ;;  %v2963_v26 = vmul.f32 %v6168_v41, %v6168_v41 }
0x251b   :  { %4395 = vmatmul.msk.bf16.vlgmr.msrb.gmra.mxu3 %vm146_vm1, %v3720_v2  ;;  %v2967_v6 = vsel %vm6468_vm13, %v2963_v26, 0.0 }
0x251c   :  { %2968 = vadd.xlane.f32.xlu1 %v2967_v6  ;;  %3789 = vmatpush.bf16.msra.mxu0 %v4496_v10  ;;  %v3427_v45 = vpop.xlane.xlu2 %3426 }
0x251d   :  { %v3431_v40 = vmul.f32 %v3427_v45, %v5074_v5 }
0x251f   :  { %v6202_v51 = vsub.f32 %v6145_v21, %v3431_v40  ;;  %v2964_v21 = vsel %vm146_vm1, %v2962_v30, 0.0 }
0x2521   :  { %v3435_v7 = vmul.f32 %v6202_v51, %v6202_v51 }
0x2523   :  { %v3437_v59 = vsel %vm146_vm1, %v3435_v7, 0.0 }
0x2577   :  { %v2593_v8 = vpop.xlane.xlu1 %2592 }
0x2578   :  { %v2597_v38 = vmul.f32 %v2593_v8, %v5074_v5 }
0x257a   :  { %v2599_v2 = vadd.f32 1e-05, %v2597_v38 }
0x257c   :  { %4695 = vrsqrt.f32 %v2599_v2  ;;  %vm2607_vm8 = vweird.f32 %v2599_v2 }
0x258f   :  { %v2969_v26 = vpop.xlane.xlu1 %2968 }
0x2590   :  { %v2971_v62 = vmul.f32 %v2969_v26, %v5074_v5 }
0x259e   :  { %v3746_v37 = vpop.f32.mrf.mxu3 }
0x259f   :  { %v3747_v42 = vadd.f32 %v3746_v37, %v3721_v63 }
0x25a1   :  { %v3751_v58 = vmax.f32 %v3747_v42, 0.0 }
0x25a6   :  { %v3748_v50 = vpop.f32.mrf.mxu3 }
0x25a7   :  { %v3749_v35 = vadd.f32 %v3748_v50, %v3721_v63  ;;  %v6240_v63 = vadd.f32 1e-05, %v2971_v62  ;;  %v6244_v50 = vpop.eup %4695  ;;  %v6311_v62 = vld [vmem:[%s6405_s21 + $0x28] sm:$0xff] }
0x25a8   :  { %vm2608_vm2 = vweird.f32 %v6244_v50 }
0x25a9   :  { %v3752_v1 = vmax.f32 %v3749_v35, 0.0  ;;  %vm6288_vm6 = vmor %vm2607_vm8, %vm2608_vm2 }
0x25ab   :  { %v3753_v33 = vpack.c.bf16 %v3752_v1, %v3751_v58 }
0x25ad   :  { %4412 = vmatmul.msk.bf16.vlgmr.msra.gmra.mxu0 %vm6469_vm7, %v3753_v33  ;;  %v2602_v33 = vmul.f32 %v6244_v50, %v2599_v2 }
0x25af   :  { %v2603_v47 = vmul.f32 %v6244_v50, %v2602_v33 }
0x25b1   :  { %v2604_v40 = vmul.f32 0.5, %v2603_v47 }
0x25b3   :  { %v2605_v30 = vsub.f32 1.5, %v2604_v40 }
0x262a   :  { %v3791_v11 = vpop.f32.mrf.mxu0 }
0x262b   :  { %v3792_v54 = vadd.f32 %v3791_v11, %v3754_v31 }
0x262d   :  { %v3796_v25 = vadd.f32 %v3792_v54, %v3718_v56 }
0x262f   :  { %v3798_v52 = vsel %vm146_vm1, %v3796_v25, 0.0 }
0x2630   :  { %3799 = vadd.xlane.f32.xlu0 %v3798_v52 }
0x2632   :  { %v3793_v48 = vpop.f32.mrf.mxu0 }
0x2633   :  { %v3794_v20 = vadd.f32 %v3793_v48, %v3754_v31 }
0x2635   :  { %v3797_v39 = vadd.f32 %v3794_v20, %v3719_v12 }
0x2637   :  { %v3801_v13 = vsel %vm6470_vm11, %v3797_v39, 0.0 }
0x2638   :  { %3802 = vadd.xlane.f32.xlu2 %v3801_v13  ;;  %2595 = vadd.xlane.f32.xlu0 %v2594_v36 }
0x2640   :  { %2965 = vadd.xlane.f32.xlu2 %v2964_v21  ;;  %3438 = vadd.xlane.f32.xlu0 %v3437_v59 }
0x2648   :  { %3441 = vadd.xlane.f32.xlu2 %v3440_v9 }
0x26a3   :  { %v3800_v53 = vpop.xlane.xlu0 %3799 }
0x26a4   :  { %v3804_v17 = vmul.f32 %v3800_v53, %v5074_v5 }
0x26a6   :  { %v6220_v49 = vsub.f32 %v3796_v25, %v3804_v17  ;;  %v2606_v17 = vmul.f32 %v6244_v50, %v2605_v30 }
0x26a8   :  { %v3808_v19 = vmul.f32 %v6220_v49, %v6220_v49  ;;  %v2610_v38 = vsel %vm6288_vm6, %v6244_v50, %v2606_v17 }
0x26a9   :  { %v2621_v33 = vmul.f32 %v2610_v38, %v6158_v32 }
0x26aa   :  { %v3810_v29 = vsel %vm146_vm1, %v3808_v19, 0.0 }
0x26ab   :  { %v3803_v16 = vpop.xlane.xlu2 %3802  ;;  %3811 = vadd.xlane.f32.xlu1 %v3810_v29  ;;  %v2596_v60 = vpop.xlane.xlu0 %2595 }
0x26ac   :  { %v3805_v34 = vmul.f32 %v3803_v16, %v5074_v5  ;;  %v2598_v10 = vmul.f32 %v2596_v60, %v5074_v5 }
0x26ae   :  { %v6226_v57 = vsub.f32 %v3797_v39, %v3805_v34  ;;  %v6242_v42 = vadd.f32 1e-05, %v2598_v10  ;;  %v2996_v10 = vperm.slane %v6311_v62, 6 }
0x26b0   :  { %v3809_v15 = vmul.f32 %v6226_v57, %v6226_v57  ;;  %vm2617_vm14 = vweird.f32 %v6242_v42 }
0x26b2   :  { %v3813_v23 = vsel %vm6473_vm5, %v3809_v15, 0.0 }
0x26b3   :  { %3814 = vadd.xlane.f32.xlu0 %v3813_v23  ;;  %v2966_v3 = vpop.xlane.xlu2 %2965  ;;  %v3439_v24 = vpop.xlane.xlu0 %3438 }
0x26b4   :  { %v2970_v56 = vmul.f32 %v2966_v3, %v5074_v5  ;;  %v3443_v12 = vmul.f32 %v3439_v24, %v5074_v5 }
0x26b6   :  { %v2972_v6 = vadd.f32 1e-05, %v2970_v56  ;;  %v6234_v61 = vadd.f32 1e-05, %v3443_v12 }
0x26b8   :  { %4697 = vrsqrt.f32 %v2972_v6  ;;  %vm2980_vm10 = vweird.f32 %v2972_v6  ;;  %vm3453_vm15 = vweird.f32 %v6234_v61 }
0x26b9   :  { %4699 = vrsqrt.f32 %v6234_v61 }
0x26ba   :  { %4701 = vrsqrt.f32 %v6240_v63 }
0x26bb   :  { %v3442_v18 = vpop.xlane.xlu2 %3441  ;;  %4703 = vrsqrt.f32 %v6242_v42 }
0x26bc   :  { %v3444_v37 = vmul.f32 %v3442_v18, %v5074_v5  ;;  %v2626_v18 = vperm.slane %v6311_v62, 0 }
0x26be   :  { %v6246_v35 = vpop.eup %4697  ;;  %v6248_v58 = vadd.f32 1e-05, %v3444_v37 }
0x26bf   :  { %v6251_v1 = vpop.eup %4699  ;;  %v2975_v31 = vmul.f32 %v6246_v35, %v2972_v6  ;;  %vm2981_vm9 = vweird.f32 %v6246_v35  ;;  %v2623_v6 = vperm.slane %v6110_v22, 7 }
0x26c0   :  { %4705 = vrsqrt.f32 %v6248_v58  ;;  %v3448_v11 = vmul.f32 %v6251_v1, %v6234_v61  ;;  %v6260_v54 = vpop.eup %4701  ;;  %vm3454_vm12 = vweird.f32 %v6251_v1  ;;  %vm6298_vm0 = vmor %vm2980_vm10, %vm2981_vm9  ;;  %v2999_v61 = vperm.slane %v6311_v62, 7 }
0x26c1   :  { %v2976_v25 = vmul.f32 %v6246_v35, %v2975_v31  ;;  %v6263_v52 = vpop.eup %4703  ;;  %v2985_v20 = vmul.f32 %v6260_v54, %v6240_v63  ;;  %vm6317_vm4 = vmor %vm3453_vm15, %vm3454_vm12  ;;  %vm2991_vm13 = vweird.f32 %v6260_v54  ;;  %vm2990_vm9 = vweird.f32 %v6240_v63 }
0x26c2   :  { %v3449_v45 = vmul.f32 %v6251_v1, %v3448_v11  ;;  %v2612_v39 = vmul.f32 %v6263_v52, %v6242_v42  ;;  %vm2618_vm7 = vweird.f32 %v6263_v52  ;;  %vm6349_vm10 = vmor %vm2990_vm9, %vm2991_vm13  ;;  %vm3463_vm6 = vweird.f32 %v6248_v58 }
0x26c3   :  { %v2977_v13 = vmul.f32 0.5, %v2976_v25  ;;  %v2986_v7 = vmul.f32 %v6260_v54, %v2985_v20  ;;  %vm6337_vm5 = vmor %vm2617_vm14, %vm2618_vm7  ;;  %v3472_v63 = vperm.slane %v6091_v28, 0  ;;  %vm6484_vm13 = vcmask 257024  }
0x26c4   :  { %v3450_v43 = vmul.f32 0.5, %v3449_v45  ;;  %v2613_v21 = vmul.f32 %v6263_v52, %v2612_v39 }
0x26c5   :  { %v2978_v59 = vsub.f32 1.5, %v2977_v13  ;;  %v2987_v19 = vmul.f32 0.5, %v2986_v7  ;;  %v3842_v13 = vperm.slane %v6091_v28, 6  ;;  %v3845_v7 = vperm.slane %v6091_v28, 7 }
0x26c6   :  { %v6266_v27 = vpop.eup %4705  ;;  %v3451_v44 = vsub.f32 1.5, %v3450_v43  ;;  %v2614_v16 = vmul.f32 0.5, %v2613_v21 }
0x26c7   :  { %v3458_v4 = vmul.f32 %v6266_v27, %v6248_v58  ;;  %v2979_v34 = vmul.f32 %v6246_v35, %v2978_v59  ;;  %v2988_v24 = vsub.f32 1.5, %v2987_v19  ;;  %vm3464_vm3 = vweird.f32 %v6266_v27 }
0x26c8   :  { %v3452_v8 = vmul.f32 %v6251_v1, %v3451_v44  ;;  %v2615_v12 = vsub.f32 1.5, %v2614_v16  ;;  %vm3465_vm12 = vmor %vm3463_vm6, %vm3464_vm3 }
0x26c9   :  { %v3459_v9 = vmul.f32 %v6266_v27, %v3458_v4  ;;  %v2983_v2 = vsel %vm6298_vm0, %v6246_v35, %v2979_v34  ;;  %v2989_v11 = vmul.f32 %v6260_v54, %v2988_v24 }
0x26ca   :  { %v3456_v22 = vsel %vm6317_vm4, %v6251_v1, %v3452_v8  ;;  %v2994_v31 = vmul.f32 %v2983_v2, %v6199_v46  ;;  %v2616_v47 = vmul.f32 %v6263_v52, %v2615_v12  ;;  %v4716_v1 = vld [vmem:[%s6405_s21 + $0x30] sm:$0xff]  ;;  %s4753_s21 = smov [#allocation2]  }
0x26cb   :  { %v3460_v3 = vmul.f32 0.5, %v3459_v9  ;;  %v3469_v32 = vperm.slane %v4716_v1, 7  ;;  %v2993_v59 = vsel %vm6349_vm10, %v6260_v54, %v2989_v11  ;;  %s3858_s17 = sshll.u32 %s4753_s21, 4  ;;  %s3859_s17 = int_to_ptr.vmem [resolvable:$true] %s3858_s17 }
0x26cc   :  { %v2997_v39 = vmul.f32 %v2996_v10, %v2994_v31  ;;  %v2995_v28 = vmul.f32 %v2993_v59, %v6168_v41 }
0x26cd   :  { %v3461_v50 = vsub.f32 1.5, %v3460_v3 }
0x26ce   :  { %v3000_v9 = vadd.f32 %v2999_v61, %v2997_v39  ;;  %v2998_v60 = vmul.f32 %v2996_v10, %v2995_v28 }
0x26cf   :  { %v3462_v40 = vmul.f32 %v6266_v27, %v3461_v50 }
0x271e   :  { %v3812_v48 = vpop.xlane.xlu1 %3811 }
0x271f   :  { %v3816_v14 = vmul.f32 %v3812_v48, %v5074_v5  ;;  %v3467_v48 = vmul.f32 %v3456_v22, %v6202_v51 }
0x2721   :  { %v6273_v36 = vadd.f32 1e-05, %v3816_v14  ;;  %v2624_v14 = vmul.f32 %v2623_v6, %v2621_v33  ;;  %v3470_v30 = vmul.f32 %v3469_v32, %v3467_v48 }
0x2723   :  { %4707 = vrsqrt.f32 %v6273_v36  ;;  %vm3826_vm2 = vweird.f32 %v6273_v36  ;;  %v2627_v17 = vadd.f32 %v2626_v18, %v2624_v14 }
0x2726   :  { %v3815_v53 = vpop.xlane.xlu0 %3814 }
0x2727   :  { %v3817_v29 = vmul.f32 %v3815_v53, %v5074_v5 }
0x2729   :  { %v4708_v15 = vpop.eup %4707  ;;  %v6286_v23 = vadd.f32 1e-05, %v3817_v29 }
0x272a   :  { %v3821_v5 = vmul.f32 %v4708_v15, %v6273_v36  ;;  %vm3827_vm11 = vweird.f32 %v4708_v15  ;;  %v2620_v36 = vsel %vm6337_vm5, %v6263_v52, %v2616_v47  ;;  %v3466_v52 = vsel %vm3465_vm12, %v6266_v27, %v3462_v40 }
0x272b   :  { %4709 = vrsqrt.f32 %v6286_v23  ;;  %vm3828_vm8 = vmor %vm3826_vm2, %vm3827_vm11  ;;  %v2622_v58 = vmul.f32 %v2620_v36, %v6191_v55  ;;  %v3468_v29 = vmul.f32 %v3466_v52, %v6212_v0  ;;  %vm3836_vm15 = vweird.f32 %v6286_v23 }
0x272c   :  { %v3822_v26 = vmul.f32 %v4708_v15, %v3821_v5  ;;  %v3002_v55 = vadd.f32 %v3000_v9, %v2627_v17  ;;  %v3001_v0 = vadd.f32 %v2999_v61, %v2998_v60 }
0x272d   :  { %v2625_v27 = vmul.f32 %v2623_v6, %v2622_v58  ;;  %v3471_v8 = vmul.f32 %v3469_v32, %v3468_v29 }
0x272e   :  { %v3823_v35 = vmul.f32 0.5, %v3822_v26 }
0x272f   :  { %v2628_v41 = vadd.f32 %v2626_v18, %v2625_v27 }
0x2730   :  { %v3824_v25 = vsub.f32 1.5, %v3823_v35 }
0x2731   :  { %v4710_v45 = vpop.eup %4709  ;;  %v3003_v56 = vadd.f32 %v3001_v0, %v2628_v41 }
0x2732   :  { %v3825_v20 = vmul.f32 %v4708_v15, %v3824_v25  ;;  %v3831_v42 = vmul.f32 %v4710_v45, %v6286_v23  ;;  %vm3837_vm0 = vweird.f32 %v4710_v45  ;;  %v3474_v23 = vadd.f32 %v3472_v63, %v3471_v8 }
0x2733   :  { %vm3838_vm4 = vmor %vm3836_vm15, %vm3837_vm0 }
0x2734   :  { %v3829_v43 = vsel %vm3828_vm8, %v4708_v15, %v3825_v20  ;;  %v3832_v4 = vmul.f32 %v4710_v45, %v3831_v42 }
0x2735   :  { %v3840_v21 = vmul.f32 %v3829_v43, %v6220_v49  ;;  %v3473_v49 = vadd.f32 %v3472_v63, %v3470_v30 }
0x2736   :  { %v3833_v44 = vmul.f32 0.5, %v3832_v4 }
0x2737   :  { %v3843_v53 = vmul.f32 %v3842_v13, %v3840_v21 }
0x2738   :  { %v3834_v19 = vsub.f32 1.5, %v3833_v44 }
0x2739   :  { %v3846_v54 = vadd.f32 %v3845_v7, %v3843_v53 }
0x273a   :  { %v3835_v16 = vmul.f32 %v4710_v45, %v3834_v19 }
0x273b   :  { %v3848_v34 = vadd.f32 %v3846_v54, %v3473_v49 }
0x273c   :  { %v3839_v15 = vsel %vm3838_vm4, %v4710_v45, %v3835_v16 }
0x273d   :  { %v3841_v3 = vmul.f32 %v3839_v15, %v6226_v57  ;;  %v3850_v5 = vadd.f32 %v3848_v34, %v3002_v55 }
0x273f   :  { %v3844_v38 = vmul.f32 %v3842_v13, %v3841_v3  ;;  %3852 = vst.msk [vmem:[#allocation2] sm:$0xff] %vm146_vm1, %v3850_v5 }
0x2741   :  { %v3847_v24 = vadd.f32 %v3845_v7, %v3844_v38 }
0x2743   :  { %v3849_v57 = vadd.f32 %v3847_v24, %v3474_v23 }
0x2745   :  { %v3851_v12 = vadd.f32 %v3849_v57, %v3003_v56 }
0x2747   :  { %3853 = vst.msk [vmem:[#allocation2 + $0x8] sm:$0xf] %vm6484_vm13, %v3851_v12 }
0x2748   :  { %3866 = dma.vmem_to_hbm [thread:$0]  %s3859_s17, 256, %s3861_s5, [#allocation3], %s4754_s7, %s4754_s7, %s4755_s6  }
0x2749   :  { %4741 = dma.done.wait [#allocation3], 256  }
0x274a   :  { %4742 = vsyncadd [#allocation3], 4294967040 }
0x274b   :  { %3871 = vsyncpa [#allocation3], 1 }

</bundles_post_ra>
